<compile_context>
chip_gen: v7x
topology: tpu7x:2x2x1
jax: 0.10.0
libtpu: 0.0.40
codegen_flags: <defaults>
</compile_context>

<pallas_src>
import functools
import math

import jax
import jax.numpy as jnp
from jax.experimental import pallas as pl
from jax.experimental.pallas import tpu as pltpu

LANE = 128       # lane width
ROW_CAP = 512    # max rows per tile (keeps >=2 grid steps on the big layers)


def _round_up(x, m):
    return (x + m - 1) // m * m


def _choose_tile(M):
    """Adaptive row tile: multiple of 8, <= ROW_CAP, minimal row padding."""
    ntiles = max(1, -(-M // ROW_CAP))
    tm = _round_up(-(-M // ntiles), 8)
    return tm, tm * ntiles, ntiles


# ----------------------------- Pallas kernels -------------------------------
def _mm_kernel(x_ref, w_ref, b_ref, o_ref, *, relu_in):
    x = x_ref[...]                                   # bf16 (TM, Kp)
    if relu_in:
        x = jnp.maximum(x, jnp.zeros_like(x))        # fused pre-activation
    acc = jnp.dot(x, w_ref[...], preferred_element_type=jnp.float32)
    acc = acc + b_ref[...]                           # f32 epilogue
    o_ref[...] = acc.astype(o_ref.dtype)


def _mm_res_kernel(x_ref, w_ref, b_ref, r_ref, o_ref, *, relu_in):
    x = x_ref[...]
    if relu_in:
        x = jnp.maximum(x, jnp.zeros_like(x))
    acc = jnp.dot(x, w_ref[...], preferred_element_type=jnp.float32)
    acc = acc + b_ref[...] + r_ref[...].astype(jnp.float32)   # bias + shortcut
    o_ref[...] = acc.astype(o_ref.dtype)


def matmul_bias(x, wp, bp, *, n, relu_in=False, residual=None,
                out_dtype=jnp.bfloat16):
    """o = [relu](x) @ W + b [+ residual].

    x: (M, K) any float; wp: pre-padded (Kp, Np) bf16; bp: (1, Np) f32;
    residual: optional (M, n).  Returns (M, n) out_dtype.
    """
    M, K = x.shape
    Kp, Np = wp.shape
    tm, Mp, ntiles = _choose_tile(M)

    xp = jnp.pad(x.astype(jnp.bfloat16), ((0, Mp - M), (0, Kp - K)))
    args = [xp, wp, bp]
    in_specs = [
        pl.BlockSpec((tm, Kp), lambda i: (i, 0)),
        pl.BlockSpec((Kp, Np), lambda i: (0, 0)),
        pl.BlockSpec((1, Np), lambda i: (0, 0)),
    ]
    if residual is not None:
        rp = jnp.pad(residual.astype(jnp.bfloat16), ((0, Mp - M), (0, Np - n)))
        args.append(rp)
        in_specs.append(pl.BlockSpec((tm, Np), lambda i: (i, 0)))
        kernel = functools.partial(_mm_res_kernel, relu_in=relu_in)
    else:
        kernel = functools.partial(_mm_kernel, relu_in=relu_in)

    out = pl.pallas_call(
        kernel,
        out_shape=jax.ShapeDtypeStruct((Mp, Np), out_dtype),
        grid_spec=pltpu.PrefetchScalarGridSpec(
            num_scalar_prefetch=0,
            grid=(ntiles,),
            in_specs=in_specs,
            out_specs=pl.BlockSpec((tm, Np), lambda i: (i, 0)),
        ),
        compiler_params=pltpu.CompilerParams(dimension_semantics=("parallel",)),
    )(*args)
    return out[:M, :n]


# ------------------------------ JAX glue ------------------------------------
def _im2col(x, kh, kw, stride, padding):
    """x: (B, H, W, C). Returns ((B*Ho*Wo, kh*kw*C), (B, Ho, Wo)).

    Column ordering is (di, dj, c), matching the weight prep in init.
    """
    B, H, W, C = x.shape
    xp = jnp.pad(x, ((0, 0), (padding, padding), (padding, padding), (0, 0)))
    Hp, Wp = H + 2 * padding, W + 2 * padding
    Ho = (Hp - kh) // stride + 1
    Wo = (Wp - kw) // stride + 1
    cols = []
    for di in range(kh):
        for dj in range(kw):
            cols.append(xp[:, di:di + stride * (Ho - 1) + 1:stride,
                           dj:dj + stride * (Wo - 1) + 1:stride, :])
    p = jnp.concatenate(cols, axis=-1)            # (B, Ho, Wo, kh*kw*C)
    return p.reshape(B * Ho * Wo, kh * kw * C), (B, Ho, Wo)


def conv2d(x, layer, *, relu_in=False, residual=None, out_dtype=jnp.bfloat16):
    cols, (B, Ho, Wo) = _im2col(x, layer["kh"], layer["kw"],
                                layer["stride"], layer["pad"])
    res = None
    if residual is not None:
        res = residual.reshape(B * Ho * Wo, layer["n"])
    y = matmul_bias(cols, layer["wp"], layer["bp"], n=layer["n"],
                    relu_in=relu_in, residual=res, out_dtype=out_dtype)
    return y.reshape(B, Ho, Wo, layer["n"])


def residual_block(t, blk):
    if blk["resample"] is None:
        # shortcut = identity; out = t + conv2(relu(conv1(relu(t))))
        r1 = conv2d(t, blk["conv1"], relu_in=True)
        return conv2d(r1, blk["conv2"], relu_in=True, residual=t)
    else:  # 'down'
        sc = conv2d(t, blk["shortcut"], relu_in=False)
        r1 = conv2d(t, blk["conv1"], relu_in=True)
        return conv2d(r1, blk["conv2"], relu_in=True, residual=sc)


# --------------------------- parameter init ---------------------------------
def _prep_conv(kw_key, kb_key, cout, cin, k, stride, pad):
    """PyTorch-style init; weights pre-reshaped/pre-padded to MXU layout."""
    fan_in = cin * k * k
    scale = 1.0 / math.sqrt(fan_in)
    w = jax.random.uniform(kw_key, (cout, cin, k, k), jnp.float32, -scale, scale)
    b = jax.random.uniform(kb_key, (cout,), jnp.float32, -scale, scale)
    wmat = jnp.transpose(w, (2, 3, 1, 0)).reshape(k * k * cin, cout)
    Kp, Np = _round_up(k * k * cin, LANE), _round_up(cout, LANE)
    wp = jnp.pad(wmat, ((0, Kp - k * k * cin), (0, Np - cout))).astype(jnp.bfloat16)
    bp = jnp.pad(b, (0, Np - cout)).reshape(1, Np).astype(jnp.float32)
    return dict(wp=wp, bp=bp, n=cout, kh=k, kw=k, stride=stride, pad=pad)


def _prep_linear(kw_key, kb_key, out_f, C, H, W):
    """Linear over PyTorch's NCHW flattening; rows reordered to NHWC at init."""
    in_f = C * H * W
    scale = 1.0 / math.sqrt(in_f)
    w = jax.random.uniform(kw_key, (out_f, in_f), jnp.float32, -scale, scale)
    b = jax.random.uniform(kb_key, (out_f,), jnp.float32, -scale, scale)
    wmat = jnp.transpose(w.reshape(out_f, C, H, W), (2, 3, 1, 0)).reshape(in_f, out_f)
    Kp, Np = _round_up(in_f, LANE), _round_up(out_f, LANE)
    wp = jnp.pad(wmat, ((0, Kp - in_f), (0, Np - out_f))).astype(jnp.bfloat16)
    bp = jnp.pad(b, (0, Np - out_f)).reshape(1, Np).astype(jnp.float32)
    return dict(wp=wp, bp=bp, n=out_f)


def init_params(key, *, channels_multiplier, context_features):
    cm = channels_multiplier
    keys = iter(jax.random.split(key, 64))
    # Initial 1x1 conv, cin=1: kept as an elementwise affine (K=1 is MXU-hostile).
    init_w = jax.random.uniform(next(keys), (cm,), jnp.float32, -1.0, 1.0)
    init_b = jax.random.uniform(next(keys), (cm,), jnp.float32, -1.0, 1.0)

    blocks = []
    for cin, resample in [(cm, None), (cm, "down"),
                          (2 * cm, None), (2 * cm, "down"),
                          (4 * cm, None), (4 * cm, "down")]:
        blk = {"resample": resample}
        blk["conv1"] = _prep_conv(next(keys), next(keys), cin, cin, 3, 1, 1)
        if resample is None:
            blk["conv2"] = _prep_conv(next(keys), next(keys), cin, cin, 3, 1, 1)
        else:
            blk["shortcut"] = _prep_conv(next(keys), next(keys), 2 * cin, cin, 3, 2, 1)
            blk["conv2"] = _prep_conv(next(keys), next(keys), 2 * cin, cin, 3, 2, 1)
        blocks.append(blk)

    final = _prep_linear(next(keys), next(keys), context_features, 8 * cm, 4, 4)
    return dict(init_w=init_w, init_b=init_b, blocks=blocks, final=final)


# ------------------------------- forward ------------------------------------
def conv_encoder_forward(x_nchw, params):
    """x_nchw: (B, 1, 28, 28) f32. Returns (B, context_features) f32."""
    x = jnp.transpose(x_nchw, (0, 2, 3, 1))                    # NHWC
    # initial 1x1 conv (cin=1): per-pixel affine, bf16 activations afterwards
    t = (x * params["init_w"] + params["init_b"]).astype(jnp.bfloat16)
    for blk in params["blocks"]:
        t = residual_block(t, blk)
    B, H, W, C = t.shape                                       # (B, 4, 4, 8*cm)
    feats = t.reshape(B, H * W * C)                            # matches reordered linear
    fin = params["final"]
    # final ReLU fused into the linear kernel's input path
    return matmul_bias(feats, fin["wp"], fin["bp"], n=fin["n"],
                       relu_in=True, out_dtype=jnp.float32)


# --------------------------------- main --------------------------------------
if __name__ == "__main__":
    key = jax.random.PRNGKey(0)
    batch, channels_multiplier, context_features = 2, 4, 8

    x = jax.random.normal(jax.random.fold_in(key, 1),
                          (batch, 1, 28, 28), jnp.float32)
    params = init_params(jax.random.fold_in(key, 2),
                         channels_multiplier=channels_multiplier,
                         context_features=context_features)

    fwd = jax.jit(lambda inp: conv_encoder_forward(inp, params))
    out = jax.block_until_ready(fwd(x))

    assert out.shape == (batch, context_features), out.shape
    assert jnp.all(jnp.isfinite(out))
    print("KERNEL_OK")
</pallas_src>

<mosaic_0001>
module attributes {stable_mosaic.version = 11 : i64} {
  func.func @_mm_kernel(%arg0: i32, %arg1: memref<392x128xbf16, #tpu.memory_space<vmem>>, %arg2: memref<128x128xbf16, #tpu.memory_space<vmem>>, %arg3: memref<1x128xf32, #tpu.memory_space<vmem>>, %arg4: memref<392x128xbf16, #tpu.memory_space<vmem>>) attributes {dimension_semantics = [#tpu.dimension_semantics<parallel>], iteration_bounds = array<i64: 4>, scalar_prefetch = 0 : i64, scratch_operands = 0 : i64, tpu.core_type = #tpu.core_type<tc>, window_params = [{transform_indices = @transform_0, window_bounds = array<i64: 392, 128>}, {pipeline_mode = #tpu.pipeline_mode<synchronous>, transform_indices = @transform_1, window_bounds = array<i64: 128, 128>}, {pipeline_mode = #tpu.pipeline_mode<synchronous>, transform_indices = @transform_2, window_bounds = array<i64: 1, 128>}, {transform_indices = @transform_3, window_bounds = array<i64: 392, 128>}]} {
    %c0 = arith.constant 0 : index
    %c0_0 = arith.constant 0 : index
    %0 = vector.load %arg1[%c0, %c0_0] : memref<392x128xbf16, #tpu.memory_space<vmem>>, vector<392x128xbf16>
    %cst = arith.constant 0.000000e+00 : bf16
    %1 = vector.broadcast %cst : bf16 to vector<392x128xbf16>
    %2 = arith.maximumf %0, %1 : vector<392x128xbf16>
    %c0_1 = arith.constant 0 : index
    %c0_2 = arith.constant 0 : index
    %3 = vector.load %arg2[%c0_1, %c0_2] : memref<128x128xbf16, #tpu.memory_space<vmem>>, vector<128x128xbf16>
    %cst_3 = arith.constant dense<0.000000e+00> : vector<392x128xf32>
    %4 = tpu.matmul %2, %3, %cst_3 {dimension_numbers = #tpu.dot_dimension_numbers<[1], [0], [0], [1], [0, 0, 1, 1], [], []>} : vector<392x128xbf16>, vector<128x128xbf16>, vector<392x128xf32> -> vector<392x128xf32>
    %c0_4 = arith.constant 0 : index
    %c0_5 = arith.constant 0 : index
    %5 = vector.load %arg3[%c0_4, %c0_5] : memref<1x128xf32, #tpu.memory_space<vmem>>, vector<1x128xf32>
    %6 = vector.broadcast %5 : vector<1x128xf32> to vector<392x128xf32>
    %7 = arith.addf %4, %6 : vector<392x128xf32>
    %8 = arith.truncf %7 : vector<392x128xf32> to vector<392x128xbf16>
    %c0_6 = arith.constant 0 : index
    %c0_7 = arith.constant 0 : index
    %9 = vector.load %arg4[%c0_6, %c0_7] : memref<392x128xbf16, #tpu.memory_space<vmem>>, vector<392x128xbf16>
    tpu.vector_store %arg4[%c0_6, %c0_7], %8 {strides = array<i32>} : memref<392x128xbf16, #tpu.memory_space<vmem>>, vector<392x128xbf16>,
    return
  }
  func.func @transform_0(%arg0: i32) -> (i32, i32) {
    %c0_i32 = arith.constant 0 : i32
    %c0_i32_0 = arith.constant 0 : i32
    return %arg0, %c0_i32 : i32, i32
  }
  func.func @transform_1(%arg0: i32) -> (i32, i32) {
    %c0_i32 = arith.constant 0 : i32
    %c0_i32_0 = arith.constant 0 : i32
    %c0_i32_1 = arith.constant 0 : i32
    return %c0_i32, %c0_i32_0 : i32, i32
  }
  func.func @transform_2(%arg0: i32) -> (i32, i32) {
    %c0_i32 = arith.constant 0 : i32
    %c0_i32_0 = arith.constant 0 : i32
    %c0_i32_1 = arith.constant 0 : i32
    return %c0_i32, %c0_i32_0 : i32, i32
  }
  func.func @transform_3(%arg0: i32) -> (i32, i32) {
    %c0_i32 = arith.constant 0 : i32
    %c0_i32_0 = arith.constant 0 : i32
    return %arg0, %c0_i32 : i32, i32
  }
}

module attributes {stable_mosaic.version = 11 : i64} {
  func.func @_mm_res_kernel(%arg0: i32, %arg1: memref<392x128xbf16, #tpu.memory_space<vmem>>, %arg2: memref<128x128xbf16, #tpu.memory_space<vmem>>, %arg3: memref<1x128xf32, #tpu.memory_space<vmem>>, %arg4: memref<392x128xbf16, #tpu.memory_space<vmem>>, %arg5: memref<392x128xbf16, #tpu.memory_space<vmem>>) attributes {dimension_semantics = [#tpu.dimension_semantics<parallel>], iteration_bounds = array<i64: 4>, scalar_prefetch = 0 : i64, scratch_operands = 0 : i64, tpu.core_type = #tpu.core_type<tc>, window_params = [{transform_indices = @transform_0, window_bounds = array<i64: 392, 128>}, {pipeline_mode = #tpu.pipeline_mode<synchronous>, transform_indices = @transform_1, window_bounds = array<i64: 128, 128>}, {pipeline_mode = #tpu.pipeline_mode<synchronous>, transform_indices = @transform_2, window_bounds = array<i64: 1, 128>}, {transform_indices = @transform_3, window_bounds = array<i64: 392, 128>}, {transform_indices = @transform_4, window_bounds = array<i64: 392, 128>}]} {
    %c0 = arith.constant 0 : index
    %c0_0 = arith.constant 0 : index
    %0 = vector.load %arg1[%c0, %c0_0] : memref<392x128xbf16, #tpu.memory_space<vmem>>, vector<392x128xbf16>
    %cst = arith.constant 0.000000e+00 : bf16
    %1 = vector.broadcast %cst : bf16 to vector<392x128xbf16>
    %2 = arith.maximumf %0, %1 : vector<392x128xbf16>
    %c0_1 = arith.constant 0 : index
    %c0_2 = arith.constant 0 : index
    %3 = vector.load %arg2[%c0_1, %c0_2] : memref<128x128xbf16, #tpu.memory_space<vmem>>, vector<128x128xbf16>
    %cst_3 = arith.constant dense<0.000000e+00> : vector<392x128xf32>
    %4 = tpu.matmul %2, %3, %cst_3 {dimension_numbers = #tpu.dot_dimension_numbers<[1], [0], [0], [1], [0, 0, 1, 1], [], []>} : vector<392x128xbf16>, vector<128x128xbf16>, vector<392x128xf32> -> vector<392x128xf32>
    %c0_4 = arith.constant 0 : index
    %c0_5 = arith.constant 0 : index
    %5 = vector.load %arg3[%c0_4, %c0_5] : memref<1x128xf32, #tpu.memory_space<vmem>>, vector<1x128xf32>
    %6 = vector.broadcast %5 : vector<1x128xf32> to vector<392x128xf32>
    %7 = arith.addf %4, %6 : vector<392x128xf32>
    %c0_6 = arith.constant 0 : index
    %c0_7 = arith.constant 0 : index
    %8 = vector.load %arg4[%c0_6, %c0_7] : memref<392x128xbf16, #tpu.memory_space<vmem>>, vector<392x128xbf16>
    %9 = arith.extf %8 : vector<392x128xbf16> to vector<392x128xf32>
    %10 = arith.addf %7, %9 : vector<392x128xf32>
    %11 = arith.truncf %10 : vector<392x128xf32> to vector<392x128xbf16>
    %c0_8 = arith.constant 0 : index
    %c0_9 = arith.constant 0 : index
    %12 = vector.load %arg5[%c0_8, %c0_9] : memref<392x128xbf16, #tpu.memory_space<vmem>>, vector<392x128xbf16>
    tpu.vector_store %arg5[%c0_8, %c0_9], %11 {strides = array<i32>} : memref<392x128xbf16, #tpu.memory_space<vmem>>, vector<392x128xbf16>,
    return
  }
  func.func @transform_0(%arg0: i32) -> (i32, i32) {
    %c0_i32 = arith.constant 0 : i32
    %c0_i32_0 = arith.constant 0 : i32
    return %arg0, %c0_i32 : i32, i32
  }
  func.func @transform_1(%arg0: i32) -> (i32, i32) {
    %c0_i32 = arith.constant 0 : i32
    %c0_i32_0 = arith.constant 0 : i32
    %c0_i32_1 = arith.constant 0 : i32
    return %c0_i32, %c0_i32_0 : i32, i32
  }
  func.func @transform_2(%arg0: i32) -> (i32, i32) {
    %c0_i32 = arith.constant 0 : i32
    %c0_i32_0 = arith.constant 0 : i32
    %c0_i32_1 = arith.constant 0 : i32
    return %c0_i32, %c0_i32_0 : i32, i32
  }
  func.func @transform_3(%arg0: i32) -> (i32, i32) {
    %c0_i32 = arith.constant 0 : i32
    %c0_i32_0 = arith.constant 0 : i32
    return %arg0, %c0_i32 : i32, i32
  }
  func.func @transform_4(%arg0: i32) -> (i32, i32) {
    %c0_i32 = arith.constant 0 : i32
    %c0_i32_0 = arith.constant 0 : i32
    return %arg0, %c0_i32 : i32, i32
  }
}

module attributes {stable_mosaic.version = 11 : i64} {
  func.func @_mm_kernel(%arg0: i32, %arg1: memref<392x128xbf16, #tpu.memory_space<vmem>>, %arg2: memref<128x128xbf16, #tpu.memory_space<vmem>>, %arg3: memref<1x128xf32, #tpu.memory_space<vmem>>, %arg4: memref<392x128xbf16, #tpu.memory_space<vmem>>) attributes {dimension_semantics = [#tpu.dimension_semantics<parallel>], iteration_bounds = array<i64: 1>, scalar_prefetch = 0 : i64, scratch_operands = 0 : i64, tpu.core_type = #tpu.core_type<tc>, window_params = [{transform_indices = @transform_0, window_bounds = array<i64: 392, 128>}, {pipeline_mode = #tpu.pipeline_mode<synchronous>, transform_indices = @transform_1, window_bounds = array<i64: 128, 128>}, {pipeline_mode = #tpu.pipeline_mode<synchronous>, transform_indices = @transform_2, window_bounds = array<i64: 1, 128>}, {transform_indices = @transform_3, window_bounds = array<i64: 392, 128>}]} {
    %c0 = arith.constant 0 : index
    %c0_0 = arith.constant 0 : index
    %0 = vector.load %arg1[%c0, %c0_0] : memref<392x128xbf16, #tpu.memory_space<vmem>>, vector<392x128xbf16>
    %c0_1 = arith.constant 0 : index
    %c0_2 = arith.constant 0 : index
    %1 = vector.load %arg2[%c0_1, %c0_2] : memref<128x128xbf16, #tpu.memory_space<vmem>>, vector<128x128xbf16>
    %cst = arith.constant dense<0.000000e+00> : vector<392x128xf32>
    %2 = tpu.matmul %0, %1, %cst {dimension_numbers = #tpu.dot_dimension_numbers<[1], [0], [0], [1], [0, 0, 1, 1], [], []>} : vector<392x128xbf16>, vector<128x128xbf16>, vector<392x128xf32> -> vector<392x128xf32>
    %c0_3 = arith.constant 0 : index
    %c0_4 = arith.constant 0 : index
    %3 = vector.load %arg3[%c0_3, %c0_4] : memref<1x128xf32, #tpu.memory_space<vmem>>, vector<1x128xf32>
    %4 = vector.broadcast %3 : vector<1x128xf32> to vector<392x128xf32>
    %5 = arith.addf %2, %4 : vector<392x128xf32>
    %6 = arith.truncf %5 : vector<392x128xf32> to vector<392x128xbf16>
    %c0_5 = arith.constant 0 : index
    %c0_6 = arith.constant 0 : index
    %7 = vector.load %arg4[%c0_5, %c0_6] : memref<392x128xbf16, #tpu.memory_space<vmem>>, vector<392x128xbf16>
    tpu.vector_store %arg4[%c0_5, %c0_6], %6 {strides = array<i32>} : memref<392x128xbf16, #tpu.memory_space<vmem>>, vector<392x128xbf16>,
    return
  }
  func.func @transform_0(%arg0: i32) -> (i32, i32) {
    %c0_i32 = arith.constant 0 : i32
    %c0_i32_0 = arith.constant 0 : i32
    return %arg0, %c0_i32 : i32, i32
  }
  func.func @transform_1(%arg0: i32) -> (i32, i32) {
    %c0_i32 = arith.constant 0 : i32
    %c0_i32_0 = arith.constant 0 : i32
    %c0_i32_1 = arith.constant 0 : i32
    return %c0_i32, %c0_i32_0 : i32, i32
  }
  func.func @transform_2(%arg0: i32) -> (i32, i32) {
    %c0_i32 = arith.constant 0 : i32
    %c0_i32_0 = arith.constant 0 : i32
    %c0_i32_1 = arith.constant 0 : i32
    return %c0_i32, %c0_i32_0 : i32, i32
  }
  func.func @transform_3(%arg0: i32) -> (i32, i32) {
    %c0_i32 = arith.constant 0 : i32
    %c0_i32_0 = arith.constant 0 : i32
    return %arg0, %c0_i32 : i32, i32
  }
}

module attributes {stable_mosaic.version = 11 : i64} {
  func.func @_mm_res_kernel(%arg0: i32, %arg1: memref<392x128xbf16, #tpu.memory_space<vmem>>, %arg2: memref<128x128xbf16, #tpu.memory_space<vmem>>, %arg3: memref<1x128xf32, #tpu.memory_space<vmem>>, %arg4: memref<392x128xbf16, #tpu.memory_space<vmem>>, %arg5: memref<392x128xbf16, #tpu.memory_space<vmem>>) attributes {dimension_semantics = [#tpu.dimension_semantics<parallel>], iteration_bounds = array<i64: 1>, scalar_prefetch = 0 : i64, scratch_operands = 0 : i64, tpu.core_type = #tpu.core_type<tc>, window_params = [{transform_indices = @transform_0, window_bounds = array<i64: 392, 128>}, {pipeline_mode = #tpu.pipeline_mode<synchronous>, transform_indices = @transform_1, window_bounds = array<i64: 128, 128>}, {pipeline_mode = #tpu.pipeline_mode<synchronous>, transform_indices = @transform_2, window_bounds = array<i64: 1, 128>}, {transform_indices = @transform_3, window_bounds = array<i64: 392, 128>}, {transform_indices = @transform_4, window_bounds = array<i64: 392, 128>}]} {
    %c0 = arith.constant 0 : index
    %c0_0 = arith.constant 0 : index
    %0 = vector.load %arg1[%c0, %c0_0] : memref<392x128xbf16, #tpu.memory_space<vmem>>, vector<392x128xbf16>
    %cst = arith.constant 0.000000e+00 : bf16
    %1 = vector.broadcast %cst : bf16 to vector<392x128xbf16>
    %2 = arith.maximumf %0, %1 : vector<392x128xbf16>
    %c0_1 = arith.constant 0 : index
    %c0_2 = arith.constant 0 : index
    %3 = vector.load %arg2[%c0_1, %c0_2] : memref<128x128xbf16, #tpu.memory_space<vmem>>, vector<128x128xbf16>
    %cst_3 = arith.constant dense<0.000000e+00> : vector<392x128xf32>
    %4 = tpu.matmul %2, %3, %cst_3 {dimension_numbers = #tpu.dot_dimension_numbers<[1], [0], [0], [1], [0, 0, 1, 1], [], []>} : vector<392x128xbf16>, vector<128x128xbf16>, vector<392x128xf32> -> vector<392x128xf32>
    %c0_4 = arith.constant 0 : index
    %c0_5 = arith.constant 0 : index
    %5 = vector.load %arg3[%c0_4, %c0_5] : memref<1x128xf32, #tpu.memory_space<vmem>>, vector<1x128xf32>
    %6 = vector.broadcast %5 : vector<1x128xf32> to vector<392x128xf32>
    %7 = arith.addf %4, %6 : vector<392x128xf32>
    %c0_6 = arith.constant 0 : index
    %c0_7 = arith.constant 0 : index
    %8 = vector.load %arg4[%c0_6, %c0_7] : memref<392x128xbf16, #tpu.memory_space<vmem>>, vector<392x128xbf16>
    %9 = arith.extf %8 : vector<392x128xbf16> to vector<392x128xf32>
    %10 = arith.addf %7, %9 : vector<392x128xf32>
    %11 = arith.truncf %10 : vector<392x128xf32> to vector<392x128xbf16>
    %c0_8 = arith.constant 0 : index
    %c0_9 = arith.constant 0 : index
    %12 = vector.load %arg5[%c0_8, %c0_9] : memref<392x128xbf16, #tpu.memory_space<vmem>>, vector<392x128xbf16>
    tpu.vector_store %arg5[%c0_8, %c0_9], %11 {strides = array<i32>} : memref<392x128xbf16, #tpu.memory_space<vmem>>, vector<392x128xbf16>,
    return
  }
  func.func @transform_0(%arg0: i32) -> (i32, i32) {
    %c0_i32 = arith.constant 0 : i32
    %c0_i32_0 = arith.constant 0 : i32
    return %arg0, %c0_i32 : i32, i32
  }
  func.func @transform_1(%arg0: i32) -> (i32, i32) {
    %c0_i32 = arith.constant 0 : i32
    %c0_i32_0 = arith.constant 0 : i32
    %c0_i32_1 = arith.constant 0 : i32
    return %c0_i32, %c0_i32_0 : i32, i32
  }
  func.func @transform_2(%arg0: i32) -> (i32, i32) {
    %c0_i32 = arith.constant 0 : i32
    %c0_i32_0 = arith.constant 0 : i32
    %c0_i32_1 = arith.constant 0 : i32
    return %c0_i32, %c0_i32_0 : i32, i32
  }
  func.func @transform_3(%arg0: i32) -> (i32, i32) {
    %c0_i32 = arith.constant 0 : i32
    %c0_i32_0 = arith.constant 0 : i32
    return %arg0, %c0_i32 : i32, i32
  }
  func.func @transform_4(%arg0: i32) -> (i32, i32) {
    %c0_i32 = arith.constant 0 : i32
    %c0_i32_0 = arith.constant 0 : i32
    return %arg0, %c0_i32 : i32, i32
  }
}

module attributes {stable_mosaic.version = 11 : i64} {
  func.func @_mm_kernel(%arg0: i32, %arg1: memref<392x128xbf16, #tpu.memory_space<vmem>>, %arg2: memref<128x128xbf16, #tpu.memory_space<vmem>>, %arg3: memref<1x128xf32, #tpu.memory_space<vmem>>, %arg4: memref<392x128xbf16, #tpu.memory_space<vmem>>) attributes {dimension_semantics = [#tpu.dimension_semantics<parallel>], iteration_bounds = array<i64: 1>, scalar_prefetch = 0 : i64, scratch_operands = 0 : i64, tpu.core_type = #tpu.core_type<tc>, window_params = [{transform_indices = @transform_0, window_bounds = array<i64: 392, 128>}, {pipeline_mode = #tpu.pipeline_mode<synchronous>, transform_indices = @transform_1, window_bounds = array<i64: 128, 128>}, {pipeline_mode = #tpu.pipeline_mode<synchronous>, transform_indices = @transform_2, window_bounds = array<i64: 1, 128>}, {transform_indices = @transform_3, window_bounds = array<i64: 392, 128>}]} {
    %c0 = arith.constant 0 : index
    %c0_0 = arith.constant 0 : index
    %0 = vector.load %arg1[%c0, %c0_0] : memref<392x128xbf16, #tpu.memory_space<vmem>>, vector<392x128xbf16>
    %cst = arith.constant 0.000000e+00 : bf16
    %1 = vector.broadcast %cst : bf16 to vector<392x128xbf16>
    %2 = arith.maximumf %0, %1 : vector<392x128xbf16>
    %c0_1 = arith.constant 0 : index
    %c0_2 = arith.constant 0 : index
    %3 = vector.load %arg2[%c0_1, %c0_2] : memref<128x128xbf16, #tpu.memory_space<vmem>>, vector<128x128xbf16>
    %cst_3 = arith.constant dense<0.000000e+00> : vector<392x128xf32>
    %4 = tpu.matmul %2, %3, %cst_3 {dimension_numbers = #tpu.dot_dimension_numbers<[1], [0], [0], [1], [0, 0, 1, 1], [], []>} : vector<392x128xbf16>, vector<128x128xbf16>, vector<392x128xf32> -> vector<392x128xf32>
    %c0_4 = arith.constant 0 : index
    %c0_5 = arith.constant 0 : index
    %5 = vector.load %arg3[%c0_4, %c0_5] : memref<1x128xf32, #tpu.memory_space<vmem>>, vector<1x128xf32>
    %6 = vector.broadcast %5 : vector<1x128xf32> to vector<392x128xf32>
    %7 = arith.addf %4, %6 : vector<392x128xf32>
    %8 = arith.truncf %7 : vector<392x128xf32> to vector<392x128xbf16>
    %c0_6 = arith.constant 0 : index
    %c0_7 = arith.constant 0 : index
    %9 = vector.load %arg4[%c0_6, %c0_7] : memref<392x128xbf16, #tpu.memory_space<vmem>>, vector<392x128xbf16>
    tpu.vector_store %arg4[%c0_6, %c0_7], %8 {strides = array<i32>} : memref<392x128xbf16, #tpu.memory_space<vmem>>, vector<392x128xbf16>,
    return
  }
  func.func @transform_0(%arg0: i32) -> (i32, i32) {
    %c0_i32 = arith.constant 0 : i32
    %c0_i32_0 = arith.constant 0 : i32
    return %arg0, %c0_i32 : i32, i32
  }
  func.func @transform_1(%arg0: i32) -> (i32, i32) {
    %c0_i32 = arith.constant 0 : i32
    %c0_i32_0 = arith.constant 0 : i32
    %c0_i32_1 = arith.constant 0 : i32
    return %c0_i32, %c0_i32_0 : i32, i32
  }
  func.func @transform_2(%arg0: i32) -> (i32, i32) {
    %c0_i32 = arith.constant 0 : i32
    %c0_i32_0 = arith.constant 0 : i32
    %c0_i32_1 = arith.constant 0 : i32
    return %c0_i32, %c0_i32_0 : i32, i32
  }
  func.func @transform_3(%arg0: i32) -> (i32, i32) {
    %c0_i32 = arith.constant 0 : i32
    %c0_i32_0 = arith.constant 0 : i32
    return %arg0, %c0_i32 : i32, i32
  }
}

module attributes {stable_mosaic.version = 11 : i64} {
  func.func @_mm_res_kernel(%arg0: i32, %arg1: memref<104x128xbf16, #tpu.memory_space<vmem>>, %arg2: memref<128x128xbf16, #tpu.memory_space<vmem>>, %arg3: memref<1x128xf32, #tpu.memory_space<vmem>>, %arg4: memref<104x128xbf16, #tpu.memory_space<vmem>>, %arg5: memref<104x128xbf16, #tpu.memory_space<vmem>>) attributes {dimension_semantics = [#tpu.dimension_semantics<parallel>], iteration_bounds = array<i64: 1>, scalar_prefetch = 0 : i64, scratch_operands = 0 : i64, tpu.core_type = #tpu.core_type<tc>, window_params = [{transform_indices = @transform_0, window_bounds = array<i64: 104, 128>}, {pipeline_mode = #tpu.pipeline_mode<synchronous>, transform_indices = @transform_1, window_bounds = array<i64: 128, 128>}, {pipeline_mode = #tpu.pipeline_mode<synchronous>, transform_indices = @transform_2, window_bounds = array<i64: 1, 128>}, {transform_indices = @transform_3, window_bounds = array<i64: 104, 128>}, {transform_indices = @transform_4, window_bounds = array<i64: 104, 128>}]} {
    %c0 = arith.constant 0 : index
    %c0_0 = arith.constant 0 : index
    %0 = vector.load %arg1[%c0, %c0_0] : memref<104x128xbf16, #tpu.memory_space<vmem>>, vector<104x128xbf16>
    %cst = arith.constant 0.000000e+00 : bf16
    %1 = vector.broadcast %cst : bf16 to vector<104x128xbf16>
    %2 = arith.maximumf %0, %1 : vector<104x128xbf16>
    %c0_1 = arith.constant 0 : index
    %c0_2 = arith.constant 0 : index
    %3 = vector.load %arg2[%c0_1, %c0_2] : memref<128x128xbf16, #tpu.memory_space<vmem>>, vector<128x128xbf16>
    %cst_3 = arith.constant dense<0.000000e+00> : vector<104x128xf32>
    %4 = tpu.matmul %2, %3, %cst_3 {dimension_numbers = #tpu.dot_dimension_numbers<[1], [0], [0], [1], [0, 0, 1, 1], [], []>} : vector<104x128xbf16>, vector<128x128xbf16>, vector<104x128xf32> -> vector<104x128xf32>
    %c0_4 = arith.constant 0 : index
    %c0_5 = arith.constant 0 : index
    %5 = vector.load %arg3[%c0_4, %c0_5] : memref<1x128xf32, #tpu.memory_space<vmem>>, vector<1x128xf32>
    %6 = vector.broadcast %5 : vector<1x128xf32> to vector<104x128xf32>
    %7 = arith.addf %4, %6 : vector<104x128xf32>
    %c0_6 = arith.constant 0 : index
    %c0_7 = arith.constant 0 : index
    %8 = vector.load %arg4[%c0_6, %c0_7] : memref<104x128xbf16, #tpu.memory_space<vmem>>, vector<104x128xbf16>
    %9 = arith.extf %8 : vector<104x128xbf16> to vector<104x128xf32>
    %10 = arith.addf %7, %9 : vector<104x128xf32>
    %11 = arith.truncf %10 : vector<104x128xf32> to vector<104x128xbf16>
    %c0_8 = arith.constant 0 : index
    %c0_9 = arith.constant 0 : index
    %12 = vector.load %arg5[%c0_8, %c0_9] : memref<104x128xbf16, #tpu.memory_space<vmem>>, vector<104x128xbf16>
    tpu.vector_store %arg5[%c0_8, %c0_9], %11 {strides = array<i32>} : memref<104x128xbf16, #tpu.memory_space<vmem>>, vector<104x128xbf16>,
    return
  }
  func.func @transform_0(%arg0: i32) -> (i32, i32) {
    %c0_i32 = arith.constant 0 : i32
    %c0_i32_0 = arith.constant 0 : i32
    return %arg0, %c0_i32 : i32, i32
  }
  func.func @transform_1(%arg0: i32) -> (i32, i32) {
    %c0_i32 = arith.constant 0 : i32
    %c0_i32_0 = arith.constant 0 : i32
    %c0_i32_1 = arith.constant 0 : i32
    return %c0_i32, %c0_i32_0 : i32, i32
  }
  func.func @transform_2(%arg0: i32) -> (i32, i32) {
    %c0_i32 = arith.constant 0 : i32
    %c0_i32_0 = arith.constant 0 : i32
    %c0_i32_1 = arith.constant 0 : i32
    return %c0_i32, %c0_i32_0 : i32, i32
  }
  func.func @transform_3(%arg0: i32) -> (i32, i32) {
    %c0_i32 = arith.constant 0 : i32
    %c0_i32_0 = arith.constant 0 : i32
    return %arg0, %c0_i32 : i32, i32
  }
  func.func @transform_4(%arg0: i32) -> (i32, i32) {
    %c0_i32 = arith.constant 0 : i32
    %c0_i32_0 = arith.constant 0 : i32
    return %arg0, %c0_i32 : i32, i32
  }
}

module attributes {stable_mosaic.version = 11 : i64} {
  func.func @_mm_kernel(%arg0: i32, %arg1: memref<104x128xbf16, #tpu.memory_space<vmem>>, %arg2: memref<128x128xbf16, #tpu.memory_space<vmem>>, %arg3: memref<1x128xf32, #tpu.memory_space<vmem>>, %arg4: memref<104x128xbf16, #tpu.memory_space<vmem>>) attributes {dimension_semantics = [#tpu.dimension_semantics<parallel>], iteration_bounds = array<i64: 1>, scalar_prefetch = 0 : i64, scratch_operands = 0 : i64, tpu.core_type = #tpu.core_type<tc>, window_params = [{transform_indices = @transform_0, window_bounds = array<i64: 104, 128>}, {pipeline_mode = #tpu.pipeline_mode<synchronous>, transform_indices = @transform_1, window_bounds = array<i64: 128, 128>}, {pipeline_mode = #tpu.pipeline_mode<synchronous>, transform_indices = @transform_2, window_bounds = array<i64: 1, 128>}, {transform_indices = @transform_3, window_bounds = array<i64: 104, 128>}]} {
    %c0 = arith.constant 0 : index
    %c0_0 = arith.constant 0 : index
    %0 = vector.load %arg1[%c0, %c0_0] : memref<104x128xbf16, #tpu.memory_space<vmem>>, vector<104x128xbf16>
    %c0_1 = arith.constant 0 : index
    %c0_2 = arith.constant 0 : index
    %1 = vector.load %arg2[%c0_1, %c0_2] : memref<128x128xbf16, #tpu.memory_space<vmem>>, vector<128x128xbf16>
    %cst = arith.constant dense<0.000000e+00> : vector<104x128xf32>
    %2 = tpu.matmul %0, %1, %cst {dimension_numbers = #tpu.dot_dimension_numbers<[1], [0], [0], [1], [0, 0, 1, 1], [], []>} : vector<104x128xbf16>, vector<128x128xbf16>, vector<104x128xf32> -> vector<104x128xf32>
    %c0_3 = arith.constant 0 : index
    %c0_4 = arith.constant 0 : index
    %3 = vector.load %arg3[%c0_3, %c0_4] : memref<1x128xf32, #tpu.memory_space<vmem>>, vector<1x128xf32>
    %4 = vector.broadcast %3 : vector<1x128xf32> to vector<104x128xf32>
    %5 = arith.addf %2, %4 : vector<104x128xf32>
    %6 = arith.truncf %5 : vector<104x128xf32> to vector<104x128xbf16>
    %c0_5 = arith.constant 0 : index
    %c0_6 = arith.constant 0 : index
    %7 = vector.load %arg4[%c0_5, %c0_6] : memref<104x128xbf16, #tpu.memory_space<vmem>>, vector<104x128xbf16>
    tpu.vector_store %arg4[%c0_5, %c0_6], %6 {strides = array<i32>} : memref<104x128xbf16, #tpu.memory_space<vmem>>, vector<104x128xbf16>,
    return
  }
  func.func @transform_0(%arg0: i32) -> (i32, i32) {
    %c0_i32 = arith.constant 0 : i32
    %c0_i32_0 = arith.constant 0 : i32
    return %arg0, %c0_i32 : i32, i32
  }
  func.func @transform_1(%arg0: i32) -> (i32, i32) {
    %c0_i32 = arith.constant 0 : i32
    %c0_i32_0 = arith.constant 0 : i32
    %c0_i32_1 = arith.constant 0 : i32
    return %c0_i32, %c0_i32_0 : i32, i32
  }
  func.func @transform_2(%arg0: i32) -> (i32, i32) {
    %c0_i32 = arith.constant 0 : i32
    %c0_i32_0 = arith.constant 0 : i32
    %c0_i32_1 = arith.constant 0 : i32
    return %c0_i32, %c0_i32_0 : i32, i32
  }
  func.func @transform_3(%arg0: i32) -> (i32, i32) {
    %c0_i32 = arith.constant 0 : i32
    %c0_i32_0 = arith.constant 0 : i32
    return %arg0, %c0_i32 : i32, i32
  }
}

module attributes {stable_mosaic.version = 11 : i64} {
  func.func @_mm_kernel(%arg0: i32, %arg1: memref<104x256xbf16, #tpu.memory_space<vmem>>, %arg2: memref<256x128xbf16, #tpu.memory_space<vmem>>, %arg3: memref<1x128xf32, #tpu.memory_space<vmem>>, %arg4: memref<104x128xbf16, #tpu.memory_space<vmem>>) attributes {dimension_semantics = [#tpu.dimension_semantics<parallel>], iteration_bounds = array<i64: 1>, scalar_prefetch = 0 : i64, scratch_operands = 0 : i64, tpu.core_type = #tpu.core_type<tc>, window_params = [{transform_indices = @transform_0, window_bounds = array<i64: 104, 256>}, {pipeline_mode = #tpu.pipeline_mode<synchronous>, transform_indices = @transform_1, window_bounds = array<i64: 256, 128>}, {pipeline_mode = #tpu.pipeline_mode<synchronous>, transform_indices = @transform_2, window_bounds = array<i64: 1, 128>}, {transform_indices = @transform_3, window_bounds = array<i64: 104, 128>}]} {
    %c0 = arith.constant 0 : index
    %c0_0 = arith.constant 0 : index
    %0 = vector.load %arg1[%c0, %c0_0] : memref<104x256xbf16, #tpu.memory_space<vmem>>, vector<104x256xbf16>
    %cst = arith.constant 0.000000e+00 : bf16
    %1 = vector.broadcast %cst : bf16 to vector<104x256xbf16>
    %2 = arith.maximumf %0, %1 : vector<104x256xbf16>
    %c0_1 = arith.constant 0 : index
    %c0_2 = arith.constant 0 : index
    %3 = vector.load %arg2[%c0_1, %c0_2] : memref<256x128xbf16, #tpu.memory_space<vmem>>, vector<256x128xbf16>
    %cst_3 = arith.constant dense<0.000000e+00> : vector<104x128xf32>
    %4 = tpu.matmul %2, %3, %cst_3 {dimension_numbers = #tpu.dot_dimension_numbers<[1], [0], [0], [1], [0, 0, 1, 1], [], []>} : vector<104x256xbf16>, vector<256x128xbf16>, vector<104x128xf32> -> vector<104x128xf32>
    %c0_4 = arith.constant 0 : index
    %c0_5 = arith.constant 0 : index
    %5 = vector.load %arg3[%c0_4, %c0_5] : memref<1x128xf32, #tpu.memory_space<vmem>>, vector<1x128xf32>
    %6 = vector.broadcast %5 : vector<1x128xf32> to vector<104x128xf32>
    %7 = arith.addf %4, %6 : vector<104x128xf32>
    %8 = arith.truncf %7 : vector<104x128xf32> to vector<104x128xbf16>
    %c0_6 = arith.constant 0 : index
    %c0_7 = arith.constant 0 : index
    %9 = vector.load %arg4[%c0_6, %c0_7] : memref<104x128xbf16, #tpu.memory_space<vmem>>, vector<104x128xbf16>
    tpu.vector_store %arg4[%c0_6, %c0_7], %8 {strides = array<i32>} : memref<104x128xbf16, #tpu.memory_space<vmem>>, vector<104x128xbf16>,
    return
  }
  func.func @transform_0(%arg0: i32) -> (i32, i32) {
    %c0_i32 = arith.constant 0 : i32
    %c0_i32_0 = arith.constant 0 : i32
    return %arg0, %c0_i32 : i32, i32
  }
  func.func @transform_1(%arg0: i32) -> (i32, i32) {
    %c0_i32 = arith.constant 0 : i32
    %c0_i32_0 = arith.constant 0 : i32
    %c0_i32_1 = arith.constant 0 : i32
    return %c0_i32, %c0_i32_0 : i32, i32
  }
  func.func @transform_2(%arg0: i32) -> (i32, i32) {
    %c0_i32 = arith.constant 0 : i32
    %c0_i32_0 = arith.constant 0 : i32
    %c0_i32_1 = arith.constant 0 : i32
    return %c0_i32, %c0_i32_0 : i32, i32
  }
  func.func @transform_3(%arg0: i32) -> (i32, i32) {
    %c0_i32 = arith.constant 0 : i32
    %c0_i32_0 = arith.constant 0 : i32
    return %arg0, %c0_i32 : i32, i32
  }
}

module attributes {stable_mosaic.version = 11 : i64} {
  func.func @_mm_res_kernel(%arg0: i32, %arg1: memref<104x256xbf16, #tpu.memory_space<vmem>>, %arg2: memref<256x128xbf16, #tpu.memory_space<vmem>>, %arg3: memref<1x128xf32, #tpu.memory_space<vmem>>, %arg4: memref<104x128xbf16, #tpu.memory_space<vmem>>, %arg5: memref<104x128xbf16, #tpu.memory_space<vmem>>) attributes {dimension_semantics = [#tpu.dimension_semantics<parallel>], iteration_bounds = array<i64: 1>, scalar_prefetch = 0 : i64, scratch_operands = 0 : i64, tpu.core_type = #tpu.core_type<tc>, window_params = [{transform_indices = @transform_0, window_bounds = array<i64: 104, 256>}, {pipeline_mode = #tpu.pipeline_mode<synchronous>, transform_indices = @transform_1, window_bounds = array<i64: 256, 128>}, {pipeline_mode = #tpu.pipeline_mode<synchronous>, transform_indices = @transform_2, window_bounds = array<i64: 1, 128>}, {transform_indices = @transform_3, window_bounds = array<i64: 104, 128>}, {transform_indices = @transform_4, window_bounds = array<i64: 104, 128>}]} {
    %c0 = arith.constant 0 : index
    %c0_0 = arith.constant 0 : index
    %0 = vector.load %arg1[%c0, %c0_0] : memref<104x256xbf16, #tpu.memory_space<vmem>>, vector<104x256xbf16>
    %cst = arith.constant 0.000000e+00 : bf16
    %1 = vector.broadcast %cst : bf16 to vector<104x256xbf16>
    %2 = arith.maximumf %0, %1 : vector<104x256xbf16>
    %c0_1 = arith.constant 0 : index
    %c0_2 = arith.constant 0 : index
    %3 = vector.load %arg2[%c0_1, %c0_2] : memref<256x128xbf16, #tpu.memory_space<vmem>>, vector<256x128xbf16>
    %cst_3 = arith.constant dense<0.000000e+00> : vector<104x128xf32>
    %4 = tpu.matmul %2, %3, %cst_3 {dimension_numbers = #tpu.dot_dimension_numbers<[1], [0], [0], [1], [0, 0, 1, 1], [], []>} : vector<104x256xbf16>, vector<256x128xbf16>, vector<104x128xf32> -> vector<104x128xf32>
    %c0_4 = arith.constant 0 : index
    %c0_5 = arith.constant 0 : index
    %5 = vector.load %arg3[%c0_4, %c0_5] : memref<1x128xf32, #tpu.memory_space<vmem>>, vector<1x128xf32>
    %6 = vector.broadcast %5 : vector<1x128xf32> to vector<104x128xf32>
    %7 = arith.addf %4, %6 : vector<104x128xf32>
    %c0_6 = arith.constant 0 : index
    %c0_7 = arith.constant 0 : index
    %8 = vector.load %arg4[%c0_6, %c0_7] : memref<104x128xbf16, #tpu.memory_space<vmem>>, vector<104x128xbf16>
    %9 = arith.extf %8 : vector<104x128xbf16> to vector<104x128xf32>
    %10 = arith.addf %7, %9 : vector<104x128xf32>
    %11 = arith.truncf %10 : vector<104x128xf32> to vector<104x128xbf16>
    %c0_8 = arith.constant 0 : index
    %c0_9 = arith.constant 0 : index
    %12 = vector.load %arg5[%c0_8, %c0_9] : memref<104x128xbf16, #tpu.memory_space<vmem>>, vector<104x128xbf16>
    tpu.vector_store %arg5[%c0_8, %c0_9], %11 {strides = array<i32>} : memref<104x128xbf16, #tpu.memory_space<vmem>>, vector<104x128xbf16>,
    return
  }
  func.func @transform_0(%arg0: i32) -> (i32, i32) {
    %c0_i32 = arith.constant 0 : i32
    %c0_i32_0 = arith.constant 0 : i32
    return %arg0, %c0_i32 : i32, i32
  }
  func.func @transform_1(%arg0: i32) -> (i32, i32) {
    %c0_i32 = arith.constant 0 : i32
    %c0_i32_0 = arith.constant 0 : i32
    %c0_i32_1 = arith.constant 0 : i32
    return %c0_i32, %c0_i32_0 : i32, i32
  }
  func.func @transform_2(%arg0: i32) -> (i32, i32) {
    %c0_i32 = arith.constant 0 : i32
    %c0_i32_0 = arith.constant 0 : i32
    %c0_i32_1 = arith.constant 0 : i32
    return %c0_i32, %c0_i32_0 : i32, i32
  }
  func.func @transform_3(%arg0: i32) -> (i32, i32) {
    %c0_i32 = arith.constant 0 : i32
    %c0_i32_0 = arith.constant 0 : i32
    return %arg0, %c0_i32 : i32, i32
  }
  func.func @transform_4(%arg0: i32) -> (i32, i32) {
    %c0_i32 = arith.constant 0 : i32
    %c0_i32_0 = arith.constant 0 : i32
    return %arg0, %c0_i32 : i32, i32
  }
}

module attributes {stable_mosaic.version = 11 : i64} {
  func.func @_mm_kernel(%arg0: i32, %arg1: memref<32x256xbf16, #tpu.memory_space<vmem>>, %arg2: memref<256x128xbf16, #tpu.memory_space<vmem>>, %arg3: memref<1x128xf32, #tpu.memory_space<vmem>>, %arg4: memref<32x128xbf16, #tpu.memory_space<vmem>>) attributes {dimension_semantics = [#tpu.dimension_semantics<parallel>], iteration_bounds = array<i64: 1>, scalar_prefetch = 0 : i64, scratch_operands = 0 : i64, tpu.core_type = #tpu.core_type<tc>, window_params = [{transform_indices = @transform_0, window_bounds = array<i64: 32, 256>}, {pipeline_mode = #tpu.pipeline_mode<synchronous>, transform_indices = @transform_1, window_bounds = array<i64: 256, 128>}, {pipeline_mode = #tpu.pipeline_mode<synchronous>, transform_indices = @transform_2, window_bounds = array<i64: 1, 128>}, {transform_indices = @transform_3, window_bounds = array<i64: 32, 128>}]} {
    %c0 = arith.constant 0 : index
    %c0_0 = arith.constant 0 : index
    %0 = vector.load %arg1[%c0, %c0_0] : memref<32x256xbf16, #tpu.memory_space<vmem>>, vector<32x256xbf16>
    %c0_1 = arith.constant 0 : index
    %c0_2 = arith.constant 0 : index
    %1 = vector.load %arg2[%c0_1, %c0_2] : memref<256x128xbf16, #tpu.memory_space<vmem>>, vector<256x128xbf16>
    %cst = arith.constant dense<0.000000e+00> : vector<32x128xf32>
    %2 = tpu.matmul %0, %1, %cst {dimension_numbers = #tpu.dot_dimension_numbers<[1], [0], [0], [1], [0, 0, 1, 1], [], []>} : vector<32x256xbf16>, vector<256x128xbf16>, vector<32x128xf32> -> vector<32x128xf32>
    %c0_3 = arith.constant 0 : index
    %c0_4 = arith.constant 0 : index
    %3 = vector.load %arg3[%c0_3, %c0_4] : memref<1x128xf32, #tpu.memory_space<vmem>>, vector<1x128xf32>
    %4 = vector.broadcast %3 : vector<1x128xf32> to vector<32x128xf32>
    %5 = arith.addf %2, %4 : vector<32x128xf32>
    %6 = arith.truncf %5 : vector<32x128xf32> to vector<32x128xbf16>
    %c0_5 = arith.constant 0 : index
    %c0_6 = arith.constant 0 : index
    %7 = vector.load %arg4[%c0_5, %c0_6] : memref<32x128xbf16, #tpu.memory_space<vmem>>, vector<32x128xbf16>
    tpu.vector_store %arg4[%c0_5, %c0_6], %6 {strides = array<i32>} : memref<32x128xbf16, #tpu.memory_space<vmem>>, vector<32x128xbf16>,
    return
  }
  func.func @transform_0(%arg0: i32) -> (i32, i32) {
    %c0_i32 = arith.constant 0 : i32
    %c0_i32_0 = arith.constant 0 : i32
    return %arg0, %c0_i32 : i32, i32
  }
  func.func @transform_1(%arg0: i32) -> (i32, i32) {
    %c0_i32 = arith.constant 0 : i32
    %c0_i32_0 = arith.constant 0 : i32
    %c0_i32_1 = arith.constant 0 : i32
    return %c0_i32, %c0_i32_0 : i32, i32
  }
  func.func @transform_2(%arg0: i32) -> (i32, i32) {
    %c0_i32 = arith.constant 0 : i32
    %c0_i32_0 = arith.constant 0 : i32
    %c0_i32_1 = arith.constant 0 : i32
    return %c0_i32, %c0_i32_0 : i32, i32
  }
  func.func @transform_3(%arg0: i32) -> (i32, i32) {
    %c0_i32 = arith.constant 0 : i32
    %c0_i32_0 = arith.constant 0 : i32
    return %arg0, %c0_i32 : i32, i32
  }
}

module attributes {stable_mosaic.version = 11 : i64} {
  func.func @_mm_kernel(%arg0: i32, %arg1: memref<8x512xbf16, #tpu.memory_space<vmem>>, %arg2: memref<512x128xbf16, #tpu.memory_space<vmem>>, %arg3: memref<1x128xf32, #tpu.memory_space<vmem>>, %arg4: memref<8x128xf32, #tpu.memory_space<vmem>>) attributes {dimension_semantics = [#tpu.dimension_semantics<parallel>], iteration_bounds = array<i64: 1>, scalar_prefetch = 0 : i64, scratch_operands = 0 : i64, tpu.core_type = #tpu.core_type<tc>, window_params = [{transform_indices = @transform_0, window_bounds = array<i64: 8, 512>}, {pipeline_mode = #tpu.pipeline_mode<synchronous>, transform_indices = @transform_1, window_bounds = array<i64: 512, 128>}, {pipeline_mode = #tpu.pipeline_mode<synchronous>, transform_indices = @transform_2, window_bounds = array<i64: 1, 128>}, {transform_indices = @transform_3, window_bounds = array<i64: 8, 128>}]} {
    %c0 = arith.constant 0 : index
    %c0_0 = arith.constant 0 : index
    %0 = vector.load %arg1[%c0, %c0_0] : memref<8x512xbf16, #tpu.memory_space<vmem>>, vector<8x512xbf16>
    %cst = arith.constant 0.000000e+00 : bf16
    %1 = vector.broadcast %cst : bf16 to vector<8x512xbf16>
    %2 = arith.maximumf %0, %1 : vector<8x512xbf16>
    %c0_1 = arith.constant 0 : index
    %c0_2 = arith.constant 0 : index
    %3 = vector.load %arg2[%c0_1, %c0_2] : memref<512x128xbf16, #tpu.memory_space<vmem>>, vector<512x128xbf16>
    %cst_3 = arith.constant dense<0.000000e+00> : vector<8x128xf32>
    %4 = tpu.matmul %2, %3, %cst_3 {dimension_numbers = #tpu.dot_dimension_numbers<[1], [0], [0], [1], [0, 0, 1, 1], [], []>} : vector<8x512xbf16>, vector<512x128xbf16>, vector<8x128xf32> -> vector<8x128xf32>
    %c0_4 = arith.constant 0 : index
    %c0_5 = arith.constant 0 : index
    %5 = vector.load %arg3[%c0_4, %c0_5] : memref<1x128xf32, #tpu.memory_space<vmem>>, vector<1x128xf32>
    %6 = vector.broadcast %5 : vector<1x128xf32> to vector<8x128xf32>
    %7 = arith.addf %4, %6 : vector<8x128xf32>
    %c0_6 = arith.constant 0 : index
    %c0_7 = arith.constant 0 : index
    %8 = vector.load %arg4[%c0_6, %c0_7] : memref<8x128xf32, #tpu.memory_space<vmem>>, vector<8x128xf32>
    tpu.vector_store %arg4[%c0_6, %c0_7], %7 {strides = array<i32>} : memref<8x128xf32, #tpu.memory_space<vmem>>, vector<8x128xf32>,
    return
  }
  func.func @transform_0(%arg0: i32) -> (i32, i32) {
    %c0_i32 = arith.constant 0 : i32
    %c0_i32_0 = arith.constant 0 : i32
    return %arg0, %c0_i32 : i32, i32
  }
  func.func @transform_1(%arg0: i32) -> (i32, i32) {
    %c0_i32 = arith.constant 0 : i32
    %c0_i32_0 = arith.constant 0 : i32
    %c0_i32_1 = arith.constant 0 : i32
    return %c0_i32, %c0_i32_0 : i32, i32
  }
  func.func @transform_2(%arg0: i32) -> (i32, i32) {
    %c0_i32 = arith.constant 0 : i32
    %c0_i32_0 = arith.constant 0 : i32
    %c0_i32_1 = arith.constant 0 : i32
    return %c0_i32, %c0_i32_0 : i32, i32
  }
  func.func @transform_3(%arg0: i32) -> (i32, i32) {
    %c0_i32 = arith.constant 0 : i32
    %c0_i32_0 = arith.constant 0 : i32
    return %arg0, %c0_i32 : i32, i32
  }
}

module attributes {stable_mosaic.version = 11 : i64} {
  func.func @_mm_res_kernel(%arg0: i32, %arg1: memref<32x256xbf16, #tpu.memory_space<vmem>>, %arg2: memref<256x128xbf16, #tpu.memory_space<vmem>>, %arg3: memref<1x128xf32, #tpu.memory_space<vmem>>, %arg4: memref<32x128xbf16, #tpu.memory_space<vmem>>, %arg5: memref<32x128xbf16, #tpu.memory_space<vmem>>) attributes {dimension_semantics = [#tpu.dimension_semantics<parallel>], iteration_bounds = array<i64: 1>, scalar_prefetch = 0 : i64, scratch_operands = 0 : i64, tpu.core_type = #tpu.core_type<tc>, window_params = [{transform_indices = @transform_0, window_bounds = array<i64: 32, 256>}, {pipeline_mode = #tpu.pipeline_mode<synchronous>, transform_indices = @transform_1, window_bounds = array<i64: 256, 128>}, {pipeline_mode = #tpu.pipeline_mode<synchronous>, transform_indices = @transform_2, window_bounds = array<i64: 1, 128>}, {transform_indices = @transform_3, window_bounds = array<i64: 32, 128>}, {transform_indices = @transform_4, window_bounds = array<i64: 32, 128>}]} {
    %c0 = arith.constant 0 : index
    %c0_0 = arith.constant 0 : index
    %0 = vector.load %arg1[%c0, %c0_0] : memref<32x256xbf16, #tpu.memory_space<vmem>>, vector<32x256xbf16>
    %cst = arith.constant 0.000000e+00 : bf16
    %1 = vector.broadcast %cst : bf16 to vector<32x256xbf16>
    %2 = arith.maximumf %0, %1 : vector<32x256xbf16>
    %c0_1 = arith.constant 0 : index
    %c0_2 = arith.constant 0 : index
    %3 = vector.load %arg2[%c0_1, %c0_2] : memref<256x128xbf16, #tpu.memory_space<vmem>>, vector<256x128xbf16>
    %cst_3 = arith.constant dense<0.000000e+00> : vector<32x128xf32>
    %4 = tpu.matmul %2, %3, %cst_3 {dimension_numbers = #tpu.dot_dimension_numbers<[1], [0], [0], [1], [0, 0, 1, 1], [], []>} : vector<32x256xbf16>, vector<256x128xbf16>, vector<32x128xf32> -> vector<32x128xf32>
    %c0_4 = arith.constant 0 : index
    %c0_5 = arith.constant 0 : index
    %5 = vector.load %arg3[%c0_4, %c0_5] : memref<1x128xf32, #tpu.memory_space<vmem>>, vector<1x128xf32>
    %6 = vector.broadcast %5 : vector<1x128xf32> to vector<32x128xf32>
    %7 = arith.addf %4, %6 : vector<32x128xf32>
    %c0_6 = arith.constant 0 : index
    %c0_7 = arith.constant 0 : index
    %8 = vector.load %arg4[%c0_6, %c0_7] : memref<32x128xbf16, #tpu.memory_space<vmem>>, vector<32x128xbf16>
    %9 = arith.extf %8 : vector<32x128xbf16> to vector<32x128xf32>
    %10 = arith.addf %7, %9 : vector<32x128xf32>
    %11 = arith.truncf %10 : vector<32x128xf32> to vector<32x128xbf16>
    %c0_8 = arith.constant 0 : index
    %c0_9 = arith.constant 0 : index
    %12 = vector.load %arg5[%c0_8, %c0_9] : memref<32x128xbf16, #tpu.memory_space<vmem>>, vector<32x128xbf16>
    tpu.vector_store %arg5[%c0_8, %c0_9], %11 {strides = array<i32>} : memref<32x128xbf16, #tpu.memory_space<vmem>>, vector<32x128xbf16>,
    return
  }
  func.func @transform_0(%arg0: i32) -> (i32, i32) {
    %c0_i32 = arith.constant 0 : i32
    %c0_i32_0 = arith.constant 0 : i32
    return %arg0, %c0_i32 : i32, i32
  }
  func.func @transform_1(%arg0: i32) -> (i32, i32) {
    %c0_i32 = arith.constant 0 : i32
    %c0_i32_0 = arith.constant 0 : i32
    %c0_i32_1 = arith.constant 0 : i32
    return %c0_i32, %c0_i32_0 : i32, i32
  }
  func.func @transform_2(%arg0: i32) -> (i32, i32) {
    %c0_i32 = arith.constant 0 : i32
    %c0_i32_0 = arith.constant 0 : i32
    %c0_i32_1 = arith.constant 0 : i32
    return %c0_i32, %c0_i32_0 : i32, i32
  }
  func.func @transform_3(%arg0: i32) -> (i32, i32) {
    %c0_i32 = arith.constant 0 : i32
    %c0_i32_0 = arith.constant 0 : i32
    return %arg0, %c0_i32 : i32, i32
  }
  func.func @transform_4(%arg0: i32) -> (i32, i32) {
    %c0_i32 = arith.constant 0 : i32
    %c0_i32_0 = arith.constant 0 : i32
    return %arg0, %c0_i32 : i32, i32
  }
}

</mosaic_0001>

<bundles_post_ra>
// kernel: _lambda_.16
= control target key start
LH: loop header
LB: loop body
LE: loop exit
PB: predicated region body
PF: predicated region fallthrough
CT: control target
= control target key end

     0   :  { %s1525_s12 = smov 0   ;;  %s1902_s0 = inlined_call_operand.vmem [shape: bf16[1568,128], index: 0, kind: input, shape index: {}]   ;;  %s1903_s1 = inlined_call_operand.vmem [shape: bf16[128,128], index: 1, kind: input, shape index: {}]   ;;  %s1904_s2 = inlined_call_operand.vmem [shape: f32[1,128], index: 2, kind: input, shape index: {}]   ;;  %s1905_s3 = inlined_call_operand.vmem [shape: bf16[1568,128], index: 3, kind: output, shape index: {}]  }
   0x1 LB: > { %s1026_s13 = sadd.s32 4294967295, %s1500_s12   ;;  %p1030_p0 = scmp.ge.s32.totalorder %s1500_s12, 1  ;;  %s1500_s12 = sphi %s1525_s12, %s13_s12  }
   0x2   : > { %p138_p1 = scmp.lt.s32.totalorder %s1500_s12, 5 }
   0x4   : > { %p139_p2 = pnand %p1030_p0, %p138_p1 }
   0x5   : > { %v1486_v0 = vld [vmem:[%s1903_s1] sm:$0xff] (!%p139_p2)   ;;  %v1502_v1 = vmov (!%p139_p2), 0.0   ;;  %v1487_v2 = vld [vmem:[%s1903_s1 + $0x8] sm:$0xff] (!%p139_p2)   ;;  %s162_s18 = smul.u32 (!%p139_p2), 49, %s1026_s13  ;;  %vm1503_vm0 = vmmov (!%p139_p2), 0   ;;  %v1488_v3 = vld [vmem:[%s1903_s1 + $0x10] sm:$0xff] (!%p139_p2)  }
   0x6   : > { %142 = sbr.rel (%p139_p2) target bundleno = 353 (0x161), region = 32  ;;  %1343 = vmatprep.subr.bf16.mxu0 (!%p139_p2), %v1502_v1  ;;  %1459 = vmatprep.subr.bf16.mxu1 (!%p139_p2), %v1502_v1  ;;  %v1489_v4 = vld [vmem:[%s1903_s1 + $0x18] sm:$0xff] (!%p139_p2)   ;;  %v1490_v5 = vld [vmem:[%s1903_s1 + $0x20] sm:$0xff] (!%p139_p2)   ;;  %v1491_v6 = vld [vmem:[%s1903_s1 + $0x28] sm:$0xff] (!%p139_p2)   ;;  %v1504_v12 = vmov (!%p139_p2), 0  }
   0x7   : > { %1344 = vmatpush3.bf16.msra.mxu0 (!%p139_p2), %v1486_v0  ;;  %1467 = vmatpush3.bf16.msra.mxu1 (!%p139_p2), %v1486_v0  ;;  %p163_p3 = scmp.lt.s32.totalorder (!%p139_p2), %s162_s18, 195  ;;  %v1492_v11 = vld [vmem:[%s1903_s1 + $0x30] sm:$0xff] (!%p139_p2)   ;;  %v1493_v23 = vld [vmem:[%s1903_s1 + $0x38] sm:$0xff] (!%p139_p2)  }
   0x8   : > { %1345 = vmatprep.subr.bf16.mxu0 (!%p139_p2), %v1502_v1  ;;  %1460 = vmatprep.subr.bf16.mxu1 (!%p139_p2), %v1502_v1 }
   0x9   : > { %1359 = vmatprep.mubr.msk.bf16.mxu0 (!%p139_p2), %vm1503_vm0, %v1502_v1  ;;  %1411 = vmatprep.mubr.msk.bf16.mxu1 (!%p139_p2), %vm1503_vm0, %v1502_v1 }
   0xb   : > { %1346 = vmatpush3.bf16.msra.mxu0 (!%p139_p2), %v1487_v2  ;;  %1468 = vmatpush3.bf16.msra.mxu1 (!%p139_p2), %v1487_v2 }
   0xc   : > { %1347 = vmatprep.subr.bf16.mxu0 (!%p139_p2), %v1502_v1  ;;  %1461 = vmatprep.subr.bf16.mxu1 (!%p139_p2), %v1502_v1 }
   0xd   : > { %s1907_s18 = smov (!%p163_p3, %s162_s18), 195 }
   0xe   : > { %s1031_s23 = sshll.u32 %s1907_s18, 2 }
   0xf   : > { %1348 = vmatpush3.bf16.msra.mxu0 %v1488_v3  ;;  %1469 = vmatpush3.bf16.msra.mxu1 %v1488_v3  ;;  %s1570_s28 = scalar_lea.vmem %s1902_s0, %s1031_s23  ;;  %s1827_s13 = scalar_lea.vmem %s1905_s3, %s1031_s23 }
  0x10   : > { %1349 = vmatprep.subr.bf16.mxu0 %v1502_v1  ;;  %1462 = vmatprep.subr.bf16.mxu1 %v1502_v1  ;;  %v175_v7 = vld [vmem:[%s1570_s28] sm:$0xf]  ;;  %v176_v8 = vld [vmem:[%s1570_s28 + $0x4] sm:$0xf]  ;;  %v201_v9 = vld [vmem:[%s1570_s28 + $0x68] sm:$0xf] }
  0x11   : > { %v202_v10 = vld [vmem:[%s1570_s28 + $0x6c] sm:$0xf]  ;;  %v1585_v13 = vmax.bf16 %v1504_v12, %v175_v7  ;;  %v1588_v14 = vmax.bf16 %v1504_v12, %v176_v8  ;;  %v191_v15 = vld [vmem:[%s1570_s28 + $0x40] sm:$0xf]  ;;  %v192_v16 = vld [vmem:[%s1570_s28 + $0x44] sm:$0xf]  ;;  %v250_v17 = vmax.bf16 %v1504_v12, %v201_v9 }
  0x12   : > { %v251_v18 = vmax.bf16 %v1504_v12, %v202_v10  ;;  %v217_v19 = vld [vmem:[%s1570_s28 + $0xa8] sm:$0xf]  ;;  %v218_v20 = vld [vmem:[%s1570_s28 + $0xac] sm:$0xf]  ;;  %v1604_v24 = vmax.bf16 %v1504_v12, %v191_v15  ;;  %v1607_v25 = vmax.bf16 %v1504_v12, %v192_v16  ;;  %v219_v26 = vld [vmem:[%s1570_s28 + $0xb0] sm:$0xf] }
  0x13   : > { %1350 = vmatpush3.bf16.msra.mxu0 %v1489_v4  ;;  %1470 = vmatpush3.bf16.msra.mxu1 %v1489_v4  ;;  %v193_v21 = vld [vmem:[%s1570_s28 + $0x48] sm:$0xf]  ;;  %v194_v22 = vld [vmem:[%s1570_s28 + $0x4c] sm:$0xf]  ;;  %v220_v27 = vld [vmem:[%s1570_s28 + $0xb4] sm:$0xf]  ;;  %v1034_v28 = vcombine.low %v1585_v13, %v1588_v14  ;;  %v1614_v29 = vmax.bf16 %v1504_v12, %v217_v19  ;;  %v1617_v30 = vmax.bf16 %v1504_v12, %v218_v20 }
  0x14   : > { %1351 = vmatprep.subr.bf16.mxu0 %v1502_v1  ;;  %1463 = vmatprep.subr.bf16.mxu1 %v1502_v1  ;;  %v1620_v31 = vmax.bf16 %v1504_v12, %v193_v21  ;;  %v195_v32 = vld [vmem:[%s1570_s28 + $0x50] sm:$0xf]  ;;  %v196_v33 = vld [vmem:[%s1570_s28 + $0x54] sm:$0xf]  ;;  %v221_v34 = vld [vmem:[%s1570_s28 + $0xb8] sm:$0xf]  ;;  %v1047_v35 = vcombine.low %v250_v17, %v251_v18  ;;  %v1042_v36 = vcombine.low %v1604_v24, %v1607_v25 }
  0x15   : > { %v1628_v37 = vmax.bf16 %v1504_v12, %v194_v22  ;;  %v222_v38 = vld [vmem:[%s1570_s28 + $0xbc] sm:$0xf]  ;;  %v197_v39 = vld [vmem:[%s1570_s28 + $0x58] sm:$0xf]  ;;  %v1055_v41 = vcombine.low %v1614_v29, %v1617_v30  ;;  %v1638_v42 = vmax.bf16 %v1504_v12, %v219_v26  ;;  %v1641_v43 = vmax.bf16 %v1504_v12, %v220_v27  ;;  %v223_v44 = vld [vmem:[%s1570_s28 + $0xc0] sm:$0xf] }
  0x16   : > { %v198_v40 = vld [vmem:[%s1570_s28 + $0x5c] sm:$0xf]  ;;  %v199_v45 = vld [vmem:[%s1570_s28 + $0x60] sm:$0xf]  ;;  %v1648_v47 = vmax.bf16 %v1504_v12, %v195_v32  ;;  %v1651_v48 = vmax.bf16 %v1504_v12, %v196_v33  ;;  %v1654_v49 = vmax.bf16 %v1504_v12, %v221_v34  ;;  %v200_v50 = vld [vmem:[%s1570_s28 + $0x64] sm:$0xf]  ;;  %v1662_v54 = vmax.bf16 %v1504_v12, %v222_v38 }
  0x17   : > { %1352 = vmatpush3.bf16.msra.mxu0 %v1490_v5  ;;  %1471 = vmatpush3.bf16.msra.mxu1 %v1490_v5  ;;  %v1043_v46 = vcombine.low %v1620_v31, %v1628_v37  ;;  %v177_v51 = vld [vmem:[%s1570_s28 + $0x8] sm:$0xf]  ;;  %v178_v52 = vld [vmem:[%s1570_s28 + $0xc] sm:$0xf]  ;;  %v1056_v53 = vcombine.low %v1638_v42, %v1641_v43  ;;  %v1665_v55 = vmax.bf16 %v1504_v12, %v197_v39  ;;  %v203_v57 = vld [vmem:[%s1570_s28 + $0x70] sm:$0xf] }
  0x18   : > { %1353 = vmatprep.subr.bf16.mxu0 %v1502_v1  ;;  %1464 = vmatprep.subr.bf16.mxu1 %v1502_v1  ;;  %v1668_v56 = vmax.bf16 %v1504_v12, %v198_v40  ;;  %v204_v58 = vld [vmem:[%s1570_s28 + $0x74] sm:$0xf]  ;;  %v1044_v59 = vcombine.low %v1648_v47, %v1651_v48  ;;  %v1675_v60 = vmax.bf16 %v1504_v12, %v223_v44  ;;  %v179_v9 = vld [vmem:[%s1570_s28 + $0x10] sm:$0xf]  ;;  %v206_v13 = vld [vmem:[%s1570_s28 + $0x7c] sm:$0xf] }
  0x19   : > { %v1678_v61 = vmax.bf16 %v1504_v12, %v199_v45  ;;  %v1057_v62 = vcombine.low %v1654_v49, %v1662_v54  ;;  %v1685_v0 = vmax.bf16 %v1504_v12, %v200_v50  ;;  %v226_v2 = vmax.bf16 %v1504_v12, %v177_v51  ;;  %v180_v10 = vld [vmem:[%s1570_s28 + $0x14] sm:$0xf]  ;;  %v181_v20 = vld [vmem:[%s1570_s28 + $0x18] sm:$0xf]  ;;  %v182_v21 = vld [vmem:[%s1570_s28 + $0x1c] sm:$0xf] }
  0x1a   : > { %v1045_v63 = vcombine.low %v1665_v55, %v1668_v56  ;;  %v227_v3 = vmax.bf16 %v1504_v12, %v178_v52  ;;  %v252_v4 = vmax.bf16 %v1504_v12, %v203_v57  ;;  %v253_v5 = vmax.bf16 %v1504_v12, %v204_v58  ;;  %v207_v22 = vld [vmem:[%s1570_s28 + $0x80] sm:$0xf]  ;;  %v184_v38 = vld [vmem:[%s1570_s28 + $0x24] sm:$0xf]  ;;  %v209_v39 = vld [vmem:[%s1570_s28 + $0x88] sm:$0xf] }
  0x1b   : > { %1354 = vmatpush3.bf16.msra.mxu0 %v1491_v6  ;;  %1472 = vmatpush3.bf16.msra.mxu1 %v1491_v6  ;;  %v1046_v6 = vcombine.low %v1678_v61, %v1685_v0  ;;  %v228_v14 = vmax.bf16 %v1504_v12, %v179_v9  ;;  %v229_v15 = vmax.bf16 %v1504_v12, %v180_v10  ;;  %v210_v40 = vld [vmem:[%s1570_s28 + $0x8c] sm:$0xf]  ;;  %v185_v58 = vld [vmem:[%s1570_s28 + $0x28] sm:$0xf]  ;;  %v1816_v24 = vld [vmem:[%s1904_s2] ss:$0 sm:$0xff] }
  0x1c   : > { %1355 = vmatprep.subr.bf16.mxu0 %v1502_v1  ;;  %1465 = vmatprep.subr.bf16.mxu1 %v1502_v1  ;;  %v1035_v7 = vcombine.low %v226_v2, %v227_v3  ;;  %v1048_v8 = vcombine.low %v252_v4, %v253_v5  ;;  %v255_v17 = vmax.bf16 %v1504_v12, %v206_v13  ;;  %v186_v2 = vld [vmem:[%s1570_s28 + $0x2c] sm:$0xf]  ;;  %v211_v3 = vld [vmem:[%s1570_s28 + $0x90] sm:$0xf]  ;;  %v212_v4 = vld [vmem:[%s1570_s28 + $0x94] sm:$0xf] }
  0x1d   : > { %v1036_v18 = vcombine.low %v228_v14, %v229_v15  ;;  %v230_v26 = vmax.bf16 %v1504_v12, %v181_v20  ;;  %v231_v27 = vmax.bf16 %v1504_v12, %v182_v21  ;;  %v233_v45 = vmax.bf16 %v1504_v12, %v184_v38  ;;  %v187_v13 = vld [vmem:[%s1570_s28 + $0x30] sm:$0xf]  ;;  %v188_v14 = vld [vmem:[%s1570_s28 + $0x34] sm:$0xf]  ;;  %v213_v15 = vld [vmem:[%s1570_s28 + $0x98] sm:$0xf] }
  0x1e   : > { %v258_v50 = vmax.bf16 %v1504_v12, %v209_v39  ;;  %v259_v51 = vmax.bf16 %v1504_v12, %v210_v40  ;;  %v234_v5 = vmax.bf16 %v1504_v12, %v185_v58  ;;  %v261_v9 = vmax.bf16 %v1504_v12, %v212_v4 }
  0x1f   : > { %1356 = vmatpush3.bf16.msra.mxu0 %v1492_v11  ;;  %1473 = vmatpush3.bf16.msra.mxu1 %v1492_v11  ;;  %v205_v11 = vld [vmem:[%s1570_s28 + $0x78] sm:$0xf]  ;;  %v1037_v33 = vcombine.low %v230_v26, %v231_v27  ;;  %v190_v26 = vld [vmem:[%s1570_s28 + $0x3c] sm:$0xf]  ;;  %v215_v27 = vld [vmem:[%s1570_s28 + $0xa0] sm:$0xf] }
  0x20   : > { %1357 = vmatprep.subr.bf16.mxu0 %v1502_v1  ;;  %1466 = vmatprep.subr.bf16.mxu1 %v1502_v1  ;;  %v254_v16 = vmax.bf16 %v1504_v12, %v205_v11  ;;  %v1051_v57 = vcombine.low %v258_v50, %v259_v51 }
  0x22   : > { %v1049_v19 = vcombine.low %v254_v16, %v255_v17  ;;  %v214_v16 = vld [vmem:[%s1570_s28 + $0x9c] sm:$0xf]  ;;  %v236_v17 = vmax.bf16 %v1504_v12, %v187_v13 }
  0x23   : > { %1358 = vmatpush3.bf16.msra.mxu0 %v1493_v23  ;;  %1474 = vmatpush3.bf16.msra.mxu1 %v1493_v23  ;;  %v208_v23 = vld [vmem:[%s1570_s28 + $0x84] sm:$0xf]  ;;  %v263_v20 = vmax.bf16 %v1504_v12, %v214_v16 }
  0x24   : > { %v257_v32 = vmax.bf16 %v1504_v12, %v208_v23  ;;  %v189_v23 = vld [vmem:[%s1570_s28 + $0x38] sm:$0xf] }
  0x26   : > { %1360 = vmatmul.mubr.bf16.vlgmr.msra.gmra.mrb[0].mxu0 %v1034_v28  ;;  %1412 = vmatmul.mubr.bf16.vlgmr.msra.gmra.mrb[0].mxu1 %v1047_v35  ;;  %v256_v28 = vmax.bf16 %v1504_v12, %v207_v22  ;;  %v183_v35 = vld [vmem:[%s1570_s28 + $0x20] sm:$0xf] }
  0x27   : > { %1363 = vmatprep.mubr.msk.bf16.mxu0 %vm1503_vm0, %v1502_v1  ;;  %1415 = vmatprep.mubr.msk.bf16.mxu1 %vm1503_vm0, %v1502_v1  ;;  %v232_v44 = vmax.bf16 %v1504_v12, %v183_v35 }
  0x28   : > { %v1050_v34 = vcombine.low %v256_v28, %v257_v32  ;;  %v216_v28 = vld [vmem:[%s1570_s28 + $0xa4] sm:$0xf]  ;;  %v238_v32 = vmax.bf16 %v1504_v12, %v189_v23 }
  0x29   : > { %v1038_v52 = vcombine.low %v232_v44, %v233_v45  ;;  %v265_v35 = vmax.bf16 %v1504_v12, %v216_v28 }
  0x2e   : > { %1364 = vmatmul.mubr.bf16.gmra.mrb[4].mxu0 %v1035_v7  ;;  %1416 = vmatmul.mubr.bf16.gmra.mrb[4].mxu1 %v1048_v8  ;;  %v235_v7 = vmax.bf16 %v1504_v12, %v186_v2  ;;  %v260_v8 = vmax.bf16 %v1504_v12, %v211_v3 }
  0x2f   : > { %1367 = vmatprep.mubr.msk.bf16.mxu0 %vm1503_vm0, %v1502_v1  ;;  %1419 = vmatprep.mubr.msk.bf16.mxu1 %vm1503_vm0, %v1502_v1 }
  0x30   : > { %v1039_v10 = vcombine.low %v234_v5, %v235_v7  ;;  %v1052_v11 = vcombine.low %v260_v8, %v261_v9 }
  0x36   : > { %1368 = vmatmul.mubr.bf16.gmra.mrb[8].mxu0 %v1036_v18  ;;  %1420 = vmatmul.mubr.bf16.gmra.mrb[8].mxu1 %v1049_v19  ;;  %v237_v18 = vmax.bf16 %v1504_v12, %v188_v14  ;;  %v262_v19 = vmax.bf16 %v1504_v12, %v213_v15 }
  0x37   : > { %1371 = vmatprep.mubr.msk.bf16.mxu0 %vm1503_vm0, %v1502_v1  ;;  %1423 = vmatprep.mubr.msk.bf16.mxu1 %vm1503_vm0, %v1502_v1 }
  0x38   : > { %v1040_v21 = vcombine.low %v236_v17, %v237_v18  ;;  %v1053_v22 = vcombine.low %v262_v19, %v263_v20 }
  0x3e   : > { %1372 = vmatmul.mubr.bf16.gmra.mrb[12].mxu0 %v1037_v33  ;;  %1424 = vmatmul.mubr.bf16.gmra.mrb[12].mxu1 %v1050_v34  ;;  %v239_v33 = vmax.bf16 %v1504_v12, %v190_v26  ;;  %v264_v34 = vmax.bf16 %v1504_v12, %v215_v27  ;;  %v1058_v12 = vcombine.low %v1675_v60, %v1675_v60 }
  0x3f   : > { %1375 = vmatprep.mubr.msk.bf16.mxu0 %vm1503_vm0, %v1502_v1  ;;  %1427 = vmatprep.mubr.msk.bf16.mxu1 %vm1503_vm0, %v1502_v1 }
  0x40   : > { %v1041_v38 = vcombine.low %v238_v32, %v239_v33  ;;  %v1054_v39 = vcombine.low %v264_v34, %v265_v35 }
  0x46   : > { %1376 = vmatmul.mubr.bf16.gmra.mrb[16].mxu0 %v1038_v52  ;;  %1428 = vmatmul.mubr.bf16.gmra.mrb[16].mxu1 %v1051_v57 }
  0x47   : > { %1379 = vmatprep.mubr.msk.bf16.mxu0 %vm1503_vm0, %v1502_v1  ;;  %1431 = vmatprep.mubr.msk.bf16.mxu1 %vm1503_vm0, %v1502_v1 }
  0x4e   : > { %1380 = vmatmul.mubr.bf16.gmra.mrb[20].mxu0 %v1039_v10  ;;  %1432 = vmatmul.mubr.bf16.gmra.mrb[20].mxu1 %v1052_v11 }
  0x4f   : > { %1383 = vmatprep.mubr.msk.bf16.mxu0 %vm1503_vm0, %v1502_v1  ;;  %1435 = vmatprep.mubr.msk.bf16.mxu1 %vm1503_vm0, %v1502_v1 }
  0x56   : > { %1384 = vmatmul.mubr.bf16.gmra.mrb[24].mxu0 %v1040_v21  ;;  %1436 = vmatmul.mubr.bf16.gmra.mrb[24].mxu1 %v1053_v22 }
  0x57   : > { %1387 = vmatprep.mubr.msk.bf16.mxu0 %vm1503_vm0, %v1502_v1  ;;  %1439 = vmatprep.mubr.msk.bf16.mxu1 %vm1503_vm0, %v1502_v1 }
  0x5e   : > { %1388 = vmatmul.mubr.bf16.gmra.mrb[28].mxu0 %v1041_v38  ;;  %1440 = vmatmul.mubr.bf16.gmra.mrb[28].mxu1 %v1054_v39 }
  0x5f   : > { %1391 = vmatprep.mubr.msk.bf16.mxu0 %vm1503_vm0, %v1502_v1  ;;  %1443 = vmatprep.mubr.msk.bf16.mxu1 %vm1503_vm0, %v1502_v1 }
  0x66   : > { %1392 = vmatmul.mubr.bf16.gmra.mrb[32].mxu0 %v1042_v36  ;;  %1444 = vmatmul.mubr.bf16.gmra.mrb[32].mxu1 %v1055_v41 }
  0x67   : > { %1395 = vmatprep.mubr.msk.bf16.mxu0 %vm1503_vm0, %v1502_v1  ;;  %1447 = vmatprep.mubr.msk.bf16.mxu1 %vm1503_vm0, %v1502_v1 }
  0x6e   : > { %1396 = vmatmul.mubr.bf16.gmra.mrb[36].mxu0 %v1043_v46  ;;  %1448 = vmatmul.mubr.bf16.gmra.mrb[36].mxu1 %v1056_v53 }
  0x6f   : > { %1399 = vmatprep.mubr.msk.bf16.mxu0 %vm1503_vm0, %v1502_v1  ;;  %1451 = vmatprep.mubr.msk.bf16.mxu1 %vm1503_vm0, %v1502_v1 }
  0x76   : > { %1400 = vmatmul.mubr.bf16.gmra.mrb[40].mxu0 %v1044_v59  ;;  %1452 = vmatmul.mubr.bf16.gmra.mrb[40].mxu1 %v1057_v62 }
  0x77   : > { %1403 = vmatprep.mubr.msk.bf16.mxu0 %vm1503_vm0, %v1502_v1  ;;  %1455 = vmatprep.mubr.msk.bf16.mxu1 %vm1503_vm0, %v1502_v1 }
  0x7e   : > { %1404 = vmatmul.mubr.bf16.gmra.mrb[44].mxu0 %v1045_v63  ;;  %1456 = vmatmul.mubr.bf16.gmra.mrb[44].mxu1 %v1058_v12 }
  0x7f   : > { %1407 = vmatprep.mubr.msk.bf16.mxu0 %vm1503_vm0, %v1502_v1 }
  0x86   : > { %1408 = vmatmul.mubr.bf16.gmra.mrb[48].mxu0 %v1046_v6 }
  0xf9   : > { %v526_v25 = vpop.f32.mrb[0].mxu0  ;;  %v630_v29 = vpop.f32.mrb[0].mxu1 }
  0xfa   : > { %v1361_v30 = vpop.f32.mrb[1].mxu0  ;;  %v631_v31 = vadd.f32 %v1816_v24, %v630_v29  ;;  %v1413_v36 = vpop.f32.mrb[1].mxu1  ;;  %v527_v42 = vadd.f32 %v1816_v24, %v526_v25 }
  0xfb   : > { %v529_v37 = vpop.f32.mrb[2].mxu0  ;;  %v633_v41 = vpop.f32.mrb[2].mxu1 }
  0xfc   : > { %v530_v1 = vadd.f32 %v1816_v24, %v529_v37  ;;  %v1362_v43 = vpop.f32.mrb[3].mxu0  ;;  %v634_v46 = vadd.f32 %v1816_v24, %v633_v41  ;;  %v1414_v47 = vpop.f32.mrb[3].mxu1 }
  0xfe   : > { %v1170_v48 = vpack.c.bf16 %v530_v1, %v527_v42  ;;  %v1235_v49 = vpack.c.bf16 %v634_v46, %v631_v31 }
 0x100   : > { %1171 = vst [vmem:[%s1827_s13] sm:$0xff] %v1170_v48   ;;  %1299 = vst [vmem:[%s1827_s13 + $0x68] sm:$0xff] %v1235_v49  }
 0x101   : > { %v534_v53 = vpop.f32.mrb[4].mxu0  ;;  %v638_v54 = vpop.f32.mrb[4].mxu1 }
 0x102   : > { %v1365_v55 = vpop.f32.mrb[5].mxu0  ;;  %v639_v56 = vadd.f32 %v1816_v24, %v638_v54  ;;  %v1417_v59 = vpop.f32.mrb[5].mxu1  ;;  %v535_v62 = vadd.f32 %v1816_v24, %v534_v53 }
 0x103   : > { %v537_v60 = vpop.f32.mrb[6].mxu0  ;;  %v641_v61 = vpop.f32.mrb[6].mxu1 }
 0x104   : > { %v538_v63 = vadd.f32 %v1816_v24, %v537_v60  ;;  %v1366_v0 = vpop.f32.mrb[7].mxu0  ;;  %v642_v6 = vadd.f32 %v1816_v24, %v641_v61  ;;  %v1418_v40 = vpop.f32.mrb[7].mxu1 }
 0x106   : > { %v1175_v44 = vpack.c.bf16 %v538_v63, %v535_v62  ;;  %v1240_v45 = vpack.c.bf16 %v642_v6, %v639_v56 }
 0x108   : > { %1287 = vst [vmem:[%s1827_s13 + $0x8] sm:$0xff] %v1175_v44   ;;  %1300 = vst [vmem:[%s1827_s13 + $0x70] sm:$0xff] %v1240_v45  }
 0x109   : > { %v542_v50 = vpop.f32.mrb[8].mxu0  ;;  %v646_v51 = vpop.f32.mrb[8].mxu1 }
 0x10a   : > { %v1369_v52 = vpop.f32.mrb[9].mxu0  ;;  %v647_v57 = vadd.f32 %v1816_v24, %v646_v51  ;;  %v1421_v58 = vpop.f32.mrb[9].mxu1  ;;  %v543_v4 = vadd.f32 %v1816_v24, %v542_v50 }
 0x10b   : > { %v545_v2 = vpop.f32.mrb[10].mxu0  ;;  %v649_v3 = vpop.f32.mrb[10].mxu1 }
 0x10c   : > { %v546_v5 = vadd.f32 %v1816_v24, %v545_v2  ;;  %v1370_v7 = vpop.f32.mrb[11].mxu0  ;;  %v650_v8 = vadd.f32 %v1816_v24, %v649_v3  ;;  %v1422_v9 = vpop.f32.mrb[11].mxu1 }
 0x10e   : > { %v1180_v10 = vpack.c.bf16 %v546_v5, %v543_v4  ;;  %v1245_v11 = vpack.c.bf16 %v650_v8, %v647_v57 }
 0x110   : > { %1288 = vst [vmem:[%s1827_s13 + $0x10] sm:$0xff] %v1180_v10   ;;  %1301 = vst [vmem:[%s1827_s13 + $0x78] sm:$0xff] %v1245_v11  }
 0x111   : > { %v550_v13 = vpop.f32.mrb[12].mxu0  ;;  %v654_v14 = vpop.f32.mrb[12].mxu1 }
 0x112   : > { %v1373_v15 = vpop.f32.mrb[13].mxu0  ;;  %v655_v16 = vadd.f32 %v1816_v24, %v654_v14  ;;  %v1425_v17 = vpop.f32.mrb[13].mxu1  ;;  %v551_v20 = vadd.f32 %v1816_v24, %v550_v13 }
 0x113   : > { %v553_v18 = vpop.f32.mrb[14].mxu0  ;;  %v657_v19 = vpop.f32.mrb[14].mxu1 }
 0x114   : > { %v554_v21 = vadd.f32 %v1816_v24, %v553_v18  ;;  %v1374_v22 = vpop.f32.mrb[15].mxu0  ;;  %v658_v23 = vadd.f32 %v1816_v24, %v657_v19  ;;  %v1426_v26 = vpop.f32.mrb[15].mxu1 }
 0x116   : > { %v1185_v27 = vpack.c.bf16 %v554_v21, %v551_v20  ;;  %v1250_v28 = vpack.c.bf16 %v658_v23, %v655_v16 }
 0x118   : > { %1289 = vst [vmem:[%s1827_s13 + $0x18] sm:$0xff] %v1185_v27   ;;  %1302 = vst [vmem:[%s1827_s13 + $0x80] sm:$0xff] %v1250_v28  }
 0x119   : > { %v558_v32 = vpop.f32.mrb[16].mxu0  ;;  %v662_v33 = vpop.f32.mrb[16].mxu1 }
 0x11a   : > { %v1377_v34 = vpop.f32.mrb[17].mxu0  ;;  %v663_v35 = vadd.f32 %v1816_v24, %v662_v33  ;;  %v1429_v38 = vpop.f32.mrb[17].mxu1  ;;  %v559_v25 = vadd.f32 %v1816_v24, %v558_v32 }
 0x11b   : > { %v561_v39 = vpop.f32.mrb[18].mxu0  ;;  %v665_v12 = vpop.f32.mrb[18].mxu1 }
 0x11c   : > { %v562_v29 = vadd.f32 %v1816_v24, %v561_v39  ;;  %v1378_v30 = vpop.f32.mrb[19].mxu0  ;;  %v666_v31 = vadd.f32 %v1816_v24, %v665_v12  ;;  %v1430_v36 = vpop.f32.mrb[19].mxu1 }
 0x11e   : > { %v1190_v37 = vpack.c.bf16 %v562_v29, %v559_v25  ;;  %v1255_v41 = vpack.c.bf16 %v666_v31, %v663_v35 }
 0x120   : > { %1290 = vst [vmem:[%s1827_s13 + $0x20] sm:$0xff] %v1190_v37   ;;  %1303 = vst [vmem:[%s1827_s13 + $0x88] sm:$0xff] %v1255_v41  }
 0x121   : > { %v566_v42 = vpop.f32.mrb[20].mxu0  ;;  %v670_v1 = vpop.f32.mrb[20].mxu1 }
 0x122   : > { %v1381_v43 = vpop.f32.mrb[21].mxu0  ;;  %v671_v46 = vadd.f32 %v1816_v24, %v670_v1  ;;  %v1433_v47 = vpop.f32.mrb[21].mxu1  ;;  %v567_v53 = vadd.f32 %v1816_v24, %v566_v42 }
 0x123   : > { %v569_v48 = vpop.f32.mrb[22].mxu0  ;;  %v673_v49 = vpop.f32.mrb[22].mxu1 }
 0x124   : > { %v570_v54 = vadd.f32 %v1816_v24, %v569_v48  ;;  %v1382_v55 = vpop.f32.mrb[23].mxu0  ;;  %v674_v56 = vadd.f32 %v1816_v24, %v673_v49  ;;  %v1434_v59 = vpop.f32.mrb[23].mxu1 }
 0x126   : > { %v1195_v60 = vpack.c.bf16 %v570_v54, %v567_v53  ;;  %v1260_v61 = vpack.c.bf16 %v674_v56, %v671_v46 }
 0x128   : > { %1291 = vst [vmem:[%s1827_s13 + $0x28] sm:$0xff] %v1195_v60   ;;  %1304 = vst [vmem:[%s1827_s13 + $0x90] sm:$0xff] %v1260_v61  }
 0x129   : > { %v574_v62 = vpop.f32.mrb[24].mxu0  ;;  %v678_v63 = vpop.f32.mrb[24].mxu1 }
 0x12a   : > { %v1385_v0 = vpop.f32.mrb[25].mxu0  ;;  %v679_v6 = vadd.f32 %v1816_v24, %v678_v63  ;;  %v1437_v40 = vpop.f32.mrb[25].mxu1  ;;  %v575_v50 = vadd.f32 %v1816_v24, %v574_v62 }
 0x12b   : > { %v577_v44 = vpop.f32.mrb[26].mxu0  ;;  %v681_v45 = vpop.f32.mrb[26].mxu1 }
 0x12c   : > { %v578_v51 = vadd.f32 %v1816_v24, %v577_v44  ;;  %v1386_v52 = vpop.f32.mrb[27].mxu0  ;;  %v682_v57 = vadd.f32 %v1816_v24, %v681_v45  ;;  %v1438_v58 = vpop.f32.mrb[27].mxu1 }
 0x12e   : > { %v1200_v2 = vpack.c.bf16 %v578_v51, %v575_v50  ;;  %v1265_v3 = vpack.c.bf16 %v682_v57, %v679_v6 }
 0x130   : > { %1292 = vst [vmem:[%s1827_s13 + $0x30] sm:$0xff] %v1200_v2   ;;  %1305 = vst [vmem:[%s1827_s13 + $0x98] sm:$0xff] %v1265_v3  }
 0x131   : > { %v582_v4 = vpop.f32.mrb[28].mxu0  ;;  %v686_v5 = vpop.f32.mrb[28].mxu1 }
 0x132   : > { %v1389_v7 = vpop.f32.mrb[29].mxu0  ;;  %v687_v8 = vadd.f32 %v1816_v24, %v686_v5  ;;  %v1441_v9 = vpop.f32.mrb[29].mxu1  ;;  %v583_v13 = vadd.f32 %v1816_v24, %v582_v4 }
 0x133   : > { %v585_v10 = vpop.f32.mrb[30].mxu0  ;;  %v689_v11 = vpop.f32.mrb[30].mxu1 }
 0x134   : > { %v586_v14 = vadd.f32 %v1816_v24, %v585_v10  ;;  %v1390_v15 = vpop.f32.mrb[31].mxu0  ;;  %v690_v16 = vadd.f32 %v1816_v24, %v689_v11  ;;  %v1442_v17 = vpop.f32.mrb[31].mxu1 }
 0x136   : > { %v1205_v18 = vpack.c.bf16 %v586_v14, %v583_v13  ;;  %v1270_v19 = vpack.c.bf16 %v690_v16, %v687_v8 }
 0x138   : > { %1293 = vst [vmem:[%s1827_s13 + $0x38] sm:$0xff] %v1205_v18   ;;  %1306 = vst [vmem:[%s1827_s13 + $0xa0] sm:$0xff] %v1270_v19  }
 0x139   : > { %v590_v20 = vpop.f32.mrb[32].mxu0  ;;  %v694_v21 = vpop.f32.mrb[32].mxu1 }
 0x13a   : > { %v1393_v22 = vpop.f32.mrb[33].mxu0  ;;  %v695_v23 = vadd.f32 %v1816_v24, %v694_v21  ;;  %v1445_v26 = vpop.f32.mrb[33].mxu1  ;;  %v591_v32 = vadd.f32 %v1816_v24, %v590_v20 }
 0x13b   : > { %v593_v27 = vpop.f32.mrb[34].mxu0  ;;  %v697_v28 = vpop.f32.mrb[34].mxu1 }
 0x13c   : > { %v594_v33 = vadd.f32 %v1816_v24, %v593_v27  ;;  %v1394_v34 = vpop.f32.mrb[35].mxu0  ;;  %v698_v35 = vadd.f32 %v1816_v24, %v697_v28  ;;  %v1446_v38 = vpop.f32.mrb[35].mxu1 }
 0x13e   : > { %v1210_v39 = vpack.c.bf16 %v594_v33, %v591_v32  ;;  %v1275_v12 = vpack.c.bf16 %v698_v35, %v695_v23 }
 0x140   : > { %1294 = vst [vmem:[%s1827_s13 + $0x40] sm:$0xff] %v1210_v39   ;;  %1307 = vst [vmem:[%s1827_s13 + $0xa8] sm:$0xff] %v1275_v12  }
 0x141   : > { %v598_v25 = vpop.f32.mrb[36].mxu0  ;;  %v702_v29 = vpop.f32.mrb[36].mxu1 }
 0x142   : > { %v1397_v30 = vpop.f32.mrb[37].mxu0  ;;  %v703_v31 = vadd.f32 %v1816_v24, %v702_v29  ;;  %v1449_v36 = vpop.f32.mrb[37].mxu1  ;;  %v599_v42 = vadd.f32 %v1816_v24, %v598_v25 }
 0x143   : > { %v601_v37 = vpop.f32.mrb[38].mxu0  ;;  %v705_v41 = vpop.f32.mrb[38].mxu1 }
 0x144   : > { %v602_v1 = vadd.f32 %v1816_v24, %v601_v37  ;;  %v1398_v43 = vpop.f32.mrb[39].mxu0  ;;  %v706_v46 = vadd.f32 %v1816_v24, %v705_v41  ;;  %v1450_v47 = vpop.f32.mrb[39].mxu1 }
 0x146   : > { %v1215_v48 = vpack.c.bf16 %v602_v1, %v599_v42  ;;  %v1280_v49 = vpack.c.bf16 %v706_v46, %v703_v31 }
 0x148   : > { %1295 = vst [vmem:[%s1827_s13 + $0x48] sm:$0xff] %v1215_v48   ;;  %1308 = vst [vmem:[%s1827_s13 + $0xb0] sm:$0xff] %v1280_v49  }
 0x149   : > { %v606_v53 = vpop.f32.mrb[40].mxu0  ;;  %v710_v54 = vpop.f32.mrb[40].mxu1 }
 0x14a   : > { %v1401_v55 = vpop.f32.mrb[41].mxu0  ;;  %v711_v56 = vadd.f32 %v1816_v24, %v710_v54  ;;  %v1453_v59 = vpop.f32.mrb[41].mxu1  ;;  %v607_v62 = vadd.f32 %v1816_v24, %v606_v53 }
 0x14b   : > { %v609_v60 = vpop.f32.mrb[42].mxu0  ;;  %v713_v61 = vpop.f32.mrb[42].mxu1 }
 0x14c   : > { %v610_v63 = vadd.f32 %v1816_v24, %v609_v60  ;;  %v1402_v0 = vpop.f32.mrb[43].mxu0  ;;  %v714_v6 = vadd.f32 %v1816_v24, %v713_v61  ;;  %v1454_v40 = vpop.f32.mrb[43].mxu1 }
 0x14e   : > { %v1220_v44 = vpack.c.bf16 %v610_v63, %v607_v62  ;;  %v1285_v45 = vpack.c.bf16 %v714_v6, %v711_v56 }
 0x150   : > { %1296 = vst [vmem:[%s1827_s13 + $0x50] sm:$0xff] %v1220_v44   ;;  %1309 = vst [vmem:[%s1827_s13 + $0xb8] sm:$0xff] %v1285_v45  }
 0x151   : > { %v614_v50 = vpop.f32.mrb[44].mxu0  ;;  %v718_v51 = vpop.f32.mrb[44].mxu1 }
 0x152   : > { %v1405_v52 = vpop.f32.mrb[45].mxu0  ;;  %v719_v57 = vadd.f32 %v1816_v24, %v718_v51  ;;  %v1457_v58 = vpop.f32.mrb[45].mxu1  ;;  %v615_v4 = vadd.f32 %v1816_v24, %v614_v50 }
 0x153   : > { %v617_v2 = vpop.f32.mrb[46].mxu0  ;;  %v721_v3 = vpop.f32.mrb[46].mxu1 }
 0x154   : > { %v618_v5 = vadd.f32 %v1816_v24, %v617_v2  ;;  %v1406_v7 = vpop.f32.mrb[47].mxu0  ;;  %v1166_v8 = vpack.c.bf16 %v719_v57, %v719_v57  ;;  %v1458_v9 = vpop.f32.mrb[47].mxu1 }
 0x156   : > { %v1225_v10 = vpack.c.bf16 %v618_v5, %v615_v4  ;;  %969 = vst [vmem:[%s1827_s13 + $0xc0] sm:$0xf] %v1166_v8 }
 0x158   : > { %1297 = vst [vmem:[%s1827_s13 + $0x58] sm:$0xff] %v1225_v10  }
 0x159   : > { %v622_v11 = vpop.f32.mrb[48].mxu0 }
 0x15a   : > { %v1409_v13 = vpop.f32.mrb[49].mxu0  ;;  %v623_v15 = vadd.f32 %v1816_v24, %v622_v11 }
 0x15b   : > { %v625_v14 = vpop.f32.mrb[50].mxu0 }
 0x15c   : > { %v626_v16 = vadd.f32 %v1816_v24, %v625_v14  ;;  %v1410_v17 = vpop.f32.mrb[51].mxu0 }
 0x15e   : > { %v1230_v18 = vpack.c.bf16 %v626_v16, %v623_v15 }
 0x160   : > { %1298 = vst [vmem:[%s1827_s13 + $0x60] sm:$0xff] %v1230_v18  }
 0x161 PF: > { %s13_s12 = sadd.s32 1, %s1500_s12  }
 0x162   : > { %p10_p4 = scmp.ge.s32.totalorder %s13_s12, 6  }
 0x164   :  { %12 = sbr.rel (!%p10_p4) target bundleno = 1 (0x1), region = 62 }

// kernel: _lambda_.17
= control target key start
LH: loop header
LB: loop body
LE: loop exit
PB: predicated region body
PF: predicated region fallthrough
CT: control target
= control target key end

     0   :  { %s1858_s15 = smov 0   ;;  %s2263_s0 = inlined_call_operand.vmem [shape: bf16[1568,128], index: 0, kind: input, shape index: {}]   ;;  %s2264_s1 = inlined_call_operand.vmem [shape: bf16[128,128], index: 1, kind: input, shape index: {}]   ;;  %s2265_s2 = inlined_call_operand.vmem [shape: f32[1,128], index: 2, kind: input, shape index: {}]   ;;  %s2266_s3 = inlined_call_operand.vmem [shape: bf16[1568,128], index: 3, kind: input, shape index: {}]   ;;  %s2267_s4 = inlined_call_operand.vmem [shape: bf16[1568,128], index: 4, kind: output, shape index: {}]  }
   0x1 LB: > { %s1234_s16 = sadd.s32 4294967295, %s1828_s15   ;;  %p1238_p0 = scmp.ge.s32.totalorder %s1828_s15, 1  ;;  %s1828_s15 = sphi %s1858_s15, %s14_s15  }
   0x2   : > { %p174_p1 = scmp.lt.s32.totalorder %s1828_s15, 5 }
   0x4   : > { %p175_p2 = pnand %p1238_p0, %p174_p1 }
   0x5   : > { %v1814_v0 = vld [vmem:[%s2264_s1] sm:$0xff] (!%p175_p2)   ;;  %v1830_v1 = vmov (!%p175_p2), 0.0   ;;  %v1815_v2 = vld [vmem:[%s2264_s1 + $0x8] sm:$0xff] (!%p175_p2)   ;;  %s205_s21 = smul.u32 (!%p175_p2), 49, %s1234_s16  ;;  %vm1831_vm0 = vmmov (!%p175_p2), 0   ;;  %v1816_v3 = vld [vmem:[%s2264_s1 + $0x10] sm:$0xff] (!%p175_p2)  }
   0x6   : > { %178 = sbr.rel (%p175_p2) target bundleno = 355 (0x163), region = 36  ;;  %1671 = vmatprep.subr.bf16.mxu0 (!%p175_p2), %v1830_v1  ;;  %1787 = vmatprep.subr.bf16.mxu1 (!%p175_p2), %v1830_v1  ;;  %v1817_v4 = vld [vmem:[%s2264_s1 + $0x18] sm:$0xff] (!%p175_p2)   ;;  %v1818_v5 = vld [vmem:[%s2264_s1 + $0x20] sm:$0xff] (!%p175_p2)   ;;  %v1819_v6 = vld [vmem:[%s2264_s1 + $0x28] sm:$0xff] (!%p175_p2)   ;;  %v1832_v12 = vmov (!%p175_p2), 0  }
   0x7   : > { %1672 = vmatpush3.bf16.msra.mxu0 (!%p175_p2), %v1814_v0  ;;  %1795 = vmatpush3.bf16.msra.mxu1 (!%p175_p2), %v1814_v0  ;;  %p206_p3 = scmp.lt.s32.totalorder (!%p175_p2), %s205_s21, 195  ;;  %v1820_v11 = vld [vmem:[%s2264_s1 + $0x30] sm:$0xff] (!%p175_p2)   ;;  %v1821_v23 = vld [vmem:[%s2264_s1 + $0x38] sm:$0xff] (!%p175_p2)  }
   0x8   : > { %1673 = vmatprep.subr.bf16.mxu0 (!%p175_p2), %v1830_v1  ;;  %1788 = vmatprep.subr.bf16.mxu1 (!%p175_p2), %v1830_v1 }
   0x9   : > { %1687 = vmatprep.mubr.msk.bf16.mxu0 (!%p175_p2), %vm1831_vm0, %v1830_v1  ;;  %1739 = vmatprep.mubr.msk.bf16.mxu1 (!%p175_p2), %vm1831_vm0, %v1830_v1 }
   0xb   : > { %1674 = vmatpush3.bf16.msra.mxu0 (!%p175_p2), %v1815_v2  ;;  %1796 = vmatpush3.bf16.msra.mxu1 (!%p175_p2), %v1815_v2 }
   0xc   : > { %1675 = vmatprep.subr.bf16.mxu0 (!%p175_p2), %v1830_v1  ;;  %1789 = vmatprep.subr.bf16.mxu1 (!%p175_p2), %v1830_v1 }
   0xd   : > { %s2269_s21 = smov (!%p206_p3, %s205_s21), 195 }
   0xe   : > { %s1890_s26 = sshll.u32 %s2269_s21, 2 }
   0xf   : > { %1676 = vmatpush3.bf16.msra.mxu0 %v1816_v3  ;;  %1797 = vmatpush3.bf16.msra.mxu1 %v1816_v3  ;;  %s1901_s5 = scalar_lea.vmem %s2263_s0, %s1890_s26  ;;  %s2148_s14 = scalar_lea.vmem %s2266_s3, %s1890_s26 }
  0x10   : > { %1677 = vmatprep.subr.bf16.mxu0 %v1830_v1  ;;  %1790 = vmatprep.subr.bf16.mxu1 %v1830_v1  ;;  %v224_v7 = vld [vmem:[%s1901_s5] sm:$0xf]  ;;  %v225_v8 = vld [vmem:[%s1901_s5 + $0x4] sm:$0xf]  ;;  %v250_v9 = vld [vmem:[%s1901_s5 + $0x68] sm:$0xf]  ;;  %s2167_s20 = scalar_lea.vmem %s2267_s4, %s1890_s26 }
  0x11   : > { %v251_v10 = vld [vmem:[%s1901_s5 + $0x6c] sm:$0xf]  ;;  %v1916_v13 = vmax.bf16 %v1832_v12, %v224_v7  ;;  %v1919_v14 = vmax.bf16 %v1832_v12, %v225_v8  ;;  %v240_v15 = vld [vmem:[%s1901_s5 + $0x40] sm:$0xf]  ;;  %v241_v16 = vld [vmem:[%s1901_s5 + $0x44] sm:$0xf]  ;;  %v299_v17 = vmax.bf16 %v1832_v12, %v250_v9 }
  0x12   : > { %v300_v18 = vmax.bf16 %v1832_v12, %v251_v10  ;;  %v266_v19 = vld [vmem:[%s1901_s5 + $0xa8] sm:$0xf]  ;;  %v267_v20 = vld [vmem:[%s1901_s5 + $0xac] sm:$0xf]  ;;  %v1935_v24 = vmax.bf16 %v1832_v12, %v240_v15  ;;  %v1938_v25 = vmax.bf16 %v1832_v12, %v241_v16  ;;  %v268_v26 = vld [vmem:[%s1901_s5 + $0xb0] sm:$0xf] }
  0x13   : > { %1678 = vmatpush3.bf16.msra.mxu0 %v1817_v4  ;;  %1798 = vmatpush3.bf16.msra.mxu1 %v1817_v4  ;;  %v242_v21 = vld [vmem:[%s1901_s5 + $0x48] sm:$0xf]  ;;  %v243_v22 = vld [vmem:[%s1901_s5 + $0x4c] sm:$0xf]  ;;  %v269_v27 = vld [vmem:[%s1901_s5 + $0xb4] sm:$0xf]  ;;  %v1243_v28 = vcombine.low %v1916_v13, %v1919_v14  ;;  %v1945_v29 = vmax.bf16 %v1832_v12, %v266_v19  ;;  %v1948_v30 = vmax.bf16 %v1832_v12, %v267_v20 }
  0x14   : > { %1679 = vmatprep.subr.bf16.mxu0 %v1830_v1  ;;  %1791 = vmatprep.subr.bf16.mxu1 %v1830_v1  ;;  %v1951_v31 = vmax.bf16 %v1832_v12, %v242_v21  ;;  %v244_v32 = vld [vmem:[%s1901_s5 + $0x50] sm:$0xf]  ;;  %v245_v33 = vld [vmem:[%s1901_s5 + $0x54] sm:$0xf]  ;;  %v270_v34 = vld [vmem:[%s1901_s5 + $0xb8] sm:$0xf]  ;;  %v1256_v35 = vcombine.low %v299_v17, %v300_v18  ;;  %v1251_v36 = vcombine.low %v1935_v24, %v1938_v25 }
  0x15   : > { %v1959_v37 = vmax.bf16 %v1832_v12, %v243_v22  ;;  %v271_v38 = vld [vmem:[%s1901_s5 + $0xbc] sm:$0xf]  ;;  %v246_v39 = vld [vmem:[%s1901_s5 + $0x58] sm:$0xf]  ;;  %v1264_v41 = vcombine.low %v1945_v29, %v1948_v30  ;;  %v1969_v42 = vmax.bf16 %v1832_v12, %v268_v26  ;;  %v1972_v43 = vmax.bf16 %v1832_v12, %v269_v27  ;;  %v272_v44 = vld [vmem:[%s1901_s5 + $0xc0] sm:$0xf] }
  0x16   : > { %v247_v40 = vld [vmem:[%s1901_s5 + $0x5c] sm:$0xf]  ;;  %v248_v45 = vld [vmem:[%s1901_s5 + $0x60] sm:$0xf]  ;;  %v1979_v47 = vmax.bf16 %v1832_v12, %v244_v32  ;;  %v1982_v48 = vmax.bf16 %v1832_v12, %v245_v33  ;;  %v1985_v49 = vmax.bf16 %v1832_v12, %v270_v34  ;;  %v249_v50 = vld [vmem:[%s1901_s5 + $0x64] sm:$0xf]  ;;  %v1993_v54 = vmax.bf16 %v1832_v12, %v271_v38 }
  0x17   : > { %1680 = vmatpush3.bf16.msra.mxu0 %v1818_v5  ;;  %1799 = vmatpush3.bf16.msra.mxu1 %v1818_v5  ;;  %v1252_v46 = vcombine.low %v1951_v31, %v1959_v37  ;;  %v226_v51 = vld [vmem:[%s1901_s5 + $0x8] sm:$0xf]  ;;  %v227_v52 = vld [vmem:[%s1901_s5 + $0xc] sm:$0xf]  ;;  %v1265_v53 = vcombine.low %v1969_v42, %v1972_v43  ;;  %v1996_v55 = vmax.bf16 %v1832_v12, %v246_v39  ;;  %v252_v57 = vld [vmem:[%s1901_s5 + $0x70] sm:$0xf] }
  0x18   : > { %1681 = vmatprep.subr.bf16.mxu0 %v1830_v1  ;;  %1792 = vmatprep.subr.bf16.mxu1 %v1830_v1  ;;  %v1999_v56 = vmax.bf16 %v1832_v12, %v247_v40  ;;  %v253_v58 = vld [vmem:[%s1901_s5 + $0x74] sm:$0xf]  ;;  %v1253_v59 = vcombine.low %v1979_v47, %v1982_v48  ;;  %v2006_v60 = vmax.bf16 %v1832_v12, %v272_v44  ;;  %v228_v9 = vld [vmem:[%s1901_s5 + $0x10] sm:$0xf]  ;;  %v255_v13 = vld [vmem:[%s1901_s5 + $0x7c] sm:$0xf] }
  0x19   : > { %v2009_v61 = vmax.bf16 %v1832_v12, %v248_v45  ;;  %v1266_v62 = vcombine.low %v1985_v49, %v1993_v54  ;;  %v2016_v0 = vmax.bf16 %v1832_v12, %v249_v50  ;;  %v275_v2 = vmax.bf16 %v1832_v12, %v226_v51  ;;  %v229_v10 = vld [vmem:[%s1901_s5 + $0x14] sm:$0xf]  ;;  %v230_v20 = vld [vmem:[%s1901_s5 + $0x18] sm:$0xf]  ;;  %v231_v21 = vld [vmem:[%s1901_s5 + $0x1c] sm:$0xf] }
  0x1a   : > { %v1254_v63 = vcombine.low %v1996_v55, %v1999_v56  ;;  %v276_v3 = vmax.bf16 %v1832_v12, %v227_v52  ;;  %v301_v4 = vmax.bf16 %v1832_v12, %v252_v57  ;;  %v302_v5 = vmax.bf16 %v1832_v12, %v253_v58  ;;  %v256_v22 = vld [vmem:[%s1901_s5 + $0x80] sm:$0xf]  ;;  %v233_v38 = vld [vmem:[%s1901_s5 + $0x24] sm:$0xf]  ;;  %v258_v39 = vld [vmem:[%s1901_s5 + $0x88] sm:$0xf] }
  0x1b   : > { %1682 = vmatpush3.bf16.msra.mxu0 %v1819_v6  ;;  %1800 = vmatpush3.bf16.msra.mxu1 %v1819_v6  ;;  %v1255_v6 = vcombine.low %v2009_v61, %v2016_v0  ;;  %v277_v14 = vmax.bf16 %v1832_v12, %v228_v9  ;;  %v278_v15 = vmax.bf16 %v1832_v12, %v229_v10  ;;  %v259_v40 = vld [vmem:[%s1901_s5 + $0x8c] sm:$0xf]  ;;  %v234_v58 = vld [vmem:[%s1901_s5 + $0x28] sm:$0xf]  ;;  %v1377_v25 = vld [vmem:[%s2148_s14] sm:$0xff]  }
  0x1c   : > { %1683 = vmatprep.subr.bf16.mxu0 %v1830_v1  ;;  %1793 = vmatprep.subr.bf16.mxu1 %v1830_v1  ;;  %v1244_v7 = vcombine.low %v275_v2, %v276_v3  ;;  %v1257_v8 = vcombine.low %v301_v4, %v302_v5  ;;  %v304_v17 = vmax.bf16 %v1832_v12, %v255_v13  ;;  %v235_v2 = vld [vmem:[%s1901_s5 + $0x2c] sm:$0xf]  ;;  %v260_v3 = vld [vmem:[%s1901_s5 + $0x90] sm:$0xf]  ;;  %v261_v4 = vld [vmem:[%s1901_s5 + $0x94] sm:$0xf]  ;;  %v1378_v31 = vunpack.c.l.bf16 %v1377_v25 }
  0x1d   : > { %v1245_v18 = vcombine.low %v277_v14, %v278_v15  ;;  %v279_v26 = vmax.bf16 %v1832_v12, %v230_v20  ;;  %v280_v27 = vmax.bf16 %v1832_v12, %v231_v21  ;;  %v282_v45 = vmax.bf16 %v1832_v12, %v233_v38  ;;  %v236_v13 = vld [vmem:[%s1901_s5 + $0x30] sm:$0xf]  ;;  %v237_v14 = vld [vmem:[%s1901_s5 + $0x34] sm:$0xf]  ;;  %v262_v15 = vld [vmem:[%s1901_s5 + $0x98] sm:$0xf] }
  0x1e   : > { %v307_v50 = vmax.bf16 %v1832_v12, %v258_v39  ;;  %v308_v51 = vmax.bf16 %v1832_v12, %v259_v40  ;;  %v283_v5 = vmax.bf16 %v1832_v12, %v234_v58  ;;  %v310_v9 = vmax.bf16 %v1832_v12, %v261_v4  ;;  %v1604_v24 = vld [vmem:[%s2148_s14 + $0x68] sm:$0xff]   ;;  %v2155_v29 = vld [vmem:[%s2265_s2] ss:$0 sm:$0xff] }
  0x1f   : > { %1684 = vmatpush3.bf16.msra.mxu0 %v1820_v11  ;;  %1801 = vmatpush3.bf16.msra.mxu1 %v1820_v11  ;;  %v254_v11 = vld [vmem:[%s1901_s5 + $0x78] sm:$0xf]  ;;  %v1246_v33 = vcombine.low %v279_v26, %v280_v27  ;;  %v239_v26 = vld [vmem:[%s1901_s5 + $0x3c] sm:$0xf]  ;;  %v264_v27 = vld [vmem:[%s1901_s5 + $0xa0] sm:$0xf]  ;;  %v1430_v30 = vunpack.c.l.bf16 %v1604_v24  ;;  %v1379_v42 = vunpack.c.h.bf16 %v1377_v25  ;;  %v1431_v47 = vunpack.c.h.bf16 %v1604_v24 }
  0x20   : > { %1685 = vmatprep.subr.bf16.mxu0 %v1830_v1  ;;  %1794 = vmatprep.subr.bf16.mxu1 %v1830_v1  ;;  %v303_v16 = vmax.bf16 %v1832_v12, %v254_v11  ;;  %v1260_v57 = vcombine.low %v307_v50, %v308_v51 }
  0x22   : > { %v1258_v19 = vcombine.low %v303_v16, %v304_v17  ;;  %v263_v16 = vld [vmem:[%s1901_s5 + $0x9c] sm:$0xf]  ;;  %v285_v17 = vmax.bf16 %v1832_v12, %v236_v13 }
  0x23   : > { %1686 = vmatpush3.bf16.msra.mxu0 %v1821_v23  ;;  %1802 = vmatpush3.bf16.msra.mxu1 %v1821_v23  ;;  %v257_v23 = vld [vmem:[%s1901_s5 + $0x84] sm:$0xf]  ;;  %v312_v20 = vmax.bf16 %v1832_v12, %v263_v16 }
  0x24   : > { %v306_v32 = vmax.bf16 %v1832_v12, %v257_v23  ;;  %v238_v23 = vld [vmem:[%s1901_s5 + $0x38] sm:$0xf] }
  0x26   : > { %1688 = vmatmul.mubr.bf16.vlgmr.msra.gmra.mrb[0].mxu0 %v1243_v28  ;;  %1740 = vmatmul.mubr.bf16.vlgmr.msra.gmra.mrb[0].mxu1 %v1256_v35  ;;  %v305_v28 = vmax.bf16 %v1832_v12, %v256_v22  ;;  %v232_v35 = vld [vmem:[%s1901_s5 + $0x20] sm:$0xf] }
  0x27   : > { %1691 = vmatprep.mubr.msk.bf16.mxu0 %vm1831_vm0, %v1830_v1  ;;  %1743 = vmatprep.mubr.msk.bf16.mxu1 %vm1831_vm0, %v1830_v1  ;;  %v281_v44 = vmax.bf16 %v1832_v12, %v232_v35 }
  0x28   : > { %v1259_v34 = vcombine.low %v305_v28, %v306_v32  ;;  %v265_v28 = vld [vmem:[%s1901_s5 + $0xa4] sm:$0xf]  ;;  %v287_v32 = vmax.bf16 %v1832_v12, %v238_v23 }
  0x29   : > { %v1247_v52 = vcombine.low %v281_v44, %v282_v45  ;;  %v314_v35 = vmax.bf16 %v1832_v12, %v265_v28 }
  0x2e   : > { %1692 = vmatmul.mubr.bf16.gmra.mrb[4].mxu0 %v1244_v7  ;;  %1744 = vmatmul.mubr.bf16.gmra.mrb[4].mxu1 %v1257_v8  ;;  %v284_v7 = vmax.bf16 %v1832_v12, %v235_v2  ;;  %v309_v8 = vmax.bf16 %v1832_v12, %v260_v3 }
  0x2f   : > { %1695 = vmatprep.mubr.msk.bf16.mxu0 %vm1831_vm0, %v1830_v1  ;;  %1747 = vmatprep.mubr.msk.bf16.mxu1 %vm1831_vm0, %v1830_v1 }
  0x30   : > { %v1248_v10 = vcombine.low %v283_v5, %v284_v7  ;;  %v1261_v11 = vcombine.low %v309_v8, %v310_v9 }
  0x36   : > { %1696 = vmatmul.mubr.bf16.gmra.mrb[8].mxu0 %v1245_v18  ;;  %1748 = vmatmul.mubr.bf16.gmra.mrb[8].mxu1 %v1258_v19  ;;  %v286_v18 = vmax.bf16 %v1832_v12, %v237_v14  ;;  %v311_v19 = vmax.bf16 %v1832_v12, %v262_v15  ;;  %v1606_v14 = vld [vmem:[%s2148_s14 + $0x78] sm:$0xff]  }
  0x37   : > { %1699 = vmatprep.mubr.msk.bf16.mxu0 %vm1831_vm0, %v1830_v1  ;;  %1751 = vmatprep.mubr.msk.bf16.mxu1 %vm1831_vm0, %v1830_v1 }
  0x38   : > { %v1249_v21 = vcombine.low %v285_v17, %v286_v18  ;;  %v1262_v22 = vcombine.low %v311_v19, %v312_v20  ;;  %v1593_v17 = vld [vmem:[%s2148_s14 + $0x10] sm:$0xff]  }
  0x39   : > { %v1386_v23 = vunpack.c.l.bf16 %v1593_v17 }
  0x3e   : > { %1700 = vmatmul.mubr.bf16.gmra.mrb[12].mxu0 %v1246_v33  ;;  %1752 = vmatmul.mubr.bf16.gmra.mrb[12].mxu1 %v1259_v34  ;;  %v288_v33 = vmax.bf16 %v1832_v12, %v239_v26  ;;  %v313_v34 = vmax.bf16 %v1832_v12, %v264_v27  ;;  %v1267_v12 = vcombine.low %v2006_v60, %v2006_v60  ;;  %v1605_v60 = vld [vmem:[%s2148_s14 + $0x70] sm:$0xff]  }
  0x3f   : > { %1703 = vmatprep.mubr.msk.bf16.mxu0 %vm1831_vm0, %v1830_v1  ;;  %1755 = vmatprep.mubr.msk.bf16.mxu1 %vm1831_vm0, %v1830_v1  ;;  %v1434_v44 = vunpack.c.l.bf16 %v1605_v60  ;;  %v1435_v4 = vunpack.c.h.bf16 %v1605_v60 }
  0x40   : > { %v1250_v38 = vcombine.low %v287_v32, %v288_v33  ;;  %v1263_v39 = vcombine.low %v313_v34, %v314_v35  ;;  %v1387_v32 = vunpack.c.h.bf16 %v1593_v17  ;;  %v1439_v35 = vunpack.c.h.bf16 %v1606_v14 }
  0x46   : > { %1704 = vmatmul.mubr.bf16.gmra.mrb[16].mxu0 %v1247_v52  ;;  %1756 = vmatmul.mubr.bf16.gmra.mrb[16].mxu1 %v1260_v57 }
  0x47   : > { %1707 = vmatprep.mubr.msk.bf16.mxu0 %vm1831_vm0, %v1830_v1  ;;  %1759 = vmatprep.mubr.msk.bf16.mxu1 %vm1831_vm0, %v1830_v1 }
  0x4e   : > { %1708 = vmatmul.mubr.bf16.gmra.mrb[20].mxu0 %v1248_v10  ;;  %1760 = vmatmul.mubr.bf16.gmra.mrb[20].mxu1 %v1261_v11 }
  0x4f   : > { %1711 = vmatprep.mubr.msk.bf16.mxu0 %vm1831_vm0, %v1830_v1  ;;  %1763 = vmatprep.mubr.msk.bf16.mxu1 %vm1831_vm0, %v1830_v1 }
  0x56   : > { %1712 = vmatmul.mubr.bf16.gmra.mrb[24].mxu0 %v1249_v21  ;;  %1764 = vmatmul.mubr.bf16.gmra.mrb[24].mxu1 %v1262_v22  ;;  %v1438_v21 = vunpack.c.l.bf16 %v1606_v14 }
  0x57   : > { %1715 = vmatprep.mubr.msk.bf16.mxu0 %vm1831_vm0, %v1830_v1  ;;  %1767 = vmatprep.mubr.msk.bf16.mxu1 %vm1831_vm0, %v1830_v1 }
  0x5e   : > { %1716 = vmatmul.mubr.bf16.gmra.mrb[28].mxu0 %v1250_v38  ;;  %1768 = vmatmul.mubr.bf16.gmra.mrb[28].mxu1 %v1263_v39 }
  0x5f   : > { %1719 = vmatprep.mubr.msk.bf16.mxu0 %vm1831_vm0, %v1830_v1  ;;  %1771 = vmatprep.mubr.msk.bf16.mxu1 %vm1831_vm0, %v1830_v1 }
  0x66   : > { %1720 = vmatmul.mubr.bf16.gmra.mrb[32].mxu0 %v1251_v36  ;;  %1772 = vmatmul.mubr.bf16.gmra.mrb[32].mxu1 %v1264_v41 }
  0x67   : > { %1723 = vmatprep.mubr.msk.bf16.mxu0 %vm1831_vm0, %v1830_v1  ;;  %1775 = vmatprep.mubr.msk.bf16.mxu1 %vm1831_vm0, %v1830_v1 }
  0x6e   : > { %1724 = vmatmul.mubr.bf16.gmra.mrb[36].mxu0 %v1252_v46  ;;  %1776 = vmatmul.mubr.bf16.gmra.mrb[36].mxu1 %v1265_v53 }
  0x6f   : > { %1727 = vmatprep.mubr.msk.bf16.mxu0 %vm1831_vm0, %v1830_v1  ;;  %1779 = vmatprep.mubr.msk.bf16.mxu1 %vm1831_vm0, %v1830_v1 }
  0x76   : > { %1728 = vmatmul.mubr.bf16.gmra.mrb[40].mxu0 %v1253_v59  ;;  %1780 = vmatmul.mubr.bf16.gmra.mrb[40].mxu1 %v1266_v62 }
  0x77   : > { %1731 = vmatprep.mubr.msk.bf16.mxu0 %vm1831_vm0, %v1830_v1  ;;  %1783 = vmatprep.mubr.msk.bf16.mxu1 %vm1831_vm0, %v1830_v1 }
  0x7e   : > { %1732 = vmatmul.mubr.bf16.gmra.mrb[44].mxu0 %v1254_v63  ;;  %1784 = vmatmul.mubr.bf16.gmra.mrb[44].mxu1 %v1267_v12  ;;  %v1592_v63 = vld [vmem:[%s2148_s14 + $0x8] sm:$0xff]  }
  0x7f   : > { %1735 = vmatprep.mubr.msk.bf16.mxu0 %vm1831_vm0, %v1830_v1  ;;  %v1382_v50 = vunpack.c.l.bf16 %v1592_v63  ;;  %v1383_v58 = vunpack.c.h.bf16 %v1592_v63 }
  0x86   : > { %1736 = vmatmul.mubr.bf16.gmra.mrb[48].mxu0 %v1255_v6 }
  0xf9   : > { %v575_v1 = vpop.f32.mrb[0].mxu0  ;;  %v679_v36 = vpop.f32.mrb[0].mxu1 }
  0xfa   : > { %v576_v37 = vadd.f32 %v2155_v29, %v575_v1  ;;  %v1689_v41 = vpop.f32.mrb[1].mxu0  ;;  %v680_v43 = vadd.f32 %v2155_v29, %v679_v36  ;;  %v1741_v46 = vpop.f32.mrb[1].mxu1 }
  0xfb   : > { %v578_v48 = vpop.f32.mrb[2].mxu0  ;;  %v682_v49 = vpop.f32.mrb[2].mxu1  ;;  %v1594_v41 = vld [vmem:[%s2148_s14 + $0x18] sm:$0xff]  }
  0xfc   : > { %v579_v53 = vadd.f32 %v2155_v29, %v578_v48  ;;  %v1690_v54 = vpop.f32.mrb[3].mxu0  ;;  %v897_v55 = vadd.f32 %v1430_v30, %v680_v43  ;;  %v683_v56 = vadd.f32 %v2155_v29, %v682_v49  ;;  %v1742_v59 = vpop.f32.mrb[3].mxu1  ;;  %v871_v61 = vadd.f32 %v1378_v31, %v576_v37  ;;  %v1607_v31 = vld [vmem:[%s2148_s14 + $0x80] sm:$0xff]  }
  0xfd   : > { %v1390_v49 = vunpack.c.l.bf16 %v1594_v41 }
  0xfe   : > { %v872_v62 = vadd.f32 %v1379_v42, %v579_v53  ;;  %v898_v0 = vadd.f32 %v1431_v47, %v683_v56  ;;  %v1442_v47 = vunpack.c.l.bf16 %v1607_v31  ;;  %v1391_v56 = vunpack.c.h.bf16 %v1594_v41 }
 0x100   : > { %v1475_v6 = vpack.c.bf16 %v872_v62, %v871_v61  ;;  %v1540_v40 = vpack.c.bf16 %v898_v0, %v897_v55  ;;  %v1443_v61 = vunpack.c.h.bf16 %v1607_v31 }
 0x101   : > { %v583_v45 = vpop.f32.mrb[4].mxu0  ;;  %v687_v51 = vpop.f32.mrb[4].mxu1 }
 0x102   : > { %1476 = vst [vmem:[%s2167_s20] sm:$0xff] %v1475_v6   ;;  %v584_v52 = vadd.f32 %v2155_v29, %v583_v45  ;;  %v1693_v57 = vpop.f32.mrb[5].mxu0  ;;  %1627 = vst [vmem:[%s2167_s20 + $0x68] sm:$0xff] %v1540_v40   ;;  %v688_v2 = vadd.f32 %v2155_v29, %v687_v51  ;;  %v1745_v3 = vpop.f32.mrb[5].mxu1 }
 0x103   : > { %v586_v5 = vpop.f32.mrb[6].mxu0  ;;  %v690_v7 = vpop.f32.mrb[6].mxu1  ;;  %v1595_v57 = vld [vmem:[%s2148_s14 + $0x20] sm:$0xff]  }
 0x104   : > { %v587_v8 = vadd.f32 %v2155_v29, %v586_v5  ;;  %v1694_v9 = vpop.f32.mrb[7].mxu0  ;;  %v899_v10 = vadd.f32 %v1434_v44, %v688_v2  ;;  %v691_v11 = vadd.f32 %v2155_v29, %v690_v7  ;;  %v1746_v13 = vpop.f32.mrb[7].mxu1  ;;  %v873_v15 = vadd.f32 %v1382_v50, %v584_v52  ;;  %v1608_v50 = vld [vmem:[%s2148_s14 + $0x88] sm:$0xff]  }
 0x105   : > { %v1394_v7 = vunpack.c.l.bf16 %v1595_v57 }
 0x106   : > { %v874_v16 = vadd.f32 %v1383_v58, %v587_v8  ;;  %v900_v18 = vadd.f32 %v1435_v4, %v691_v11  ;;  %v1446_v4 = vunpack.c.l.bf16 %v1608_v50  ;;  %v1395_v11 = vunpack.c.h.bf16 %v1595_v57 }
 0x108   : > { %v1480_v19 = vpack.c.bf16 %v874_v16, %v873_v15  ;;  %v1545_v20 = vpack.c.bf16 %v900_v18, %v899_v10  ;;  %v1447_v15 = vunpack.c.h.bf16 %v1608_v50 }
 0x109   : > { %v591_v22 = vpop.f32.mrb[8].mxu0  ;;  %v695_v26 = vpop.f32.mrb[8].mxu1 }
 0x10a   : > { %1615 = vst [vmem:[%s2167_s20 + $0x8] sm:$0xff] %v1480_v19   ;;  %v592_v27 = vadd.f32 %v2155_v29, %v591_v22  ;;  %v1697_v28 = vpop.f32.mrb[9].mxu0  ;;  %1628 = vst [vmem:[%s2167_s20 + $0x70] sm:$0xff] %v1545_v20   ;;  %v696_v33 = vadd.f32 %v2155_v29, %v695_v26  ;;  %v1749_v34 = vpop.f32.mrb[9].mxu1 }
 0x10b   : > { %v594_v38 = vpop.f32.mrb[10].mxu0  ;;  %v698_v39 = vpop.f32.mrb[10].mxu1  ;;  %v1596_v28 = vld [vmem:[%s2148_s14 + $0x28] sm:$0xff]  }
 0x10c   : > { %v595_v12 = vadd.f32 %v2155_v29, %v594_v38  ;;  %v1698_v24 = vpop.f32.mrb[11].mxu0  ;;  %v901_v25 = vadd.f32 %v1438_v21, %v696_v33  ;;  %v699_v30 = vadd.f32 %v2155_v29, %v698_v39  ;;  %v1750_v1 = vpop.f32.mrb[11].mxu1  ;;  %v875_v36 = vadd.f32 %v1386_v23, %v592_v27  ;;  %v1609_v23 = vld [vmem:[%s2148_s14 + $0x90] sm:$0xff]  }
 0x10d   : > { %v1398_v39 = vunpack.c.l.bf16 %v1596_v28 }
 0x10e   : > { %v876_v37 = vadd.f32 %v1387_v32, %v595_v12  ;;  %v902_v42 = vadd.f32 %v1439_v35, %v699_v30  ;;  %v1450_v35 = vunpack.c.l.bf16 %v1609_v23  ;;  %v1399_v30 = vunpack.c.h.bf16 %v1596_v28 }
 0x110   : > { %v1485_v43 = vpack.c.bf16 %v876_v37, %v875_v36  ;;  %v1550_v46 = vpack.c.bf16 %v902_v42, %v901_v25  ;;  %v1451_v36 = vunpack.c.h.bf16 %v1609_v23 }
 0x111   : > { %v599_v48 = vpop.f32.mrb[12].mxu0  ;;  %v703_v53 = vpop.f32.mrb[12].mxu1 }
 0x112   : > { %1616 = vst [vmem:[%s2167_s20 + $0x10] sm:$0xff] %v1485_v43   ;;  %v600_v54 = vadd.f32 %v2155_v29, %v599_v48  ;;  %v1701_v55 = vpop.f32.mrb[13].mxu0  ;;  %1629 = vst [vmem:[%s2167_s20 + $0x78] sm:$0xff] %v1550_v46   ;;  %v704_v59 = vadd.f32 %v2155_v29, %v703_v53  ;;  %v1753_v60 = vpop.f32.mrb[13].mxu1 }
 0x113   : > { %v602_v62 = vpop.f32.mrb[14].mxu0  ;;  %v706_v63 = vpop.f32.mrb[14].mxu1  ;;  %v1597_v55 = vld [vmem:[%s2148_s14 + $0x30] sm:$0xff]  }
 0x114   : > { %v603_v0 = vadd.f32 %v2155_v29, %v602_v62  ;;  %v1702_v6 = vpop.f32.mrb[15].mxu0  ;;  %v903_v40 = vadd.f32 %v1442_v47, %v704_v59  ;;  %v707_v44 = vadd.f32 %v2155_v29, %v706_v63  ;;  %v1754_v45 = vpop.f32.mrb[15].mxu1  ;;  %v877_v51 = vadd.f32 %v1390_v49, %v600_v54  ;;  %v1610_v49 = vld [vmem:[%s2148_s14 + $0x98] sm:$0xff]  }
 0x115   : > { %v1402_v63 = vunpack.c.l.bf16 %v1597_v55 }
 0x116   : > { %v878_v52 = vadd.f32 %v1391_v56, %v603_v0  ;;  %v904_v58 = vadd.f32 %v1443_v61, %v707_v44  ;;  %v1454_v61 = vunpack.c.l.bf16 %v1610_v49  ;;  %v1403_v44 = vunpack.c.h.bf16 %v1597_v55 }
 0x118   : > { %v1490_v2 = vpack.c.bf16 %v878_v52, %v877_v51  ;;  %v1555_v3 = vpack.c.bf16 %v904_v58, %v903_v40  ;;  %v1455_v51 = vunpack.c.h.bf16 %v1610_v49 }
 0x119   : > { %v607_v5 = vpop.f32.mrb[16].mxu0  ;;  %v711_v8 = vpop.f32.mrb[16].mxu1 }
 0x11a   : > { %1617 = vst [vmem:[%s2167_s20 + $0x18] sm:$0xff] %v1490_v2   ;;  %v608_v9 = vadd.f32 %v2155_v29, %v607_v5  ;;  %v1705_v10 = vpop.f32.mrb[17].mxu0  ;;  %1630 = vst [vmem:[%s2167_s20 + $0x80] sm:$0xff] %v1555_v3   ;;  %v712_v13 = vadd.f32 %v2155_v29, %v711_v8  ;;  %v1757_v14 = vpop.f32.mrb[17].mxu1 }
 0x11b   : > { %v610_v16 = vpop.f32.mrb[18].mxu0  ;;  %v714_v17 = vpop.f32.mrb[18].mxu1  ;;  %v1598_v10 = vld [vmem:[%s2148_s14 + $0x38] sm:$0xff]  }
 0x11c   : > { %v611_v18 = vadd.f32 %v2155_v29, %v610_v16  ;;  %v1706_v19 = vpop.f32.mrb[19].mxu0  ;;  %v905_v20 = vadd.f32 %v1446_v4, %v712_v13  ;;  %v715_v21 = vadd.f32 %v2155_v29, %v714_v17  ;;  %v1758_v22 = vpop.f32.mrb[19].mxu1  ;;  %v879_v26 = vadd.f32 %v1394_v7, %v608_v9  ;;  %v1611_v7 = vld [vmem:[%s2148_s14 + $0xa0] sm:$0xff]  }
 0x11d   : > { %v1406_v17 = vunpack.c.l.bf16 %v1598_v10 }
 0x11e   : > { %v880_v27 = vadd.f32 %v1395_v11, %v611_v18  ;;  %v906_v32 = vadd.f32 %v1447_v15, %v715_v21  ;;  %v1458_v15 = vunpack.c.l.bf16 %v1611_v7  ;;  %v1407_v21 = vunpack.c.h.bf16 %v1598_v10 }
 0x120   : > { %v1495_v33 = vpack.c.bf16 %v880_v27, %v879_v26  ;;  %v1560_v34 = vpack.c.bf16 %v906_v32, %v905_v20  ;;  %v1459_v26 = vunpack.c.h.bf16 %v1611_v7 }
 0x121   : > { %v615_v38 = vpop.f32.mrb[20].mxu0  ;;  %v719_v12 = vpop.f32.mrb[20].mxu1 }
 0x122   : > { %1618 = vst [vmem:[%s2167_s20 + $0x20] sm:$0xff] %v1495_v33   ;;  %v616_v24 = vadd.f32 %v2155_v29, %v615_v38  ;;  %v1709_v25 = vpop.f32.mrb[21].mxu0  ;;  %1631 = vst [vmem:[%s2167_s20 + $0x88] sm:$0xff] %v1560_v34   ;;  %v720_v1 = vadd.f32 %v2155_v29, %v719_v12  ;;  %v1761_v31 = vpop.f32.mrb[21].mxu1 }
 0x123   : > { %v618_v37 = vpop.f32.mrb[22].mxu0  ;;  %v722_v41 = vpop.f32.mrb[22].mxu1  ;;  %v1599_v25 = vld [vmem:[%s2148_s14 + $0x40] sm:$0xff]  }
 0x124   : > { %v619_v42 = vadd.f32 %v2155_v29, %v618_v37  ;;  %v1710_v43 = vpop.f32.mrb[23].mxu0  ;;  %v907_v46 = vadd.f32 %v1450_v35, %v720_v1  ;;  %v723_v47 = vadd.f32 %v2155_v29, %v722_v41  ;;  %v1762_v48 = vpop.f32.mrb[23].mxu1  ;;  %v881_v53 = vadd.f32 %v1398_v39, %v616_v24  ;;  %v1612_v39 = vld [vmem:[%s2148_s14 + $0xa8] sm:$0xff]  }
 0x125   : > { %v1410_v41 = vunpack.c.l.bf16 %v1599_v25 }
 0x126   : > { %v882_v54 = vadd.f32 %v1399_v30, %v619_v42  ;;  %v908_v56 = vadd.f32 %v1451_v36, %v723_v47  ;;  %v1462_v36 = vunpack.c.l.bf16 %v1612_v39  ;;  %v1411_v47 = vunpack.c.h.bf16 %v1599_v25 }
 0x128   : > { %v1500_v59 = vpack.c.bf16 %v882_v54, %v881_v53  ;;  %v1565_v60 = vpack.c.bf16 %v908_v56, %v907_v46  ;;  %v1463_v53 = vunpack.c.h.bf16 %v1612_v39 }
 0x129   : > { %v623_v62 = vpop.f32.mrb[24].mxu0  ;;  %v727_v0 = vpop.f32.mrb[24].mxu1 }
 0x12a   : > { %1619 = vst [vmem:[%s2167_s20 + $0x28] sm:$0xff] %v1500_v59   ;;  %v624_v6 = vadd.f32 %v2155_v29, %v623_v62  ;;  %v1713_v40 = vpop.f32.mrb[25].mxu0  ;;  %1632 = vst [vmem:[%s2167_s20 + $0x90] sm:$0xff] %v1565_v60   ;;  %v728_v45 = vadd.f32 %v2155_v29, %v727_v0  ;;  %v1765_v50 = vpop.f32.mrb[25].mxu1 }
 0x12b   : > { %v626_v52 = vpop.f32.mrb[26].mxu0  ;;  %v730_v57 = vpop.f32.mrb[26].mxu1  ;;  %v1600_v40 = vld [vmem:[%s2148_s14 + $0x48] sm:$0xff]  }
 0x12c   : > { %v627_v58 = vadd.f32 %v2155_v29, %v626_v52  ;;  %v1714_v2 = vpop.f32.mrb[27].mxu0  ;;  %v909_v3 = vadd.f32 %v1454_v61, %v728_v45  ;;  %v731_v4 = vadd.f32 %v2155_v29, %v730_v57  ;;  %v1766_v5 = vpop.f32.mrb[27].mxu1  ;;  %v883_v8 = vadd.f32 %v1402_v63, %v624_v6  ;;  %v1613_v63 = vld [vmem:[%s2148_s14 + $0xb0] sm:$0xff]  }
 0x12d   : > { %v1414_v57 = vunpack.c.l.bf16 %v1600_v40 }
 0x12e   : > { %v884_v9 = vadd.f32 %v1403_v44, %v627_v58  ;;  %v910_v11 = vadd.f32 %v1455_v51, %v731_v4  ;;  %v1466_v51 = vunpack.c.l.bf16 %v1613_v63  ;;  %v1415_v4 = vunpack.c.h.bf16 %v1600_v40 }
 0x130   : > { %v1505_v13 = vpack.c.bf16 %v884_v9, %v883_v8  ;;  %v1570_v14 = vpack.c.bf16 %v910_v11, %v909_v3  ;;  %v1467_v8 = vunpack.c.h.bf16 %v1613_v63 }
 0x131   : > { %v631_v16 = vpop.f32.mrb[28].mxu0  ;;  %v735_v18 = vpop.f32.mrb[28].mxu1 }
 0x132   : > { %1620 = vst [vmem:[%s2167_s20 + $0x30] sm:$0xff] %v1505_v13   ;;  %v632_v19 = vadd.f32 %v2155_v29, %v631_v16  ;;  %v1717_v20 = vpop.f32.mrb[29].mxu0  ;;  %1633 = vst [vmem:[%s2167_s20 + $0x98] sm:$0xff] %v1570_v14   ;;  %v736_v22 = vadd.f32 %v2155_v29, %v735_v18  ;;  %v1769_v23 = vpop.f32.mrb[29].mxu1 }
 0x133   : > { %v634_v27 = vpop.f32.mrb[30].mxu0  ;;  %v738_v28 = vpop.f32.mrb[30].mxu1  ;;  %v1601_v20 = vld [vmem:[%s2148_s14 + $0x50] sm:$0xff]  }
 0x134   : > { %v635_v32 = vadd.f32 %v2155_v29, %v634_v27  ;;  %v1718_v33 = vpop.f32.mrb[31].mxu0  ;;  %v911_v34 = vadd.f32 %v1458_v15, %v736_v22  ;;  %v739_v35 = vadd.f32 %v2155_v29, %v738_v28  ;;  %v1770_v38 = vpop.f32.mrb[31].mxu1  ;;  %v885_v12 = vadd.f32 %v1406_v17, %v632_v19  ;;  %v1614_v17 = vld [vmem:[%s2148_s14 + $0xb8] sm:$0xff]  }
 0x135   : > { %v1418_v28 = vunpack.c.l.bf16 %v1601_v20 }
 0x136   : > { %v886_v24 = vadd.f32 %v1407_v21, %v635_v32  ;;  %v912_v30 = vadd.f32 %v1459_v26, %v739_v35  ;;  %v1470_v26 = vunpack.c.l.bf16 %v1614_v17  ;;  %v1419_v35 = vunpack.c.h.bf16 %v1601_v20 }
 0x138   : > { %v1510_v1 = vpack.c.bf16 %v886_v24, %v885_v12  ;;  %v1575_v31 = vpack.c.bf16 %v912_v30, %v911_v34  ;;  %v1471_v12 = vunpack.c.h.bf16 %v1614_v17 }
 0x139   : > { %v639_v37 = vpop.f32.mrb[32].mxu0  ;;  %v743_v42 = vpop.f32.mrb[32].mxu1 }
 0x13a   : > { %1621 = vst [vmem:[%s2167_s20 + $0x38] sm:$0xff] %v1510_v1   ;;  %v640_v43 = vadd.f32 %v2155_v29, %v639_v37  ;;  %v1721_v46 = vpop.f32.mrb[33].mxu0  ;;  %1634 = vst [vmem:[%s2167_s20 + $0xa0] sm:$0xff] %v1575_v31   ;;  %v744_v48 = vadd.f32 %v2155_v29, %v743_v42  ;;  %v1773_v49 = vpop.f32.mrb[33].mxu1 }
 0x13b   : > { %v642_v54 = vpop.f32.mrb[34].mxu0  ;;  %v746_v55 = vpop.f32.mrb[34].mxu1 }
 0x13c   : > { %v643_v56 = vadd.f32 %v2155_v29, %v642_v54  ;;  %v1722_v59 = vpop.f32.mrb[35].mxu0  ;;  %v913_v60 = vadd.f32 %v1462_v36, %v744_v48  ;;  %v747_v61 = vadd.f32 %v2155_v29, %v746_v55  ;;  %v1774_v62 = vpop.f32.mrb[35].mxu1  ;;  %v887_v0 = vadd.f32 %v1410_v41, %v640_v43  ;;  %v821_v41 = vld [vmem:[%s2148_s14 + $0xc0] sm:$0xf] }
 0x13e   : > { %v888_v6 = vadd.f32 %v1411_v47, %v643_v56  ;;  %v914_v44 = vadd.f32 %v1463_v53, %v747_v61  ;;  %v1602_v47 = vld [vmem:[%s2148_s14 + $0x58] sm:$0xff]   ;;  %v870_v53 = vunpack.c.l.bf16 %v821_v41 }
 0x13f   : > { %v1422_v59 = vunpack.c.l.bf16 %v1602_v47  ;;  %v1423_v61 = vunpack.c.h.bf16 %v1602_v47 }
 0x140   : > { %v1515_v45 = vpack.c.bf16 %v888_v6, %v887_v0  ;;  %v1580_v50 = vpack.c.bf16 %v914_v44, %v913_v60 }
 0x141   : > { %v647_v52 = vpop.f32.mrb[36].mxu0  ;;  %v751_v58 = vpop.f32.mrb[36].mxu1 }
 0x142   : > { %1622 = vst [vmem:[%s2167_s20 + $0x40] sm:$0xff] %v1515_v45   ;;  %v648_v2 = vadd.f32 %v2155_v29, %v647_v52  ;;  %v1725_v3 = vpop.f32.mrb[37].mxu0  ;;  %1635 = vst [vmem:[%s2167_s20 + $0xa8] sm:$0xff] %v1580_v50   ;;  %v752_v5 = vadd.f32 %v2155_v29, %v751_v58  ;;  %v1777_v7 = vpop.f32.mrb[37].mxu1  ;;  %v1603_v58 = vld [vmem:[%s2148_s14 + $0x60] sm:$0xff]  }
 0x143   : > { %v650_v9 = vpop.f32.mrb[38].mxu0  ;;  %v754_v10 = vpop.f32.mrb[38].mxu1 }
 0x144   : > { %v651_v11 = vadd.f32 %v2155_v29, %v650_v9  ;;  %v1726_v13 = vpop.f32.mrb[39].mxu0  ;;  %v915_v14 = vadd.f32 %v1466_v51, %v752_v5  ;;  %v755_v15 = vadd.f32 %v2155_v29, %v754_v10  ;;  %v1778_v16 = vpop.f32.mrb[39].mxu1  ;;  %v889_v18 = vadd.f32 %v1414_v57, %v648_v2 }
 0x145   : > { %v1426_v5 = vunpack.c.l.bf16 %v1603_v58 }
 0x146   : > { %v890_v19 = vadd.f32 %v1415_v4, %v651_v11  ;;  %v916_v21 = vadd.f32 %v1467_v8, %v755_v15  ;;  %v1427_v8 = vunpack.c.h.bf16 %v1603_v58 }
 0x148   : > { %v1520_v22 = vpack.c.bf16 %v890_v19, %v889_v18  ;;  %v1585_v23 = vpack.c.bf16 %v916_v21, %v915_v14 }
 0x149   : > { %v655_v27 = vpop.f32.mrb[40].mxu0  ;;  %v759_v32 = vpop.f32.mrb[40].mxu1 }
 0x14a   : > { %1623 = vst [vmem:[%s2167_s20 + $0x48] sm:$0xff] %v1520_v22   ;;  %v656_v33 = vadd.f32 %v2155_v29, %v655_v27  ;;  %v1729_v34 = vpop.f32.mrb[41].mxu0  ;;  %1636 = vst [vmem:[%s2167_s20 + $0xb0] sm:$0xff] %v1585_v23   ;;  %v760_v38 = vadd.f32 %v2155_v29, %v759_v32  ;;  %v1781_v39 = vpop.f32.mrb[41].mxu1 }
 0x14b   : > { %v658_v24 = vpop.f32.mrb[42].mxu0  ;;  %v762_v25 = vpop.f32.mrb[42].mxu1 }
 0x14c   : > { %v659_v30 = vadd.f32 %v2155_v29, %v658_v24  ;;  %v1730_v1 = vpop.f32.mrb[43].mxu0  ;;  %v917_v31 = vadd.f32 %v1470_v26, %v760_v38  ;;  %v763_v36 = vadd.f32 %v2155_v29, %v762_v25  ;;  %v1782_v37 = vpop.f32.mrb[43].mxu1  ;;  %v891_v42 = vadd.f32 %v1418_v28, %v656_v33 }
 0x14e   : > { %v892_v43 = vadd.f32 %v1419_v35, %v659_v30  ;;  %v918_v46 = vadd.f32 %v1471_v12, %v763_v36 }
 0x150   : > { %v1525_v48 = vpack.c.bf16 %v892_v43, %v891_v42  ;;  %v1590_v49 = vpack.c.bf16 %v918_v46, %v917_v31 }
 0x151   : > { %v663_v54 = vpop.f32.mrb[44].mxu0  ;;  %v767_v55 = vpop.f32.mrb[44].mxu1 }
 0x152   : > { %1624 = vst [vmem:[%s2167_s20 + $0x50] sm:$0xff] %v1525_v48   ;;  %v664_v56 = vadd.f32 %v2155_v29, %v663_v54  ;;  %v1733_v60 = vpop.f32.mrb[45].mxu0  ;;  %1637 = vst [vmem:[%s2167_s20 + $0xb8] sm:$0xff] %v1590_v49   ;;  %v768_v62 = vadd.f32 %v2155_v29, %v767_v55  ;;  %v1785_v63 = vpop.f32.mrb[45].mxu1 }
 0x153   : > { %v666_v0 = vpop.f32.mrb[46].mxu0  ;;  %v770_v6 = vpop.f32.mrb[46].mxu1 }
 0x154   : > { %v667_v40 = vadd.f32 %v2155_v29, %v666_v0  ;;  %v1734_v44 = vpop.f32.mrb[47].mxu0  ;;  %v919_v45 = vadd.f32 %v870_v53, %v768_v62  ;;  %v1786_v50 = vpop.f32.mrb[47].mxu1  ;;  %v893_v51 = vadd.f32 %v1422_v59, %v664_v56 }
 0x156   : > { %v894_v52 = vadd.f32 %v1423_v61, %v667_v40  ;;  %v1375_v57 = vpack.c.bf16 %v919_v45, %v919_v45 }
 0x158   : > { %v1530_v2 = vpack.c.bf16 %v894_v52, %v893_v51  ;;  %1165 = vst [vmem:[%s2167_s20 + $0xc0] sm:$0xf] %v1375_v57 }
 0x159   : > { %v671_v3 = vpop.f32.mrb[48].mxu0 }
 0x15a   : > { %1625 = vst [vmem:[%s2167_s20 + $0x58] sm:$0xff] %v1530_v2   ;;  %v672_v4 = vadd.f32 %v2155_v29, %v671_v3  ;;  %v1737_v7 = vpop.f32.mrb[49].mxu0 }
 0x15b   : > { %v674_v9 = vpop.f32.mrb[50].mxu0 }
 0x15c   : > { %v675_v10 = vadd.f32 %v2155_v29, %v674_v9  ;;  %v1738_v11 = vpop.f32.mrb[51].mxu0  ;;  %v895_v13 = vadd.f32 %v1426_v5, %v672_v4 }
 0x15e   : > { %v896_v14 = vadd.f32 %v1427_v8, %v675_v10 }
 0x160   : > { %v1535_v15 = vpack.c.bf16 %v896_v14, %v895_v13 }
 0x162   : > { %1626 = vst [vmem:[%s2167_s20 + $0x60] sm:$0xff] %v1535_v15  }
 0x163 PF: > { %s14_s15 = sadd.s32 1, %s1828_s15  }
 0x164   : > { %p11_p4 = scmp.ge.s32.totalorder %s14_s15, 6  }
 0x166   :  { %13 = sbr.rel (!%p11_p4) target bundleno = 1 (0x1), region = 69 }

// kernel: _lambda_.18
= control target key start
LH: loop header
LB: loop body
LE: loop exit
PB: predicated region body
PF: predicated region fallthrough
CT: control target
= control target key end

     0   :  { %v1240_v0 = vmov 0.0   ;;  %vm1241_vm0 = vmmov 0   ;;  %s1556_s1 = inlined_call_operand.vmem [shape: bf16[128,128], index: 1, kind: input, shape index: {}]   ;;  %s1557_s0 = inlined_call_operand.vmem [shape: bf16[392,128], index: 0, kind: input, shape index: {}]   ;;  %s1558_s2 = inlined_call_operand.vmem [shape: f32[1,128], index: 2, kind: input, shape index: {}]   ;;  %s1559_s3 = inlined_call_operand.vmem [shape: bf16[392,128], index: 3, kind: output, shape index: {}]  }
   0x1   :  { %1073 = vmatprep.subr.bf16.mxu0 %v1240_v0  ;;  %v1207_v1 = vld [vmem:[%s1556_s1] sm:$0xff]   ;;  %1189 = vmatprep.subr.bf16.mxu1 %v1240_v0  ;;  %v1208_v2 = vld [vmem:[%s1556_s1 + $0x8] sm:$0xff]   ;;  %v1209_v3 = vld [vmem:[%s1556_s1 + $0x10] sm:$0xff]  }
   0x2   :  { %1089 = vmatprep.mubr.msk.bf16.mxu0 %vm1241_vm0, %v1240_v0  ;;  %1141 = vmatprep.mubr.msk.bf16.mxu1 %vm1241_vm0, %v1240_v0  ;;  %v1210_v4 = vld [vmem:[%s1556_s1 + $0x18] sm:$0xff]   ;;  %v1211_v5 = vld [vmem:[%s1556_s1 + $0x20] sm:$0xff]   ;;  %v1212_v6 = vld [vmem:[%s1556_s1 + $0x28] sm:$0xff]  }
   0x3   :  { %1074 = vmatpush3.bf16.msra.mxu0 %v1207_v1  ;;  %1197 = vmatpush3.bf16.msra.mxu1 %v1207_v1  ;;  %v1213_v7 = vld [vmem:[%s1556_s1 + $0x30] sm:$0xff]   ;;  %v1214_v8 = vld [vmem:[%s1556_s1 + $0x38] sm:$0xff]   ;;  %v1215_v9 = vld [vmem:[%s1557_s0] sm:$0xff]  }
   0x4   :  { %1075 = vmatprep.subr.bf16.mxu0 %v1240_v0  ;;  %1190 = vmatprep.subr.bf16.mxu1 %v1240_v0  ;;  %v1216_v10 = vld [vmem:[%s1557_s0 + $0x68] sm:$0xff]   ;;  %v1218_v12 = vld [vmem:[%s1557_s0 + $0x70] sm:$0xff]   ;;  %v1220_v14 = vld [vmem:[%s1557_s0 + $0x78] sm:$0xff]  }
   0x5   :  { %v1217_v11 = vld [vmem:[%s1557_s0 + $0x8] sm:$0xff]   ;;  %v1219_v13 = vld [vmem:[%s1557_s0 + $0x10] sm:$0xff]   ;;  %v1221_v15 = vld [vmem:[%s1557_s0 + $0x18] sm:$0xff]  }
   0x6   :  { %v1222_v16 = vld [vmem:[%s1557_s0 + $0x80] sm:$0xff]   ;;  %v1224_v18 = vld [vmem:[%s1557_s0 + $0x88] sm:$0xff]   ;;  %v1226_v20 = vld [vmem:[%s1557_s0 + $0x90] sm:$0xff]  }
   0x7   :  { %1076 = vmatpush3.bf16.msra.mxu0 %v1208_v2  ;;  %1198 = vmatpush3.bf16.msra.mxu1 %v1208_v2  ;;  %v1223_v17 = vld [vmem:[%s1557_s0 + $0x20] sm:$0xff]   ;;  %v1225_v19 = vld [vmem:[%s1557_s0 + $0x28] sm:$0xff]   ;;  %v1227_v21 = vld [vmem:[%s1557_s0 + $0x30] sm:$0xff]  }
   0x8   :  { %1077 = vmatprep.subr.bf16.mxu0 %v1240_v0  ;;  %1191 = vmatprep.subr.bf16.mxu1 %v1240_v0  ;;  %v1228_v22 = vld [vmem:[%s1557_s0 + $0x98] sm:$0xff]   ;;  %v1230_v24 = vld [vmem:[%s1557_s0 + $0xa0] sm:$0xff]   ;;  %v1232_v26 = vld [vmem:[%s1557_s0 + $0xa8] sm:$0xff]  }
   0x9   :  { %v1229_v23 = vld [vmem:[%s1557_s0 + $0x38] sm:$0xff]   ;;  %v1231_v25 = vld [vmem:[%s1557_s0 + $0x40] sm:$0xff]   ;;  %v1233_v27 = vld [vmem:[%s1557_s0 + $0x48] sm:$0xff]  }
   0xa   :  { %v1234_v28 = vld [vmem:[%s1557_s0 + $0xb0] sm:$0xff]   ;;  %v1236_v30 = vld [vmem:[%s1557_s0 + $0xb8] sm:$0xff]   ;;  %v1238_v32 = vld [vmem:[%s1557_s0 + $0xc0] ss:$0 sps:$4 sm:$0xff]  }
   0xb   :  { %1078 = vmatpush3.bf16.msra.mxu0 %v1209_v3  ;;  %1199 = vmatpush3.bf16.msra.mxu1 %v1209_v3  ;;  %v1235_v29 = vld [vmem:[%s1557_s0 + $0x50] sm:$0xff]   ;;  %v1237_v31 = vld [vmem:[%s1557_s0 + $0x58] sm:$0xff]   ;;  %v1239_v33 = vld [vmem:[%s1557_s0 + $0x60] sm:$0xff]  }
   0xc   :  { %1079 = vmatprep.subr.bf16.mxu0 %v1240_v0  ;;  %1192 = vmatprep.subr.bf16.mxu1 %v1240_v0  ;;  %v1430_v34 = vld [vmem:[%s1558_s2] ss:$0 sm:$0xff] }
   0xf   :  { %1080 = vmatpush3.bf16.msra.mxu0 %v1210_v4  ;;  %1200 = vmatpush3.bf16.msra.mxu1 %v1210_v4 }
  0x10   :  { %1081 = vmatprep.subr.bf16.mxu0 %v1240_v0  ;;  %1193 = vmatprep.subr.bf16.mxu1 %v1240_v0 }
  0x13   :  { %1082 = vmatpush3.bf16.msra.mxu0 %v1211_v5  ;;  %1201 = vmatpush3.bf16.msra.mxu1 %v1211_v5 }
  0x14   :  { %1083 = vmatprep.subr.bf16.mxu0 %v1240_v0  ;;  %1194 = vmatprep.subr.bf16.mxu1 %v1240_v0 }
  0x17   :  { %1084 = vmatpush3.bf16.msra.mxu0 %v1212_v6  ;;  %1202 = vmatpush3.bf16.msra.mxu1 %v1212_v6 }
  0x18   :  { %1085 = vmatprep.subr.bf16.mxu0 %v1240_v0  ;;  %1195 = vmatprep.subr.bf16.mxu1 %v1240_v0 }
  0x1b   :  { %1086 = vmatpush3.bf16.msra.mxu0 %v1213_v7  ;;  %1203 = vmatpush3.bf16.msra.mxu1 %v1213_v7 }
  0x1c   :  { %1087 = vmatprep.subr.bf16.mxu0 %v1240_v0  ;;  %1196 = vmatprep.subr.bf16.mxu1 %v1240_v0 }
  0x1f   :  { %1088 = vmatpush3.bf16.msra.mxu0 %v1214_v8  ;;  %1204 = vmatpush3.bf16.msra.mxu1 %v1214_v8 }
  0x22   :  { %1090 = vmatmul.mubr.bf16.vlgmr.msra.gmra.mrb[0].mxu0 %v1215_v9  ;;  %1142 = vmatmul.mubr.bf16.vlgmr.msra.gmra.mrb[0].mxu1 %v1216_v10 }
  0x23   :  { %1093 = vmatprep.mubr.msk.bf16.mxu0 %vm1241_vm0, %v1240_v0  ;;  %1145 = vmatprep.mubr.msk.bf16.mxu1 %vm1241_vm0, %v1240_v0 }
  0x2a   :  { %1094 = vmatmul.mubr.bf16.gmra.mrb[4].mxu0 %v1217_v11  ;;  %1146 = vmatmul.mubr.bf16.gmra.mrb[4].mxu1 %v1218_v12 }
  0x2b   :  { %1097 = vmatprep.mubr.msk.bf16.mxu0 %vm1241_vm0, %v1240_v0  ;;  %1149 = vmatprep.mubr.msk.bf16.mxu1 %vm1241_vm0, %v1240_v0 }
  0x32   :  { %1098 = vmatmul.mubr.bf16.gmra.mrb[8].mxu0 %v1219_v13  ;;  %1150 = vmatmul.mubr.bf16.gmra.mrb[8].mxu1 %v1220_v14 }
  0x33   :  { %1101 = vmatprep.mubr.msk.bf16.mxu0 %vm1241_vm0, %v1240_v0  ;;  %1153 = vmatprep.mubr.msk.bf16.mxu1 %vm1241_vm0, %v1240_v0 }
  0x3a   :  { %1102 = vmatmul.mubr.bf16.gmra.mrb[12].mxu0 %v1221_v15  ;;  %1154 = vmatmul.mubr.bf16.gmra.mrb[12].mxu1 %v1222_v16 }
  0x3b   :  { %1105 = vmatprep.mubr.msk.bf16.mxu0 %vm1241_vm0, %v1240_v0  ;;  %1157 = vmatprep.mubr.msk.bf16.mxu1 %vm1241_vm0, %v1240_v0 }
  0x42   :  { %1106 = vmatmul.mubr.bf16.gmra.mrb[16].mxu0 %v1223_v17  ;;  %1158 = vmatmul.mubr.bf16.gmra.mrb[16].mxu1 %v1224_v18 }
  0x43   :  { %1109 = vmatprep.mubr.msk.bf16.mxu0 %vm1241_vm0, %v1240_v0  ;;  %1161 = vmatprep.mubr.msk.bf16.mxu1 %vm1241_vm0, %v1240_v0 }
  0x4a   :  { %1110 = vmatmul.mubr.bf16.gmra.mrb[20].mxu0 %v1225_v19  ;;  %1162 = vmatmul.mubr.bf16.gmra.mrb[20].mxu1 %v1226_v20 }
  0x4b   :  { %1113 = vmatprep.mubr.msk.bf16.mxu0 %vm1241_vm0, %v1240_v0  ;;  %1165 = vmatprep.mubr.msk.bf16.mxu1 %vm1241_vm0, %v1240_v0 }
  0x52   :  { %1114 = vmatmul.mubr.bf16.gmra.mrb[24].mxu0 %v1227_v21  ;;  %1166 = vmatmul.mubr.bf16.gmra.mrb[24].mxu1 %v1228_v22 }
  0x53   :  { %1117 = vmatprep.mubr.msk.bf16.mxu0 %vm1241_vm0, %v1240_v0  ;;  %1169 = vmatprep.mubr.msk.bf16.mxu1 %vm1241_vm0, %v1240_v0 }
  0x5a   :  { %1118 = vmatmul.mubr.bf16.gmra.mrb[28].mxu0 %v1229_v23  ;;  %1170 = vmatmul.mubr.bf16.gmra.mrb[28].mxu1 %v1230_v24 }
  0x5b   :  { %1121 = vmatprep.mubr.msk.bf16.mxu0 %vm1241_vm0, %v1240_v0  ;;  %1173 = vmatprep.mubr.msk.bf16.mxu1 %vm1241_vm0, %v1240_v0 }
  0x62   :  { %1122 = vmatmul.mubr.bf16.gmra.mrb[32].mxu0 %v1231_v25  ;;  %1174 = vmatmul.mubr.bf16.gmra.mrb[32].mxu1 %v1232_v26 }
  0x63   :  { %1125 = vmatprep.mubr.msk.bf16.mxu0 %vm1241_vm0, %v1240_v0  ;;  %1177 = vmatprep.mubr.msk.bf16.mxu1 %vm1241_vm0, %v1240_v0 }
  0x6a   :  { %1126 = vmatmul.mubr.bf16.gmra.mrb[36].mxu0 %v1233_v27  ;;  %1178 = vmatmul.mubr.bf16.gmra.mrb[36].mxu1 %v1234_v28 }
  0x6b   :  { %1129 = vmatprep.mubr.msk.bf16.mxu0 %vm1241_vm0, %v1240_v0  ;;  %1181 = vmatprep.mubr.msk.bf16.mxu1 %vm1241_vm0, %v1240_v0 }
  0x72   :  { %1130 = vmatmul.mubr.bf16.gmra.mrb[40].mxu0 %v1235_v29  ;;  %1182 = vmatmul.mubr.bf16.gmra.mrb[40].mxu1 %v1236_v30 }
  0x73   :  { %1133 = vmatprep.mubr.msk.bf16.mxu0 %vm1241_vm0, %v1240_v0  ;;  %1185 = vmatprep.mubr.msk.bf16.mxu1 %vm1241_vm0, %v1240_v0 }
  0x7a   :  { %1134 = vmatmul.mubr.bf16.gmra.mrb[44].mxu0 %v1237_v31  ;;  %1186 = vmatmul.mubr.bf16.gmra.mrb[44].mxu1 %v1238_v32 }
  0x7b   :  { %1137 = vmatprep.mubr.msk.bf16.mxu0 %vm1241_vm0, %v1240_v0 }
  0x82   :  { %1138 = vmatmul.mubr.bf16.gmra.mrb[48].mxu0 %v1239_v33 }
  0xf5   :  { %v317_v35 = vpop.f32.mrb[0].mxu0  ;;  %v421_v36 = vpop.f32.mrb[0].mxu1 }
  0xf6   :  { %v1091_v37 = vpop.f32.mrb[1].mxu0  ;;  %v422_v38 = vadd.f32 %v1430_v34, %v421_v36  ;;  %v1143_v39 = vpop.f32.mrb[1].mxu1  ;;  %v318_v42 = vadd.f32 %v1430_v34, %v317_v35 }
  0xf7   :  { %v320_v40 = vpop.f32.mrb[2].mxu0  ;;  %v424_v41 = vpop.f32.mrb[2].mxu1 }
  0xf8   :  { %v321_v43 = vadd.f32 %v1430_v34, %v320_v40  ;;  %v1092_v44 = vpop.f32.mrb[3].mxu0  ;;  %v425_v45 = vadd.f32 %v1430_v34, %v424_v41  ;;  %v1144_v46 = vpop.f32.mrb[3].mxu1 }
  0xfa   :  { %v900_v47 = vpack.c.bf16 %v321_v43, %v318_v42  ;;  %v965_v48 = vpack.c.bf16 %v425_v45, %v422_v38 }
  0xfc   :  { %901 = vst [vmem:[%s1559_s3] sm:$0xff] %v900_v47   ;;  %1029 = vst [vmem:[%s1559_s3 + $0x68] sm:$0xff] %v965_v48  }
  0xfd   :  { %v325_v49 = vpop.f32.mrb[4].mxu0  ;;  %v429_v50 = vpop.f32.mrb[4].mxu1 }
  0xfe   :  { %v1095_v51 = vpop.f32.mrb[5].mxu0  ;;  %v430_v52 = vadd.f32 %v1430_v34, %v429_v50  ;;  %v1147_v53 = vpop.f32.mrb[5].mxu1  ;;  %v326_v56 = vadd.f32 %v1430_v34, %v325_v49 }
  0xff   :  { %v328_v54 = vpop.f32.mrb[6].mxu0  ;;  %v432_v55 = vpop.f32.mrb[6].mxu1 }
 0x100   :  { %v329_v57 = vadd.f32 %v1430_v34, %v328_v54  ;;  %v1096_v58 = vpop.f32.mrb[7].mxu0  ;;  %v433_v59 = vadd.f32 %v1430_v34, %v432_v55  ;;  %v1148_v60 = vpop.f32.mrb[7].mxu1 }
 0x102   :  { %v905_v61 = vpack.c.bf16 %v329_v57, %v326_v56  ;;  %v970_v62 = vpack.c.bf16 %v433_v59, %v430_v52 }
 0x104   :  { %1017 = vst [vmem:[%s1559_s3 + $0x8] sm:$0xff] %v905_v61   ;;  %1030 = vst [vmem:[%s1559_s3 + $0x70] sm:$0xff] %v970_v62  }
 0x105   :  { %v333_v63 = vpop.f32.mrb[8].mxu0  ;;  %v437_v0 = vpop.f32.mrb[8].mxu1 }
 0x106   :  { %v1099_v1 = vpop.f32.mrb[9].mxu0  ;;  %v438_v2 = vadd.f32 %v1430_v34, %v437_v0  ;;  %v1151_v3 = vpop.f32.mrb[9].mxu1  ;;  %v334_v6 = vadd.f32 %v1430_v34, %v333_v63 }
 0x107   :  { %v336_v4 = vpop.f32.mrb[10].mxu0  ;;  %v440_v5 = vpop.f32.mrb[10].mxu1 }
 0x108   :  { %v337_v7 = vadd.f32 %v1430_v34, %v336_v4  ;;  %v1100_v8 = vpop.f32.mrb[11].mxu0  ;;  %v441_v9 = vadd.f32 %v1430_v34, %v440_v5  ;;  %v1152_v10 = vpop.f32.mrb[11].mxu1 }
 0x10a   :  { %v910_v11 = vpack.c.bf16 %v337_v7, %v334_v6  ;;  %v975_v12 = vpack.c.bf16 %v441_v9, %v438_v2 }
 0x10c   :  { %1018 = vst [vmem:[%s1559_s3 + $0x10] sm:$0xff] %v910_v11   ;;  %1031 = vst [vmem:[%s1559_s3 + $0x78] sm:$0xff] %v975_v12  }
 0x10d   :  { %v341_v13 = vpop.f32.mrb[12].mxu0  ;;  %v445_v14 = vpop.f32.mrb[12].mxu1 }
 0x10e   :  { %v1103_v15 = vpop.f32.mrb[13].mxu0  ;;  %v446_v16 = vadd.f32 %v1430_v34, %v445_v14  ;;  %v1155_v17 = vpop.f32.mrb[13].mxu1  ;;  %v342_v20 = vadd.f32 %v1430_v34, %v341_v13 }
 0x10f   :  { %v344_v18 = vpop.f32.mrb[14].mxu0  ;;  %v448_v19 = vpop.f32.mrb[14].mxu1 }
 0x110   :  { %v345_v21 = vadd.f32 %v1430_v34, %v344_v18  ;;  %v1104_v22 = vpop.f32.mrb[15].mxu0  ;;  %v449_v23 = vadd.f32 %v1430_v34, %v448_v19  ;;  %v1156_v24 = vpop.f32.mrb[15].mxu1 }
 0x112   :  { %v915_v25 = vpack.c.bf16 %v345_v21, %v342_v20  ;;  %v980_v26 = vpack.c.bf16 %v449_v23, %v446_v16 }
 0x114   :  { %1019 = vst [vmem:[%s1559_s3 + $0x18] sm:$0xff] %v915_v25   ;;  %1032 = vst [vmem:[%s1559_s3 + $0x80] sm:$0xff] %v980_v26  }
 0x115   :  { %v349_v27 = vpop.f32.mrb[16].mxu0  ;;  %v453_v28 = vpop.f32.mrb[16].mxu1 }
 0x116   :  { %v1107_v29 = vpop.f32.mrb[17].mxu0  ;;  %v454_v30 = vadd.f32 %v1430_v34, %v453_v28  ;;  %v1159_v31 = vpop.f32.mrb[17].mxu1  ;;  %v350_v35 = vadd.f32 %v1430_v34, %v349_v27 }
 0x117   :  { %v352_v32 = vpop.f32.mrb[18].mxu0  ;;  %v456_v33 = vpop.f32.mrb[18].mxu1 }
 0x118   :  { %v353_v36 = vadd.f32 %v1430_v34, %v352_v32  ;;  %v1108_v37 = vpop.f32.mrb[19].mxu0  ;;  %v457_v38 = vadd.f32 %v1430_v34, %v456_v33  ;;  %v1160_v39 = vpop.f32.mrb[19].mxu1 }
 0x11a   :  { %v920_v40 = vpack.c.bf16 %v353_v36, %v350_v35  ;;  %v985_v41 = vpack.c.bf16 %v457_v38, %v454_v30 }
 0x11c   :  { %1020 = vst [vmem:[%s1559_s3 + $0x20] sm:$0xff] %v920_v40   ;;  %1033 = vst [vmem:[%s1559_s3 + $0x88] sm:$0xff] %v985_v41  }
 0x11d   :  { %v357_v42 = vpop.f32.mrb[20].mxu0  ;;  %v461_v43 = vpop.f32.mrb[20].mxu1 }
 0x11e   :  { %v1111_v44 = vpop.f32.mrb[21].mxu0  ;;  %v462_v45 = vadd.f32 %v1430_v34, %v461_v43  ;;  %v1163_v46 = vpop.f32.mrb[21].mxu1  ;;  %v358_v49 = vadd.f32 %v1430_v34, %v357_v42 }
 0x11f   :  { %v360_v47 = vpop.f32.mrb[22].mxu0  ;;  %v464_v48 = vpop.f32.mrb[22].mxu1 }
 0x120   :  { %v361_v50 = vadd.f32 %v1430_v34, %v360_v47  ;;  %v1112_v51 = vpop.f32.mrb[23].mxu0  ;;  %v465_v52 = vadd.f32 %v1430_v34, %v464_v48  ;;  %v1164_v53 = vpop.f32.mrb[23].mxu1 }
 0x122   :  { %v925_v54 = vpack.c.bf16 %v361_v50, %v358_v49  ;;  %v990_v55 = vpack.c.bf16 %v465_v52, %v462_v45 }
 0x124   :  { %1021 = vst [vmem:[%s1559_s3 + $0x28] sm:$0xff] %v925_v54   ;;  %1034 = vst [vmem:[%s1559_s3 + $0x90] sm:$0xff] %v990_v55  }
 0x125   :  { %v365_v56 = vpop.f32.mrb[24].mxu0  ;;  %v469_v57 = vpop.f32.mrb[24].mxu1 }
 0x126   :  { %v1115_v58 = vpop.f32.mrb[25].mxu0  ;;  %v470_v59 = vadd.f32 %v1430_v34, %v469_v57  ;;  %v1167_v60 = vpop.f32.mrb[25].mxu1  ;;  %v366_v63 = vadd.f32 %v1430_v34, %v365_v56 }
 0x127   :  { %v368_v61 = vpop.f32.mrb[26].mxu0  ;;  %v472_v62 = vpop.f32.mrb[26].mxu1 }
 0x128   :  { %v369_v0 = vadd.f32 %v1430_v34, %v368_v61  ;;  %v1116_v1 = vpop.f32.mrb[27].mxu0  ;;  %v473_v2 = vadd.f32 %v1430_v34, %v472_v62  ;;  %v1168_v3 = vpop.f32.mrb[27].mxu1 }
 0x12a   :  { %v930_v4 = vpack.c.bf16 %v369_v0, %v366_v63  ;;  %v995_v5 = vpack.c.bf16 %v473_v2, %v470_v59 }
 0x12c   :  { %1022 = vst [vmem:[%s1559_s3 + $0x30] sm:$0xff] %v930_v4   ;;  %1035 = vst [vmem:[%s1559_s3 + $0x98] sm:$0xff] %v995_v5  }
 0x12d   :  { %v373_v6 = vpop.f32.mrb[28].mxu0  ;;  %v477_v7 = vpop.f32.mrb[28].mxu1 }
 0x12e   :  { %v1119_v8 = vpop.f32.mrb[29].mxu0  ;;  %v478_v9 = vadd.f32 %v1430_v34, %v477_v7  ;;  %v1171_v10 = vpop.f32.mrb[29].mxu1  ;;  %v374_v13 = vadd.f32 %v1430_v34, %v373_v6 }
 0x12f   :  { %v376_v11 = vpop.f32.mrb[30].mxu0  ;;  %v480_v12 = vpop.f32.mrb[30].mxu1 }
 0x130   :  { %v377_v14 = vadd.f32 %v1430_v34, %v376_v11  ;;  %v1120_v15 = vpop.f32.mrb[31].mxu0  ;;  %v481_v16 = vadd.f32 %v1430_v34, %v480_v12  ;;  %v1172_v17 = vpop.f32.mrb[31].mxu1 }
 0x132   :  { %v935_v18 = vpack.c.bf16 %v377_v14, %v374_v13  ;;  %v1000_v19 = vpack.c.bf16 %v481_v16, %v478_v9 }
 0x134   :  { %1023 = vst [vmem:[%s1559_s3 + $0x38] sm:$0xff] %v935_v18   ;;  %1036 = vst [vmem:[%s1559_s3 + $0xa0] sm:$0xff] %v1000_v19  }
 0x135   :  { %v381_v20 = vpop.f32.mrb[32].mxu0  ;;  %v485_v21 = vpop.f32.mrb[32].mxu1 }
 0x136   :  { %v1123_v22 = vpop.f32.mrb[33].mxu0  ;;  %v486_v23 = vadd.f32 %v1430_v34, %v485_v21  ;;  %v1175_v24 = vpop.f32.mrb[33].mxu1  ;;  %v382_v27 = vadd.f32 %v1430_v34, %v381_v20 }
 0x137   :  { %v384_v25 = vpop.f32.mrb[34].mxu0  ;;  %v488_v26 = vpop.f32.mrb[34].mxu1 }
 0x138   :  { %v385_v28 = vadd.f32 %v1430_v34, %v384_v25  ;;  %v1124_v29 = vpop.f32.mrb[35].mxu0  ;;  %v489_v30 = vadd.f32 %v1430_v34, %v488_v26  ;;  %v1176_v31 = vpop.f32.mrb[35].mxu1 }
 0x13a   :  { %v940_v32 = vpack.c.bf16 %v385_v28, %v382_v27  ;;  %v1005_v33 = vpack.c.bf16 %v489_v30, %v486_v23 }
 0x13c   :  { %1024 = vst [vmem:[%s1559_s3 + $0x40] sm:$0xff] %v940_v32   ;;  %1037 = vst [vmem:[%s1559_s3 + $0xa8] sm:$0xff] %v1005_v33  }
 0x13d   :  { %v389_v35 = vpop.f32.mrb[36].mxu0  ;;  %v493_v36 = vpop.f32.mrb[36].mxu1 }
 0x13e   :  { %v1127_v37 = vpop.f32.mrb[37].mxu0  ;;  %v494_v38 = vadd.f32 %v1430_v34, %v493_v36  ;;  %v1179_v39 = vpop.f32.mrb[37].mxu1  ;;  %v390_v42 = vadd.f32 %v1430_v34, %v389_v35 }
 0x13f   :  { %v392_v40 = vpop.f32.mrb[38].mxu0  ;;  %v496_v41 = vpop.f32.mrb[38].mxu1 }
 0x140   :  { %v393_v43 = vadd.f32 %v1430_v34, %v392_v40  ;;  %v1128_v44 = vpop.f32.mrb[39].mxu0  ;;  %v497_v45 = vadd.f32 %v1430_v34, %v496_v41  ;;  %v1180_v46 = vpop.f32.mrb[39].mxu1 }
 0x142   :  { %v945_v47 = vpack.c.bf16 %v393_v43, %v390_v42  ;;  %v1010_v48 = vpack.c.bf16 %v497_v45, %v494_v38 }
 0x144   :  { %1025 = vst [vmem:[%s1559_s3 + $0x48] sm:$0xff] %v945_v47   ;;  %1038 = vst [vmem:[%s1559_s3 + $0xb0] sm:$0xff] %v1010_v48  }
 0x145   :  { %v397_v49 = vpop.f32.mrb[40].mxu0  ;;  %v501_v50 = vpop.f32.mrb[40].mxu1 }
 0x146   :  { %v1131_v51 = vpop.f32.mrb[41].mxu0  ;;  %v502_v52 = vadd.f32 %v1430_v34, %v501_v50  ;;  %v1183_v53 = vpop.f32.mrb[41].mxu1  ;;  %v398_v56 = vadd.f32 %v1430_v34, %v397_v49 }
 0x147   :  { %v400_v54 = vpop.f32.mrb[42].mxu0  ;;  %v504_v55 = vpop.f32.mrb[42].mxu1 }
 0x148   :  { %v401_v57 = vadd.f32 %v1430_v34, %v400_v54  ;;  %v1132_v58 = vpop.f32.mrb[43].mxu0  ;;  %v505_v59 = vadd.f32 %v1430_v34, %v504_v55  ;;  %v1184_v60 = vpop.f32.mrb[43].mxu1 }
 0x14a   :  { %v950_v61 = vpack.c.bf16 %v401_v57, %v398_v56  ;;  %v1015_v62 = vpack.c.bf16 %v505_v59, %v502_v52 }
 0x14c   :  { %1026 = vst [vmem:[%s1559_s3 + $0x50] sm:$0xff] %v950_v61   ;;  %1039 = vst [vmem:[%s1559_s3 + $0xb8] sm:$0xff] %v1015_v62  }
 0x14d   :  { %v405_v63 = vpop.f32.mrb[44].mxu0  ;;  %v509_v0 = vpop.f32.mrb[44].mxu1 }
 0x14e   :  { %v1135_v1 = vpop.f32.mrb[45].mxu0  ;;  %v510_v2 = vadd.f32 %v1430_v34, %v509_v0  ;;  %v1187_v3 = vpop.f32.mrb[45].mxu1  ;;  %v406_v6 = vadd.f32 %v1430_v34, %v405_v63 }
 0x14f   :  { %v408_v4 = vpop.f32.mrb[46].mxu0  ;;  %v512_v5 = vpop.f32.mrb[46].mxu1 }
 0x150   :  { %v409_v7 = vadd.f32 %v1430_v34, %v408_v4  ;;  %v1136_v8 = vpop.f32.mrb[47].mxu0  ;;  %v896_v9 = vpack.c.bf16 %v510_v2, %v510_v2  ;;  %v1188_v10 = vpop.f32.mrb[47].mxu1 }
 0x152   :  { %v955_v11 = vpack.c.bf16 %v409_v7, %v406_v6  ;;  %760 = vst [vmem:[%s1559_s3 + $0xc0] sm:$0xf] %v896_v9 }
 0x154   :  { %1027 = vst [vmem:[%s1559_s3 + $0x58] sm:$0xff] %v955_v11  }
 0x155   :  { %v413_v12 = vpop.f32.mrb[48].mxu0 }
 0x156   :  { %v1139_v13 = vpop.f32.mrb[49].mxu0  ;;  %v414_v15 = vadd.f32 %v1430_v34, %v413_v12 }
 0x157   :  { %v416_v14 = vpop.f32.mrb[50].mxu0 }
 0x158   :  { %v417_v16 = vadd.f32 %v1430_v34, %v416_v14  ;;  %v1140_v17 = vpop.f32.mrb[51].mxu0 }
 0x15a   :  { %v960_v18 = vpack.c.bf16 %v417_v16, %v414_v15 }
 0x15c   :  { %1028 = vst [vmem:[%s1559_s3 + $0x60] sm:$0xff] %v960_v18  }

// kernel: _lambda_.20
= control target key start
LH: loop header
LB: loop body
LE: loop exit
PB: predicated region body
PF: predicated region fallthrough
CT: control target
= control target key end

     0   :  { %v1534_v0 = vmov 0.0   ;;  %vm1535_vm0 = vmmov 0   ;;  %v1536_v16 = vmov 0   ;;  %s2128_s1 = inlined_call_operand.vmem [shape: bf16[128,128], index: 1, kind: input, shape index: {}]   ;;  %s2129_s0 = inlined_call_operand.vmem [shape: bf16[392,128], index: 0, kind: input, shape index: {}]   ;;  %s2130_s3 = inlined_call_operand.vmem [shape: bf16[392,128], index: 3, kind: input, shape index: {}]   ;;  %s2131_s2 = inlined_call_operand.vmem [shape: f32[1,128], index: 2, kind: input, shape index: {}]   ;;  %s2132_s4 = inlined_call_operand.vmem [shape: bf16[392,128], index: 4, kind: output, shape index: {}]  }
   0x1   :  { %1391 = vmatprep.subr.bf16.mxu0 %v1534_v0  ;;  %v1526_v1 = vld [vmem:[%s2128_s1] sm:$0xff]   ;;  %1507 = vmatprep.subr.bf16.mxu1 %v1534_v0  ;;  %v1527_v2 = vld [vmem:[%s2128_s1 + $0x8] sm:$0xff]   ;;  %v1528_v3 = vld [vmem:[%s2128_s1 + $0x10] sm:$0xff]  }
   0x2   :  { %1407 = vmatprep.mubr.msk.bf16.mxu0 %vm1535_vm0, %v1534_v0  ;;  %1459 = vmatprep.mubr.msk.bf16.mxu1 %vm1535_vm0, %v1534_v0  ;;  %v1529_v4 = vld [vmem:[%s2128_s1 + $0x18] sm:$0xff]   ;;  %v1530_v5 = vld [vmem:[%s2128_s1 + $0x20] sm:$0xff]   ;;  %v1531_v6 = vld [vmem:[%s2128_s1 + $0x28] sm:$0xff]  }
   0x3   :  { %1392 = vmatpush3.bf16.msra.mxu0 %v1526_v1  ;;  %1515 = vmatpush3.bf16.msra.mxu1 %v1526_v1  ;;  %v18_v7 = vld [vmem:[%s2129_s0] sm:$0xf]  ;;  %v19_v8 = vld [vmem:[%s2129_s0 + $0x4] sm:$0xf]  ;;  %v44_v9 = vld [vmem:[%s2129_s0 + $0x68] sm:$0xf] }
   0x4   :  { %1393 = vmatprep.subr.bf16.mxu0 %v1534_v0  ;;  %1508 = vmatprep.subr.bf16.mxu1 %v1534_v0  ;;  %v34_v10 = vld [vmem:[%s2129_s0 + $0x40] sm:$0xf]  ;;  %v35_v11 = vld [vmem:[%s2129_s0 + $0x44] sm:$0xf]  ;;  %v1532_v12 = vld [vmem:[%s2128_s1 + $0x30] sm:$0xff]   ;;  %v67_v17 = vmax.bf16 %v1536_v16, %v18_v7  ;;  %v68_v21 = vmax.bf16 %v1536_v16, %v19_v8  ;;  %v93_v27 = vmax.bf16 %v1536_v16, %v44_v9 }
   0x5   :  { %v45_v13 = vld [vmem:[%s2129_s0 + $0x6c] sm:$0xf]  ;;  %v60_v14 = vld [vmem:[%s2129_s0 + $0xa8] sm:$0xf]  ;;  %v62_v20 = vld [vmem:[%s2129_s0 + $0xb0] sm:$0xf]  ;;  %v1635_v22 = vmax.bf16 %v1536_v16, %v34_v10  ;;  %v1638_v23 = vmax.bf16 %v1536_v16, %v35_v11 }
   0x6   :  { %v61_v15 = vld [vmem:[%s2129_s0 + $0xac] sm:$0xf]  ;;  %v36_v18 = vld [vmem:[%s2129_s0 + $0x48] sm:$0xf]  ;;  %v63_v24 = vld [vmem:[%s2129_s0 + $0xb4] sm:$0xf]  ;;  %v94_v28 = vmax.bf16 %v1536_v16, %v45_v13  ;;  %v1654_v29 = vmax.bf16 %v1536_v16, %v60_v14  ;;  %v1677_v37 = vmax.bf16 %v1536_v16, %v62_v20  ;;  %v965_v56 = vcombine.low %v67_v17, %v68_v21 }
   0x7   :  { %1394 = vmatpush3.bf16.msra.mxu0 %v1527_v2  ;;  %1516 = vmatpush3.bf16.msra.mxu1 %v1527_v2  ;;  %v37_v19 = vld [vmem:[%s2129_s0 + $0x4c] sm:$0xf]  ;;  %v38_v25 = vld [vmem:[%s2129_s0 + $0x50] sm:$0xf]  ;;  %v39_v26 = vld [vmem:[%s2129_s0 + $0x54] sm:$0xf]  ;;  %v973_v31 = vcombine.low %v1635_v22, %v1638_v23  ;;  %v1662_v32 = vmax.bf16 %v1536_v16, %v61_v15  ;;  %v1665_v33 = vmax.bf16 %v1536_v16, %v36_v18 }
   0x8   :  { %1395 = vmatprep.subr.bf16.mxu0 %v1534_v0  ;;  %1509 = vmatprep.subr.bf16.mxu1 %v1534_v0  ;;  %v64_v30 = vld [vmem:[%s2129_s0 + $0xb8] sm:$0xf]  ;;  %v1668_v34 = vmax.bf16 %v1536_v16, %v37_v19  ;;  %v65_v35 = vld [vmem:[%s2129_s0 + $0xbc] sm:$0xf]  ;;  %v1680_v38 = vmax.bf16 %v1536_v16, %v63_v24  ;;  %v1683_v39 = vmax.bf16 %v1536_v16, %v38_v25  ;;  %v66_v42 = vld [vmem:[%s2129_s0 + $0xc0] sm:$0xf] }
   0x9   :  { %v40_v36 = vld [vmem:[%s2129_s0 + $0x58] sm:$0xf]  ;;  %v1686_v40 = vmax.bf16 %v1536_v16, %v39_v26  ;;  %v41_v41 = vld [vmem:[%s2129_s0 + $0x5c] sm:$0xf]  ;;  %v42_v43 = vld [vmem:[%s2129_s0 + $0x60] sm:$0xf]  ;;  %v986_v45 = vcombine.low %v1654_v29, %v1662_v32  ;;  %v1705_v47 = vmax.bf16 %v1536_v16, %v64_v30  ;;  %v1717_v51 = vmax.bf16 %v1536_v16, %v65_v35 }
   0xa   :  { %v1533_v44 = vld [vmem:[%s2128_s1 + $0x38] sm:$0xff]   ;;  %v974_v46 = vcombine.low %v1665_v33, %v1668_v34  ;;  %v43_v48 = vld [vmem:[%s2129_s0 + $0x64] sm:$0xf]  ;;  %v987_v49 = vcombine.low %v1677_v37, %v1680_v38  ;;  %v1720_v52 = vmax.bf16 %v1536_v16, %v40_v36  ;;  %v1723_v53 = vmax.bf16 %v1536_v16, %v41_v41  ;;  %v20_v58 = vld [vmem:[%s2129_s0 + $0x8] sm:$0xf] }
   0xb   :  { %1396 = vmatpush3.bf16.msra.mxu0 %v1528_v3  ;;  %1517 = vmatpush3.bf16.msra.mxu1 %v1528_v3  ;;  %v975_v50 = vcombine.low %v1683_v39, %v1686_v40  ;;  %v1726_v54 = vmax.bf16 %v1536_v16, %v66_v42  ;;  %v1729_v55 = vmax.bf16 %v1536_v16, %v42_v43  ;;  %v21_v61 = vld [vmem:[%s2129_s0 + $0xc] sm:$0xf]  ;;  %v46_v62 = vld [vmem:[%s2129_s0 + $0x70] sm:$0xf]  ;;  %v47_v63 = vld [vmem:[%s2129_s0 + $0x74] sm:$0xf] }
   0xc   :  { %1397 = vmatprep.subr.bf16.mxu0 %v1534_v0  ;;  %1510 = vmatprep.subr.bf16.mxu1 %v1534_v0  ;;  %v978_v57 = vcombine.low %v93_v27, %v94_v28  ;;  %v988_v59 = vcombine.low %v1705_v47, %v1717_v51  ;;  %v1737_v60 = vmax.bf16 %v1536_v16, %v43_v48  ;;  %v22_v9 = vld [vmem:[%s2129_s0 + $0x10] sm:$0xf]  ;;  %v23_v10 = vld [vmem:[%s2129_s0 + $0x14] sm:$0xf]  ;;  %v48_v11 = vld [vmem:[%s2129_s0 + $0x78] sm:$0xf] }
   0xd   :  { %v976_v1 = vcombine.low %v1720_v52, %v1723_v53  ;;  %v69_v3 = vmax.bf16 %v1536_v16, %v20_v58  ;;  %v71_v13 = vmax.bf16 %v1536_v16, %v22_v9  ;;  %v72_v14 = vmax.bf16 %v1536_v16, %v23_v10  ;;  %v24_v20 = vld [vmem:[%s2129_s0 + $0x18] sm:$0xf]  ;;  %v25_v21 = vld [vmem:[%s2129_s0 + $0x1c] sm:$0xf]  ;;  %v50_v24 = vld [vmem:[%s2129_s0 + $0x80] sm:$0xf] }
   0xe   :  { %v977_v2 = vcombine.low %v1729_v55, %v1737_v60  ;;  %v97_v15 = vmax.bf16 %v1536_v16, %v48_v11  ;;  %v51_v25 = vld [vmem:[%s2129_s0 + $0x84] sm:$0xf]  ;;  %v73_v26 = vmax.bf16 %v1536_v16, %v24_v20  ;;  %v74_v27 = vmax.bf16 %v1536_v16, %v25_v21  ;;  %v26_v41 = vld [vmem:[%s2129_s0 + $0x20] sm:$0xf]  ;;  %v52_v43 = vld [vmem:[%s2129_s0 + $0x88] sm:$0xf] }
   0xf   :  { %1398 = vmatpush3.bf16.msra.mxu0 %v1529_v4  ;;  %1518 = vmatpush3.bf16.msra.mxu1 %v1529_v4  ;;  %v70_v4 = vmax.bf16 %v1536_v16, %v21_v61  ;;  %v967_v18 = vcombine.low %v71_v13, %v72_v14  ;;  %v99_v28 = vmax.bf16 %v1536_v16, %v50_v24  ;;  %v27_v42 = vld [vmem:[%s2129_s0 + $0x24] sm:$0xf]  ;;  %v31_v13 = vld [vmem:[%s2129_s0 + $0x34] sm:$0xf]  ;;  %v56_v14 = vld [vmem:[%s2129_s0 + $0x98] sm:$0xf] }
  0x10   :  { %1399 = vmatprep.subr.bf16.mxu0 %v1534_v0  ;;  %1511 = vmatprep.subr.bf16.mxu1 %v1534_v0  ;;  %v100_v30 = vmax.bf16 %v1536_v16, %v51_v25  ;;  %v968_v35 = vcombine.low %v73_v26, %v74_v27  ;;  %v75_v48 = vmax.bf16 %v1536_v16, %v26_v41  ;;  %v32_v25 = vld [vmem:[%s2129_s0 + $0x38] sm:$0xf]  ;;  %v33_v26 = vld [vmem:[%s2129_s0 + $0x3c] sm:$0xf]  ;;  %v58_v27 = vld [vmem:[%s2129_s0 + $0xa0] sm:$0xf] }
  0x11   :  { %v966_v7 = vcombine.low %v69_v3, %v70_v4  ;;  %v29_v3 = vld [vmem:[%s2129_s0 + $0x2c] sm:$0xf]  ;;  %v54_v4 = vld [vmem:[%s2129_s0 + $0x90] sm:$0xf]  ;;  %v1097_v23 = vld [vmem:[%s2130_s3] sm:$0xff]  }
  0x12   :  { %v981_v36 = vcombine.low %v99_v28, %v100_v30  ;;  %v59_v28 = vld [vmem:[%s2129_s0 + $0xa4] sm:$0xf]  ;;  %v81_v30 = vmax.bf16 %v1536_v16, %v32_v25  ;;  %v1324_v22 = vld [vmem:[%s2130_s3 + $0x68] sm:$0xff]   ;;  %v1933_v29 = vld [vmem:[%s2131_s2] ss:$0 sm:$0xff]  ;;  %v1099_v38 = vunpack.c.h.bf16 %v1097_v23 }
  0x13   :  { %1400 = vmatpush3.bf16.msra.mxu0 %v1530_v5  ;;  %1519 = vmatpush3.bf16.msra.mxu1 %v1530_v5  ;;  %v95_v5 = vmax.bf16 %v1536_v16, %v46_v62  ;;  %v108_v41 = vmax.bf16 %v1536_v16, %v59_v28  ;;  %v1312_v60 = vld [vmem:[%s2130_s3 + $0x8] sm:$0xff]  }
  0x14   :  { %1401 = vmatprep.subr.bf16.mxu0 %v1534_v0  ;;  %1512 = vmatprep.subr.bf16.mxu1 %v1534_v0 }
  0x17   :  { %1402 = vmatpush3.bf16.msra.mxu0 %v1531_v6  ;;  %1520 = vmatpush3.bf16.msra.mxu1 %v1531_v6  ;;  %v96_v6 = vmax.bf16 %v1536_v16, %v47_v63  ;;  %v28_v63 = vld [vmem:[%s2129_s0 + $0x28] sm:$0xf] }
  0x18   :  { %1403 = vmatprep.subr.bf16.mxu0 %v1534_v0  ;;  %1513 = vmatprep.subr.bf16.mxu1 %v1534_v0 }
  0x19   :  { %v979_v8 = vcombine.low %v95_v5, %v96_v6  ;;  %v55_v5 = vld [vmem:[%s2129_s0 + $0x94] sm:$0xf]  ;;  %v77_v6 = vmax.bf16 %v1536_v16, %v28_v63  ;;  %v1103_v63 = vunpack.c.h.bf16 %v1312_v60 }
  0x1a   :  { %v104_v9 = vmax.bf16 %v1536_v16, %v55_v5 }
  0x1b   :  { %1404 = vmatpush3.bf16.msra.mxu0 %v1532_v12  ;;  %1521 = vmatpush3.bf16.msra.mxu1 %v1532_v12  ;;  %v49_v12 = vld [vmem:[%s2129_s0 + $0x7c] sm:$0xf] }
  0x1c   :  { %1405 = vmatprep.subr.bf16.mxu0 %v1534_v0  ;;  %1514 = vmatprep.subr.bf16.mxu1 %v1534_v0  ;;  %v98_v17 = vmax.bf16 %v1536_v16, %v49_v12  ;;  %v30_v12 = vld [vmem:[%s2129_s0 + $0x30] sm:$0xf] }
  0x1e   :  { %v980_v19 = vcombine.low %v97_v15, %v98_v17  ;;  %v57_v15 = vld [vmem:[%s2129_s0 + $0x9c] sm:$0xf]  ;;  %v79_v17 = vmax.bf16 %v1536_v16, %v30_v12 }
  0x1f   :  { %1406 = vmatpush3.bf16.msra.mxu0 %v1533_v44  ;;  %1522 = vmatpush3.bf16.msra.mxu1 %v1533_v44  ;;  %v53_v44 = vld [vmem:[%s2129_s0 + $0x8c] sm:$0xf]  ;;  %v106_v20 = vmax.bf16 %v1536_v16, %v57_v15 }
  0x20   :  { %v102_v58 = vmax.bf16 %v1536_v16, %v53_v44 }
  0x22   :  { %1408 = vmatmul.mubr.bf16.vlgmr.msra.gmra.mrb[0].mxu0 %v965_v56  ;;  %1460 = vmatmul.mubr.bf16.vlgmr.msra.gmra.mrb[0].mxu1 %v978_v57  ;;  %v76_v56 = vmax.bf16 %v1536_v16, %v27_v42  ;;  %v101_v57 = vmax.bf16 %v1536_v16, %v52_v43 }
  0x23   :  { %1411 = vmatprep.mubr.msk.bf16.mxu0 %vm1535_vm0, %v1534_v0  ;;  %1463 = vmatprep.mubr.msk.bf16.mxu1 %vm1535_vm0, %v1534_v0 }
  0x24   :  { %v969_v61 = vcombine.low %v75_v48, %v76_v56  ;;  %v982_v62 = vcombine.low %v101_v57, %v102_v58  ;;  %v1102_v57 = vunpack.c.l.bf16 %v1312_v60 }
  0x2a   :  { %1412 = vmatmul.mubr.bf16.gmra.mrb[4].mxu0 %v966_v7  ;;  %1464 = vmatmul.mubr.bf16.gmra.mrb[4].mxu1 %v979_v8  ;;  %v78_v7 = vmax.bf16 %v1536_v16, %v29_v3  ;;  %v103_v8 = vmax.bf16 %v1536_v16, %v54_v4 }
  0x2b   :  { %1415 = vmatprep.mubr.msk.bf16.mxu0 %vm1535_vm0, %v1534_v0  ;;  %1467 = vmatprep.mubr.msk.bf16.mxu1 %vm1535_vm0, %v1534_v0 }
  0x2c   :  { %v970_v10 = vcombine.low %v77_v6, %v78_v7  ;;  %v983_v11 = vcombine.low %v103_v8, %v104_v9 }
  0x32   :  { %1416 = vmatmul.mubr.bf16.gmra.mrb[8].mxu0 %v967_v18  ;;  %1468 = vmatmul.mubr.bf16.gmra.mrb[8].mxu1 %v980_v19  ;;  %v80_v18 = vmax.bf16 %v1536_v16, %v31_v13  ;;  %v105_v19 = vmax.bf16 %v1536_v16, %v56_v14  ;;  %v1326_v13 = vld [vmem:[%s2130_s3 + $0x78] sm:$0xff]  }
  0x33   :  { %1419 = vmatprep.mubr.msk.bf16.mxu0 %vm1535_vm0, %v1534_v0  ;;  %1471 = vmatprep.mubr.msk.bf16.mxu1 %vm1535_vm0, %v1534_v0 }
  0x34   :  { %v971_v21 = vcombine.low %v79_v17, %v80_v18  ;;  %v984_v24 = vcombine.low %v105_v19, %v106_v20  ;;  %v1313_v17 = vld [vmem:[%s2130_s3 + $0x10] sm:$0xff]  }
  0x35   :  { %v1106_v25 = vunpack.c.l.bf16 %v1313_v17 }
  0x3a   :  { %1420 = vmatmul.mubr.bf16.gmra.mrb[12].mxu0 %v968_v35  ;;  %1472 = vmatmul.mubr.bf16.gmra.mrb[12].mxu1 %v981_v36  ;;  %v82_v35 = vmax.bf16 %v1536_v16, %v33_v26  ;;  %v107_v36 = vmax.bf16 %v1536_v16, %v58_v27  ;;  %v989_v16 = vcombine.low %v1726_v54, %v1726_v54  ;;  %v1325_v54 = vld [vmem:[%s2130_s3 + $0x70] sm:$0xff]  }
  0x3b   :  { %1423 = vmatprep.mubr.msk.bf16.mxu0 %vm1535_vm0, %v1534_v0  ;;  %1475 = vmatprep.mubr.msk.bf16.mxu1 %vm1535_vm0, %v1534_v0  ;;  %v1154_v48 = vunpack.c.l.bf16 %v1325_v54  ;;  %v1155_v5 = vunpack.c.h.bf16 %v1325_v54 }
  0x3c   :  { %v972_v42 = vcombine.low %v81_v30, %v82_v35  ;;  %v985_v43 = vcombine.low %v107_v36, %v108_v41  ;;  %v1107_v30 = vunpack.c.h.bf16 %v1313_v17  ;;  %v1159_v41 = vunpack.c.h.bf16 %v1326_v13 }
  0x42   :  { %1424 = vmatmul.mubr.bf16.gmra.mrb[16].mxu0 %v969_v61  ;;  %1476 = vmatmul.mubr.bf16.gmra.mrb[16].mxu1 %v982_v62 }
  0x43   :  { %1427 = vmatprep.mubr.msk.bf16.mxu0 %vm1535_vm0, %v1534_v0  ;;  %1479 = vmatprep.mubr.msk.bf16.mxu1 %vm1535_vm0, %v1534_v0 }
  0x4a   :  { %1428 = vmatmul.mubr.bf16.gmra.mrb[20].mxu0 %v970_v10  ;;  %1480 = vmatmul.mubr.bf16.gmra.mrb[20].mxu1 %v983_v11 }
  0x4b   :  { %1431 = vmatprep.mubr.msk.bf16.mxu0 %vm1535_vm0, %v1534_v0  ;;  %1483 = vmatprep.mubr.msk.bf16.mxu1 %vm1535_vm0, %v1534_v0 }
  0x52   :  { %1432 = vmatmul.mubr.bf16.gmra.mrb[24].mxu0 %v971_v21  ;;  %1484 = vmatmul.mubr.bf16.gmra.mrb[24].mxu1 %v984_v24  ;;  %v1158_v21 = vunpack.c.l.bf16 %v1326_v13 }
  0x53   :  { %1435 = vmatprep.mubr.msk.bf16.mxu0 %vm1535_vm0, %v1534_v0  ;;  %1487 = vmatprep.mubr.msk.bf16.mxu1 %vm1535_vm0, %v1534_v0 }
  0x5a   :  { %1436 = vmatmul.mubr.bf16.gmra.mrb[28].mxu0 %v972_v42  ;;  %1488 = vmatmul.mubr.bf16.gmra.mrb[28].mxu1 %v985_v43 }
  0x5b   :  { %1439 = vmatprep.mubr.msk.bf16.mxu0 %vm1535_vm0, %v1534_v0  ;;  %1491 = vmatprep.mubr.msk.bf16.mxu1 %vm1535_vm0, %v1534_v0 }
  0x62   :  { %1440 = vmatmul.mubr.bf16.gmra.mrb[32].mxu0 %v973_v31  ;;  %1492 = vmatmul.mubr.bf16.gmra.mrb[32].mxu1 %v986_v45  ;;  %v1150_v31 = vunpack.c.l.bf16 %v1324_v22  ;;  %v1151_v45 = vunpack.c.h.bf16 %v1324_v22 }
  0x63   :  { %1443 = vmatprep.mubr.msk.bf16.mxu0 %vm1535_vm0, %v1534_v0  ;;  %1495 = vmatprep.mubr.msk.bf16.mxu1 %vm1535_vm0, %v1534_v0 }
  0x6a   :  { %1444 = vmatmul.mubr.bf16.gmra.mrb[36].mxu0 %v974_v46  ;;  %1496 = vmatmul.mubr.bf16.gmra.mrb[36].mxu1 %v987_v49 }
  0x6b   :  { %1447 = vmatprep.mubr.msk.bf16.mxu0 %vm1535_vm0, %v1534_v0  ;;  %1499 = vmatprep.mubr.msk.bf16.mxu1 %vm1535_vm0, %v1534_v0 }
  0x72   :  { %1448 = vmatmul.mubr.bf16.gmra.mrb[40].mxu0 %v975_v50  ;;  %1500 = vmatmul.mubr.bf16.gmra.mrb[40].mxu1 %v988_v59 }
  0x73   :  { %1451 = vmatprep.mubr.msk.bf16.mxu0 %vm1535_vm0, %v1534_v0  ;;  %1503 = vmatprep.mubr.msk.bf16.mxu1 %vm1535_vm0, %v1534_v0 }
  0x7a   :  { %1452 = vmatmul.mubr.bf16.gmra.mrb[44].mxu0 %v976_v1  ;;  %1504 = vmatmul.mubr.bf16.gmra.mrb[44].mxu1 %v989_v16 }
  0x7b   :  { %1455 = vmatprep.mubr.msk.bf16.mxu0 %vm1535_vm0, %v1534_v0  ;;  %v1098_v0 = vunpack.c.l.bf16 %v1097_v23 }
  0x82   :  { %1456 = vmatmul.mubr.bf16.gmra.mrb[48].mxu0 %v977_v2 }
  0xf5   :  { %v369_v32 = vpop.f32.mrb[0].mxu0  ;;  %v473_v33 = vpop.f32.mrb[0].mxu1 }
  0xf6   :  { %v370_v34 = vadd.f32 %v1933_v29, %v369_v32  ;;  %v1409_v37 = vpop.f32.mrb[1].mxu0  ;;  %v474_v39 = vadd.f32 %v1933_v29, %v473_v33  ;;  %v1461_v40 = vpop.f32.mrb[1].mxu1 }
  0xf7   :  { %v372_v46 = vpop.f32.mrb[2].mxu0  ;;  %v476_v47 = vpop.f32.mrb[2].mxu1  ;;  %v1314_v37 = vld [vmem:[%s2130_s3 + $0x18] sm:$0xff]  }
  0xf8   :  { %v373_v49 = vadd.f32 %v1933_v29, %v372_v46  ;;  %v1410_v50 = vpop.f32.mrb[3].mxu0  ;;  %v691_v51 = vadd.f32 %v1150_v31, %v474_v39  ;;  %v477_v52 = vadd.f32 %v1933_v29, %v476_v47  ;;  %v1462_v53 = vpop.f32.mrb[3].mxu1  ;;  %v665_v55 = vadd.f32 %v1098_v0, %v370_v34  ;;  %v1327_v0 = vld [vmem:[%s2130_s3 + $0x80] sm:$0xff]  }
  0xf9   :  { %v1110_v47 = vunpack.c.l.bf16 %v1314_v37 }
  0xfa   :  { %v666_v59 = vadd.f32 %v1099_v38, %v373_v49  ;;  %v692_v1 = vadd.f32 %v1151_v45, %v477_v52  ;;  %v1162_v45 = vunpack.c.l.bf16 %v1327_v0  ;;  %v1111_v52 = vunpack.c.h.bf16 %v1314_v37 }
  0xfc   :  { %v1195_v2 = vpack.c.bf16 %v666_v59, %v665_v55  ;;  %v1260_v44 = vpack.c.bf16 %v692_v1, %v691_v51  ;;  %v1163_v55 = vunpack.c.h.bf16 %v1327_v0 }
  0xfd   :  { %v377_v56 = vpop.f32.mrb[4].mxu0  ;;  %v481_v58 = vpop.f32.mrb[4].mxu1 }
  0xfe   :  { %1196 = vst [vmem:[%s2132_s4] sm:$0xff] %v1195_v2   ;;  %v378_v61 = vadd.f32 %v1933_v29, %v377_v56  ;;  %v1413_v62 = vpop.f32.mrb[5].mxu0  ;;  %1347 = vst [vmem:[%s2132_s4 + $0x68] sm:$0xff] %v1260_v44   ;;  %v482_v3 = vadd.f32 %v1933_v29, %v481_v58  ;;  %v1465_v4 = vpop.f32.mrb[5].mxu1 }
  0xff   :  { %v380_v6 = vpop.f32.mrb[6].mxu0  ;;  %v484_v7 = vpop.f32.mrb[6].mxu1  ;;  %v1315_v62 = vld [vmem:[%s2130_s3 + $0x20] sm:$0xff]  }
 0x100   :  { %v381_v8 = vadd.f32 %v1933_v29, %v380_v6  ;;  %v1414_v9 = vpop.f32.mrb[7].mxu0  ;;  %v693_v10 = vadd.f32 %v1154_v48, %v482_v3  ;;  %v485_v11 = vadd.f32 %v1933_v29, %v484_v7  ;;  %v1466_v12 = vpop.f32.mrb[7].mxu1  ;;  %v667_v14 = vadd.f32 %v1102_v57, %v378_v61  ;;  %v1328_v57 = vld [vmem:[%s2130_s3 + $0x88] sm:$0xff]  }
 0x101   :  { %v1114_v7 = vunpack.c.l.bf16 %v1315_v62 }
 0x102   :  { %v668_v15 = vadd.f32 %v1103_v63, %v381_v8  ;;  %v694_v18 = vadd.f32 %v1155_v5, %v485_v11  ;;  %v1166_v5 = vunpack.c.l.bf16 %v1328_v57  ;;  %v1115_v11 = vunpack.c.h.bf16 %v1315_v62 }
 0x104   :  { %v1200_v19 = vpack.c.bf16 %v668_v15, %v667_v14  ;;  %v1265_v20 = vpack.c.bf16 %v694_v18, %v693_v10  ;;  %v1167_v14 = vunpack.c.h.bf16 %v1328_v57 }
 0x105   :  { %v385_v24 = vpop.f32.mrb[8].mxu0  ;;  %v489_v26 = vpop.f32.mrb[8].mxu1 }
 0x106   :  { %1335 = vst [vmem:[%s2132_s4 + $0x8] sm:$0xff] %v1200_v19   ;;  %v386_v27 = vadd.f32 %v1933_v29, %v385_v24  ;;  %v1417_v28 = vpop.f32.mrb[9].mxu0  ;;  %1348 = vst [vmem:[%s2132_s4 + $0x70] sm:$0xff] %v1265_v20   ;;  %v490_v35 = vadd.f32 %v1933_v29, %v489_v26  ;;  %v1469_v36 = vpop.f32.mrb[9].mxu1 }
 0x107   :  { %v388_v42 = vpop.f32.mrb[10].mxu0  ;;  %v492_v43 = vpop.f32.mrb[10].mxu1  ;;  %v1316_v28 = vld [vmem:[%s2130_s3 + $0x28] sm:$0xff]  }
 0x108   :  { %v389_v16 = vadd.f32 %v1933_v29, %v388_v42  ;;  %v1418_v22 = vpop.f32.mrb[11].mxu0  ;;  %v695_v23 = vadd.f32 %v1158_v21, %v490_v35  ;;  %v493_v31 = vadd.f32 %v1933_v29, %v492_v43  ;;  %v1470_v32 = vpop.f32.mrb[11].mxu1  ;;  %v669_v33 = vadd.f32 %v1106_v25, %v386_v27  ;;  %v1329_v25 = vld [vmem:[%s2130_s3 + $0x90] sm:$0xff]  }
 0x109   :  { %v1118_v43 = vunpack.c.l.bf16 %v1316_v28 }
 0x10a   :  { %v670_v34 = vadd.f32 %v1107_v30, %v389_v16  ;;  %v696_v38 = vadd.f32 %v1159_v41, %v493_v31  ;;  %v1170_v41 = vunpack.c.l.bf16 %v1329_v25  ;;  %v1119_v31 = vunpack.c.h.bf16 %v1316_v28 }
 0x10c   :  { %v1205_v39 = vpack.c.bf16 %v670_v34, %v669_v33  ;;  %v1270_v40 = vpack.c.bf16 %v696_v38, %v695_v23  ;;  %v1171_v33 = vunpack.c.h.bf16 %v1329_v25 }
 0x10d   :  { %v393_v46 = vpop.f32.mrb[12].mxu0  ;;  %v497_v49 = vpop.f32.mrb[12].mxu1 }
 0x10e   :  { %1336 = vst [vmem:[%s2132_s4 + $0x10] sm:$0xff] %v1205_v39   ;;  %v394_v50 = vadd.f32 %v1933_v29, %v393_v46  ;;  %v1421_v51 = vpop.f32.mrb[13].mxu0  ;;  %1349 = vst [vmem:[%s2132_s4 + $0x78] sm:$0xff] %v1270_v40   ;;  %v498_v53 = vadd.f32 %v1933_v29, %v497_v49  ;;  %v1473_v54 = vpop.f32.mrb[13].mxu1 }
 0x10f   :  { %v396_v59 = vpop.f32.mrb[14].mxu0  ;;  %v500_v60 = vpop.f32.mrb[14].mxu1  ;;  %v1317_v51 = vld [vmem:[%s2130_s3 + $0x30] sm:$0xff]  }
 0x110   :  { %v397_v1 = vadd.f32 %v1933_v29, %v396_v59  ;;  %v1422_v2 = vpop.f32.mrb[15].mxu0  ;;  %v697_v44 = vadd.f32 %v1162_v45, %v498_v53  ;;  %v501_v48 = vadd.f32 %v1933_v29, %v500_v60  ;;  %v1474_v56 = vpop.f32.mrb[15].mxu1  ;;  %v671_v58 = vadd.f32 %v1110_v47, %v394_v50  ;;  %v1330_v47 = vld [vmem:[%s2130_s3 + $0x98] sm:$0xff]  }
 0x111   :  { %v1122_v60 = vunpack.c.l.bf16 %v1317_v51 }
 0x112   :  { %v672_v61 = vadd.f32 %v1111_v52, %v397_v1  ;;  %v698_v63 = vadd.f32 %v1163_v55, %v501_v48  ;;  %v1174_v55 = vunpack.c.l.bf16 %v1330_v47  ;;  %v1123_v48 = vunpack.c.h.bf16 %v1317_v51 }
 0x114   :  { %v1210_v3 = vpack.c.bf16 %v672_v61, %v671_v58  ;;  %v1275_v4 = vpack.c.bf16 %v698_v63, %v697_v44  ;;  %v1175_v58 = vunpack.c.h.bf16 %v1330_v47 }
 0x115   :  { %v401_v6 = vpop.f32.mrb[16].mxu0  ;;  %v505_v8 = vpop.f32.mrb[16].mxu1 }
 0x116   :  { %1337 = vst [vmem:[%s2132_s4 + $0x18] sm:$0xff] %v1210_v3   ;;  %v402_v9 = vadd.f32 %v1933_v29, %v401_v6  ;;  %v1425_v10 = vpop.f32.mrb[17].mxu0  ;;  %1350 = vst [vmem:[%s2132_s4 + $0x80] sm:$0xff] %v1275_v4   ;;  %v506_v12 = vadd.f32 %v1933_v29, %v505_v8  ;;  %v1477_v13 = vpop.f32.mrb[17].mxu1 }
 0x117   :  { %v404_v15 = vpop.f32.mrb[18].mxu0  ;;  %v508_v17 = vpop.f32.mrb[18].mxu1  ;;  %v1318_v10 = vld [vmem:[%s2130_s3 + $0x38] sm:$0xff]  }
 0x118   :  { %v405_v18 = vadd.f32 %v1933_v29, %v404_v15  ;;  %v1426_v19 = vpop.f32.mrb[19].mxu0  ;;  %v699_v20 = vadd.f32 %v1166_v5, %v506_v12  ;;  %v509_v21 = vadd.f32 %v1933_v29, %v508_v17  ;;  %v1478_v24 = vpop.f32.mrb[19].mxu1  ;;  %v673_v26 = vadd.f32 %v1114_v7, %v402_v9  ;;  %v1331_v7 = vld [vmem:[%s2130_s3 + $0xa0] sm:$0xff]  }
 0x119   :  { %v1126_v17 = vunpack.c.l.bf16 %v1318_v10 }
 0x11a   :  { %v674_v27 = vadd.f32 %v1115_v11, %v405_v18  ;;  %v700_v30 = vadd.f32 %v1167_v14, %v509_v21  ;;  %v1178_v14 = vunpack.c.l.bf16 %v1331_v7  ;;  %v1127_v21 = vunpack.c.h.bf16 %v1318_v10 }
 0x11c   :  { %v1215_v35 = vpack.c.bf16 %v674_v27, %v673_v26  ;;  %v1280_v36 = vpack.c.bf16 %v700_v30, %v699_v20  ;;  %v1179_v26 = vunpack.c.h.bf16 %v1331_v7 }
 0x11d   :  { %v409_v42 = vpop.f32.mrb[20].mxu0  ;;  %v513_v16 = vpop.f32.mrb[20].mxu1 }
 0x11e   :  { %1338 = vst [vmem:[%s2132_s4 + $0x20] sm:$0xff] %v1215_v35   ;;  %v410_v22 = vadd.f32 %v1933_v29, %v409_v42  ;;  %v1429_v23 = vpop.f32.mrb[21].mxu0  ;;  %1351 = vst [vmem:[%s2132_s4 + $0x88] sm:$0xff] %v1280_v36   ;;  %v514_v32 = vadd.f32 %v1933_v29, %v513_v16  ;;  %v1481_v0 = vpop.f32.mrb[21].mxu1 }
 0x11f   :  { %v412_v34 = vpop.f32.mrb[22].mxu0  ;;  %v516_v37 = vpop.f32.mrb[22].mxu1  ;;  %v1319_v23 = vld [vmem:[%s2130_s3 + $0x40] sm:$0xff]  }
 0x120   :  { %v413_v38 = vadd.f32 %v1933_v29, %v412_v34  ;;  %v1430_v39 = vpop.f32.mrb[23].mxu0  ;;  %v701_v40 = vadd.f32 %v1170_v41, %v514_v32  ;;  %v517_v45 = vadd.f32 %v1933_v29, %v516_v37  ;;  %v1482_v46 = vpop.f32.mrb[23].mxu1  ;;  %v675_v49 = vadd.f32 %v1118_v43, %v410_v22  ;;  %v1332_v43 = vld [vmem:[%s2130_s3 + $0xa8] sm:$0xff]  }
 0x121   :  { %v1130_v37 = vunpack.c.l.bf16 %v1319_v23 }
 0x122   :  { %v676_v50 = vadd.f32 %v1119_v31, %v413_v38  ;;  %v702_v52 = vadd.f32 %v1171_v33, %v517_v45  ;;  %v1182_v33 = vunpack.c.l.bf16 %v1332_v43  ;;  %v1131_v45 = vunpack.c.h.bf16 %v1319_v23 }
 0x124   :  { %v1220_v53 = vpack.c.bf16 %v676_v50, %v675_v49  ;;  %v1285_v54 = vpack.c.bf16 %v702_v52, %v701_v40  ;;  %v1183_v49 = vunpack.c.h.bf16 %v1332_v43 }
 0x125   :  { %v417_v59 = vpop.f32.mrb[24].mxu0  ;;  %v521_v1 = vpop.f32.mrb[24].mxu1 }
 0x126   :  { %1339 = vst [vmem:[%s2132_s4 + $0x28] sm:$0xff] %v1220_v53   ;;  %v418_v2 = vadd.f32 %v1933_v29, %v417_v59  ;;  %v1433_v44 = vpop.f32.mrb[25].mxu0  ;;  %1352 = vst [vmem:[%s2132_s4 + $0x90] sm:$0xff] %v1285_v54   ;;  %v522_v56 = vadd.f32 %v1933_v29, %v521_v1  ;;  %v1485_v57 = vpop.f32.mrb[25].mxu1 }
 0x127   :  { %v420_v61 = vpop.f32.mrb[26].mxu0  ;;  %v524_v62 = vpop.f32.mrb[26].mxu1  ;;  %v1320_v44 = vld [vmem:[%s2130_s3 + $0x48] sm:$0xff]  }
 0x128   :  { %v421_v63 = vadd.f32 %v1933_v29, %v420_v61  ;;  %v1434_v3 = vpop.f32.mrb[27].mxu0  ;;  %v703_v4 = vadd.f32 %v1174_v55, %v522_v56  ;;  %v525_v5 = vadd.f32 %v1933_v29, %v524_v62  ;;  %v1486_v6 = vpop.f32.mrb[27].mxu1  ;;  %v677_v8 = vadd.f32 %v1122_v60, %v418_v2  ;;  %v1333_v60 = vld [vmem:[%s2130_s3 + $0xb0] sm:$0xff]  }
 0x129   :  { %v1134_v62 = vunpack.c.l.bf16 %v1320_v44 }
 0x12a   :  { %v678_v9 = vadd.f32 %v1123_v48, %v421_v63  ;;  %v704_v11 = vadd.f32 %v1175_v58, %v525_v5  ;;  %v1186_v58 = vunpack.c.l.bf16 %v1333_v60  ;;  %v1135_v5 = vunpack.c.h.bf16 %v1320_v44 }
 0x12c   :  { %v1225_v12 = vpack.c.bf16 %v678_v9, %v677_v8  ;;  %v1290_v13 = vpack.c.bf16 %v704_v11, %v703_v4  ;;  %v1187_v8 = vunpack.c.h.bf16 %v1333_v60 }
 0x12d   :  { %v425_v15 = vpop.f32.mrb[28].mxu0  ;;  %v529_v18 = vpop.f32.mrb[28].mxu1 }
 0x12e   :  { %1340 = vst [vmem:[%s2132_s4 + $0x30] sm:$0xff] %v1225_v12   ;;  %v426_v19 = vadd.f32 %v1933_v29, %v425_v15  ;;  %v1437_v20 = vpop.f32.mrb[29].mxu0  ;;  %1353 = vst [vmem:[%s2132_s4 + $0x98] sm:$0xff] %v1290_v13   ;;  %v530_v24 = vadd.f32 %v1933_v29, %v529_v18  ;;  %v1489_v25 = vpop.f32.mrb[29].mxu1 }
 0x12f   :  { %v428_v27 = vpop.f32.mrb[30].mxu0  ;;  %v532_v28 = vpop.f32.mrb[30].mxu1  ;;  %v1321_v20 = vld [vmem:[%s2130_s3 + $0x50] sm:$0xff]  }
 0x130   :  { %v429_v30 = vadd.f32 %v1933_v29, %v428_v27  ;;  %v1438_v35 = vpop.f32.mrb[31].mxu0  ;;  %v705_v36 = vadd.f32 %v1178_v14, %v530_v24  ;;  %v533_v41 = vadd.f32 %v1933_v29, %v532_v28  ;;  %v1490_v42 = vpop.f32.mrb[31].mxu1  ;;  %v679_v16 = vadd.f32 %v1126_v17, %v426_v19  ;;  %v1334_v17 = vld [vmem:[%s2130_s3 + $0xb8] sm:$0xff]  }
 0x131   :  { %v1138_v28 = vunpack.c.l.bf16 %v1321_v20 }
 0x132   :  { %v680_v22 = vadd.f32 %v1127_v21, %v429_v30  ;;  %v706_v31 = vadd.f32 %v1179_v26, %v533_v41  ;;  %v1190_v26 = vunpack.c.l.bf16 %v1334_v17  ;;  %v1139_v41 = vunpack.c.h.bf16 %v1321_v20 }
 0x134   :  { %v1230_v32 = vpack.c.bf16 %v680_v22, %v679_v16  ;;  %v1295_v0 = vpack.c.bf16 %v706_v31, %v705_v36  ;;  %v1191_v16 = vunpack.c.h.bf16 %v1334_v17 }
 0x135   :  { %v433_v34 = vpop.f32.mrb[32].mxu0  ;;  %v537_v38 = vpop.f32.mrb[32].mxu1 }
 0x136   :  { %1341 = vst [vmem:[%s2132_s4 + $0x38] sm:$0xff] %v1230_v32   ;;  %v434_v39 = vadd.f32 %v1933_v29, %v433_v34  ;;  %v1441_v40 = vpop.f32.mrb[33].mxu0  ;;  %1354 = vst [vmem:[%s2132_s4 + $0xa0] sm:$0xff] %v1295_v0   ;;  %v538_v46 = vadd.f32 %v1933_v29, %v537_v38  ;;  %v1493_v47 = vpop.f32.mrb[33].mxu1 }
 0x137   :  { %v436_v50 = vpop.f32.mrb[34].mxu0  ;;  %v540_v51 = vpop.f32.mrb[34].mxu1 }
 0x138   :  { %v437_v52 = vadd.f32 %v1933_v29, %v436_v50  ;;  %v1442_v53 = vpop.f32.mrb[35].mxu0  ;;  %v707_v54 = vadd.f32 %v1182_v33, %v538_v46  ;;  %v541_v55 = vadd.f32 %v1933_v29, %v540_v51  ;;  %v1494_v59 = vpop.f32.mrb[35].mxu1  ;;  %v681_v1 = vadd.f32 %v1130_v37, %v434_v39  ;;  %v615_v37 = vld [vmem:[%s2130_s3 + $0xc0] sm:$0xf] }
 0x13a   :  { %v682_v2 = vadd.f32 %v1131_v45, %v437_v52  ;;  %v708_v48 = vadd.f32 %v1183_v49, %v541_v55  ;;  %v1322_v45 = vld [vmem:[%s2130_s3 + $0x58] sm:$0xff]   ;;  %v664_v49 = vunpack.c.l.bf16 %v615_v37 }
 0x13b   :  { %v1142_v53 = vunpack.c.l.bf16 %v1322_v45  ;;  %v1143_v55 = vunpack.c.h.bf16 %v1322_v45 }
 0x13c   :  { %v1235_v56 = vpack.c.bf16 %v682_v2, %v681_v1  ;;  %v1300_v57 = vpack.c.bf16 %v708_v48, %v707_v54 }
 0x13d   :  { %v441_v61 = vpop.f32.mrb[36].mxu0  ;;  %v545_v63 = vpop.f32.mrb[36].mxu1 }
 0x13e   :  { %1342 = vst [vmem:[%s2132_s4 + $0x40] sm:$0xff] %v1235_v56   ;;  %v442_v3 = vadd.f32 %v1933_v29, %v441_v61  ;;  %v1445_v4 = vpop.f32.mrb[37].mxu0  ;;  %1355 = vst [vmem:[%s2132_s4 + $0xa8] sm:$0xff] %v1300_v57   ;;  %v546_v6 = vadd.f32 %v1933_v29, %v545_v63  ;;  %v1497_v7 = vpop.f32.mrb[37].mxu1  ;;  %v1323_v63 = vld [vmem:[%s2130_s3 + $0x60] sm:$0xff]  }
 0x13f   :  { %v444_v9 = vpop.f32.mrb[38].mxu0  ;;  %v548_v10 = vpop.f32.mrb[38].mxu1 }
 0x140   :  { %v445_v11 = vadd.f32 %v1933_v29, %v444_v9  ;;  %v1446_v12 = vpop.f32.mrb[39].mxu0  ;;  %v709_v13 = vadd.f32 %v1186_v58, %v546_v6  ;;  %v549_v14 = vadd.f32 %v1933_v29, %v548_v10  ;;  %v1498_v15 = vpop.f32.mrb[39].mxu1  ;;  %v683_v18 = vadd.f32 %v1134_v62, %v442_v3 }
 0x141   :  { %v1146_v6 = vunpack.c.l.bf16 %v1323_v63 }
 0x142   :  { %v684_v19 = vadd.f32 %v1135_v5, %v445_v11  ;;  %v710_v21 = vadd.f32 %v1187_v8, %v549_v14  ;;  %v1147_v8 = vunpack.c.h.bf16 %v1323_v63 }
 0x144   :  { %v1240_v24 = vpack.c.bf16 %v684_v19, %v683_v18  ;;  %v1305_v25 = vpack.c.bf16 %v710_v21, %v709_v13 }
 0x145   :  { %v449_v27 = vpop.f32.mrb[40].mxu0  ;;  %v553_v30 = vpop.f32.mrb[40].mxu1 }
 0x146   :  { %1343 = vst [vmem:[%s2132_s4 + $0x48] sm:$0xff] %v1240_v24   ;;  %v450_v35 = vadd.f32 %v1933_v29, %v449_v27  ;;  %v1449_v36 = vpop.f32.mrb[41].mxu0  ;;  %1356 = vst [vmem:[%s2132_s4 + $0xb0] sm:$0xff] %v1305_v25   ;;  %v554_v42 = vadd.f32 %v1933_v29, %v553_v30  ;;  %v1501_v43 = vpop.f32.mrb[41].mxu1 }
 0x147   :  { %v452_v22 = vpop.f32.mrb[42].mxu0  ;;  %v556_v23 = vpop.f32.mrb[42].mxu1 }
 0x148   :  { %v453_v31 = vadd.f32 %v1933_v29, %v452_v22  ;;  %v1450_v32 = vpop.f32.mrb[43].mxu0  ;;  %v711_v0 = vadd.f32 %v1190_v26, %v554_v42  ;;  %v557_v33 = vadd.f32 %v1933_v29, %v556_v23  ;;  %v1502_v34 = vpop.f32.mrb[43].mxu1  ;;  %v685_v38 = vadd.f32 %v1138_v28, %v450_v35 }
 0x14a   :  { %v686_v39 = vadd.f32 %v1139_v41, %v453_v31  ;;  %v712_v40 = vadd.f32 %v1191_v16, %v557_v33 }
 0x14c   :  { %v1245_v46 = vpack.c.bf16 %v686_v39, %v685_v38  ;;  %v1310_v47 = vpack.c.bf16 %v712_v40, %v711_v0 }
 0x14d   :  { %v457_v50 = vpop.f32.mrb[44].mxu0  ;;  %v561_v51 = vpop.f32.mrb[44].mxu1 }
 0x14e   :  { %1344 = vst [vmem:[%s2132_s4 + $0x50] sm:$0xff] %v1245_v46   ;;  %v458_v52 = vadd.f32 %v1933_v29, %v457_v50  ;;  %v1453_v54 = vpop.f32.mrb[45].mxu0  ;;  %1357 = vst [vmem:[%s2132_s4 + $0xb8] sm:$0xff] %v1310_v47   ;;  %v562_v59 = vadd.f32 %v1933_v29, %v561_v51  ;;  %v1505_v60 = vpop.f32.mrb[45].mxu1 }
 0x14f   :  { %v460_v1 = vpop.f32.mrb[46].mxu0  ;;  %v564_v2 = vpop.f32.mrb[46].mxu1 }
 0x150   :  { %v461_v44 = vadd.f32 %v1933_v29, %v460_v1  ;;  %v1454_v48 = vpop.f32.mrb[47].mxu0  ;;  %v713_v56 = vadd.f32 %v664_v49, %v562_v59  ;;  %v1506_v57 = vpop.f32.mrb[47].mxu1  ;;  %v687_v58 = vadd.f32 %v1142_v53, %v458_v52 }
 0x152   :  { %v688_v61 = vadd.f32 %v1143_v55, %v461_v44  ;;  %v1095_v62 = vpack.c.bf16 %v713_v56, %v713_v56 }
 0x154   :  { %v1250_v3 = vpack.c.bf16 %v688_v61, %v687_v58  ;;  %959 = vst [vmem:[%s2132_s4 + $0xc0] sm:$0xf] %v1095_v62 }
 0x155   :  { %v465_v4 = vpop.f32.mrb[48].mxu0 }
 0x156   :  { %1345 = vst [vmem:[%s2132_s4 + $0x58] sm:$0xff] %v1250_v3   ;;  %v466_v5 = vadd.f32 %v1933_v29, %v465_v4  ;;  %v1457_v7 = vpop.f32.mrb[49].mxu0 }
 0x157   :  { %v468_v9 = vpop.f32.mrb[50].mxu0 }
 0x158   :  { %v469_v10 = vadd.f32 %v1933_v29, %v468_v9  ;;  %v1458_v11 = vpop.f32.mrb[51].mxu0  ;;  %v689_v12 = vadd.f32 %v1146_v6, %v466_v5 }
 0x15a   :  { %v690_v13 = vadd.f32 %v1147_v8, %v469_v10 }
 0x15c   :  { %v1255_v14 = vpack.c.bf16 %v690_v13, %v689_v12 }
 0x15e   :  { %1346 = vst [vmem:[%s2132_s4 + $0x60] sm:$0xff] %v1255_v14  }

// kernel: _lambda_.21
= control target key start
LH: loop header
LB: loop body
LE: loop exit
PB: predicated region body
PF: predicated region fallthrough
CT: control target
= control target key end

     0   :  { %v1265_v0 = vmov 0.0   ;;  %vm1266_vm0 = vmmov 0   ;;  %v1267_v16 = vmov 0   ;;  %s1779_s1 = inlined_call_operand.vmem [shape: bf16[128,128], index: 1, kind: input, shape index: {}]   ;;  %s1780_s0 = inlined_call_operand.vmem [shape: bf16[392,128], index: 0, kind: input, shape index: {}]   ;;  %s1781_s2 = inlined_call_operand.vmem [shape: f32[1,128], index: 2, kind: input, shape index: {}]   ;;  %s1782_s3 = inlined_call_operand.vmem [shape: bf16[392,128], index: 3, kind: output, shape index: {}]  }
   0x1   :  { %1122 = vmatprep.subr.bf16.mxu0 %v1265_v0  ;;  %v1257_v1 = vld [vmem:[%s1779_s1] sm:$0xff]   ;;  %1238 = vmatprep.subr.bf16.mxu1 %v1265_v0  ;;  %v1258_v2 = vld [vmem:[%s1779_s1 + $0x8] sm:$0xff]   ;;  %v1259_v3 = vld [vmem:[%s1779_s1 + $0x10] sm:$0xff]  }
   0x2   :  { %1138 = vmatprep.mubr.msk.bf16.mxu0 %vm1266_vm0, %v1265_v0  ;;  %1190 = vmatprep.mubr.msk.bf16.mxu1 %vm1266_vm0, %v1265_v0  ;;  %v1260_v4 = vld [vmem:[%s1779_s1 + $0x18] sm:$0xff]   ;;  %v1261_v5 = vld [vmem:[%s1779_s1 + $0x20] sm:$0xff]   ;;  %v1262_v6 = vld [vmem:[%s1779_s1 + $0x28] sm:$0xff]  }
   0x3   :  { %1123 = vmatpush3.bf16.msra.mxu0 %v1257_v1  ;;  %1246 = vmatpush3.bf16.msra.mxu1 %v1257_v1  ;;  %v15_v7 = vld [vmem:[%s1780_s0] sm:$0xf]  ;;  %v16_v8 = vld [vmem:[%s1780_s0 + $0x4] sm:$0xf]  ;;  %v41_v9 = vld [vmem:[%s1780_s0 + $0x68] sm:$0xf] }
   0x4   :  { %1124 = vmatprep.subr.bf16.mxu0 %v1265_v0  ;;  %1239 = vmatprep.subr.bf16.mxu1 %v1265_v0  ;;  %v31_v10 = vld [vmem:[%s1780_s0 + $0x40] sm:$0xf]  ;;  %v32_v11 = vld [vmem:[%s1780_s0 + $0x44] sm:$0xf]  ;;  %v1263_v12 = vld [vmem:[%s1779_s1 + $0x30] sm:$0xff]   ;;  %v64_v17 = vmax.bf16 %v1267_v16, %v15_v7  ;;  %v65_v21 = vmax.bf16 %v1267_v16, %v16_v8  ;;  %v90_v27 = vmax.bf16 %v1267_v16, %v41_v9 }
   0x5   :  { %v42_v13 = vld [vmem:[%s1780_s0 + $0x6c] sm:$0xf]  ;;  %v57_v14 = vld [vmem:[%s1780_s0 + $0xa8] sm:$0xf]  ;;  %v59_v20 = vld [vmem:[%s1780_s0 + $0xb0] sm:$0xf]  ;;  %v1361_v22 = vmax.bf16 %v1267_v16, %v31_v10  ;;  %v1364_v23 = vmax.bf16 %v1267_v16, %v32_v11 }
   0x6   :  { %v58_v15 = vld [vmem:[%s1780_s0 + $0xac] sm:$0xf]  ;;  %v33_v18 = vld [vmem:[%s1780_s0 + $0x48] sm:$0xf]  ;;  %v60_v24 = vld [vmem:[%s1780_s0 + $0xb4] sm:$0xf]  ;;  %v91_v28 = vmax.bf16 %v1267_v16, %v42_v13  ;;  %v1380_v29 = vmax.bf16 %v1267_v16, %v57_v14  ;;  %v1403_v37 = vmax.bf16 %v1267_v16, %v59_v20  ;;  %v815_v56 = vcombine.low %v64_v17, %v65_v21 }
   0x7   :  { %1125 = vmatpush3.bf16.msra.mxu0 %v1258_v2  ;;  %1247 = vmatpush3.bf16.msra.mxu1 %v1258_v2  ;;  %v34_v19 = vld [vmem:[%s1780_s0 + $0x4c] sm:$0xf]  ;;  %v35_v25 = vld [vmem:[%s1780_s0 + $0x50] sm:$0xf]  ;;  %v36_v26 = vld [vmem:[%s1780_s0 + $0x54] sm:$0xf]  ;;  %v823_v31 = vcombine.low %v1361_v22, %v1364_v23  ;;  %v1388_v32 = vmax.bf16 %v1267_v16, %v58_v15  ;;  %v1391_v33 = vmax.bf16 %v1267_v16, %v33_v18 }
   0x8   :  { %1126 = vmatprep.subr.bf16.mxu0 %v1265_v0  ;;  %1240 = vmatprep.subr.bf16.mxu1 %v1265_v0  ;;  %v61_v30 = vld [vmem:[%s1780_s0 + $0xb8] sm:$0xf]  ;;  %v1394_v34 = vmax.bf16 %v1267_v16, %v34_v19  ;;  %v62_v35 = vld [vmem:[%s1780_s0 + $0xbc] sm:$0xf]  ;;  %v1406_v38 = vmax.bf16 %v1267_v16, %v60_v24  ;;  %v1409_v39 = vmax.bf16 %v1267_v16, %v35_v25  ;;  %v63_v42 = vld [vmem:[%s1780_s0 + $0xc0] sm:$0xf] }
   0x9   :  { %v37_v36 = vld [vmem:[%s1780_s0 + $0x58] sm:$0xf]  ;;  %v1412_v40 = vmax.bf16 %v1267_v16, %v36_v26  ;;  %v38_v41 = vld [vmem:[%s1780_s0 + $0x5c] sm:$0xf]  ;;  %v39_v43 = vld [vmem:[%s1780_s0 + $0x60] sm:$0xf]  ;;  %v836_v45 = vcombine.low %v1380_v29, %v1388_v32  ;;  %v1431_v47 = vmax.bf16 %v1267_v16, %v61_v30  ;;  %v1443_v51 = vmax.bf16 %v1267_v16, %v62_v35 }
   0xa   :  { %v1264_v44 = vld [vmem:[%s1779_s1 + $0x38] sm:$0xff]   ;;  %v824_v46 = vcombine.low %v1391_v33, %v1394_v34  ;;  %v40_v48 = vld [vmem:[%s1780_s0 + $0x64] sm:$0xf]  ;;  %v837_v49 = vcombine.low %v1403_v37, %v1406_v38  ;;  %v1446_v52 = vmax.bf16 %v1267_v16, %v37_v36  ;;  %v1449_v53 = vmax.bf16 %v1267_v16, %v38_v41  ;;  %v17_v58 = vld [vmem:[%s1780_s0 + $0x8] sm:$0xf] }
   0xb   :  { %1127 = vmatpush3.bf16.msra.mxu0 %v1259_v3  ;;  %1248 = vmatpush3.bf16.msra.mxu1 %v1259_v3  ;;  %v825_v50 = vcombine.low %v1409_v39, %v1412_v40  ;;  %v1452_v54 = vmax.bf16 %v1267_v16, %v63_v42  ;;  %v1455_v55 = vmax.bf16 %v1267_v16, %v39_v43  ;;  %v18_v61 = vld [vmem:[%s1780_s0 + $0xc] sm:$0xf]  ;;  %v43_v62 = vld [vmem:[%s1780_s0 + $0x70] sm:$0xf]  ;;  %v44_v63 = vld [vmem:[%s1780_s0 + $0x74] sm:$0xf] }
   0xc   :  { %1128 = vmatprep.subr.bf16.mxu0 %v1265_v0  ;;  %1241 = vmatprep.subr.bf16.mxu1 %v1265_v0  ;;  %v828_v57 = vcombine.low %v90_v27, %v91_v28  ;;  %v838_v59 = vcombine.low %v1431_v47, %v1443_v51  ;;  %v1463_v60 = vmax.bf16 %v1267_v16, %v40_v48  ;;  %v19_v9 = vld [vmem:[%s1780_s0 + $0x10] sm:$0xf]  ;;  %v20_v10 = vld [vmem:[%s1780_s0 + $0x14] sm:$0xf]  ;;  %v45_v11 = vld [vmem:[%s1780_s0 + $0x78] sm:$0xf] }
   0xd   :  { %v826_v1 = vcombine.low %v1446_v52, %v1449_v53  ;;  %v66_v3 = vmax.bf16 %v1267_v16, %v17_v58  ;;  %v68_v13 = vmax.bf16 %v1267_v16, %v19_v9  ;;  %v69_v14 = vmax.bf16 %v1267_v16, %v20_v10  ;;  %v21_v20 = vld [vmem:[%s1780_s0 + $0x18] sm:$0xf]  ;;  %v22_v21 = vld [vmem:[%s1780_s0 + $0x1c] sm:$0xf]  ;;  %v47_v24 = vld [vmem:[%s1780_s0 + $0x80] sm:$0xf] }
   0xe   :  { %v827_v2 = vcombine.low %v1455_v55, %v1463_v60  ;;  %v94_v15 = vmax.bf16 %v1267_v16, %v45_v11  ;;  %v48_v25 = vld [vmem:[%s1780_s0 + $0x84] sm:$0xf]  ;;  %v70_v26 = vmax.bf16 %v1267_v16, %v21_v20  ;;  %v71_v27 = vmax.bf16 %v1267_v16, %v22_v21  ;;  %v23_v41 = vld [vmem:[%s1780_s0 + $0x20] sm:$0xf]  ;;  %v49_v43 = vld [vmem:[%s1780_s0 + $0x88] sm:$0xf] }
   0xf   :  { %1129 = vmatpush3.bf16.msra.mxu0 %v1260_v4  ;;  %1249 = vmatpush3.bf16.msra.mxu1 %v1260_v4  ;;  %v67_v4 = vmax.bf16 %v1267_v16, %v18_v61  ;;  %v817_v18 = vcombine.low %v68_v13, %v69_v14  ;;  %v96_v28 = vmax.bf16 %v1267_v16, %v47_v24  ;;  %v24_v42 = vld [vmem:[%s1780_s0 + $0x24] sm:$0xf]  ;;  %v28_v13 = vld [vmem:[%s1780_s0 + $0x34] sm:$0xf]  ;;  %v53_v14 = vld [vmem:[%s1780_s0 + $0x98] sm:$0xf] }
  0x10   :  { %1130 = vmatprep.subr.bf16.mxu0 %v1265_v0  ;;  %1242 = vmatprep.subr.bf16.mxu1 %v1265_v0  ;;  %v97_v30 = vmax.bf16 %v1267_v16, %v48_v25  ;;  %v818_v35 = vcombine.low %v70_v26, %v71_v27  ;;  %v72_v48 = vmax.bf16 %v1267_v16, %v23_v41  ;;  %v29_v25 = vld [vmem:[%s1780_s0 + $0x38] sm:$0xf]  ;;  %v30_v26 = vld [vmem:[%s1780_s0 + $0x3c] sm:$0xf]  ;;  %v55_v27 = vld [vmem:[%s1780_s0 + $0xa0] sm:$0xf] }
  0x11   :  { %v816_v7 = vcombine.low %v66_v3, %v67_v4  ;;  %v26_v3 = vld [vmem:[%s1780_s0 + $0x2c] sm:$0xf]  ;;  %v51_v4 = vld [vmem:[%s1780_s0 + $0x90] sm:$0xf]  ;;  %v1653_v22 = vld [vmem:[%s1781_s2] ss:$0 sm:$0xff] }
  0x12   :  { %v831_v36 = vcombine.low %v96_v28, %v97_v30  ;;  %v56_v28 = vld [vmem:[%s1780_s0 + $0xa4] sm:$0xf]  ;;  %v78_v30 = vmax.bf16 %v1267_v16, %v29_v25 }
  0x13   :  { %1131 = vmatpush3.bf16.msra.mxu0 %v1261_v5  ;;  %1250 = vmatpush3.bf16.msra.mxu1 %v1261_v5  ;;  %v92_v5 = vmax.bf16 %v1267_v16, %v43_v62  ;;  %v105_v41 = vmax.bf16 %v1267_v16, %v56_v28 }
  0x14   :  { %1132 = vmatprep.subr.bf16.mxu0 %v1265_v0  ;;  %1243 = vmatprep.subr.bf16.mxu1 %v1265_v0 }
  0x17   :  { %1133 = vmatpush3.bf16.msra.mxu0 %v1262_v6  ;;  %1251 = vmatpush3.bf16.msra.mxu1 %v1262_v6  ;;  %v93_v6 = vmax.bf16 %v1267_v16, %v44_v63  ;;  %v25_v63 = vld [vmem:[%s1780_s0 + $0x28] sm:$0xf] }
  0x18   :  { %1134 = vmatprep.subr.bf16.mxu0 %v1265_v0  ;;  %1244 = vmatprep.subr.bf16.mxu1 %v1265_v0 }
  0x19   :  { %v829_v8 = vcombine.low %v92_v5, %v93_v6  ;;  %v52_v5 = vld [vmem:[%s1780_s0 + $0x94] sm:$0xf]  ;;  %v74_v6 = vmax.bf16 %v1267_v16, %v25_v63 }
  0x1a   :  { %v101_v9 = vmax.bf16 %v1267_v16, %v52_v5 }
  0x1b   :  { %1135 = vmatpush3.bf16.msra.mxu0 %v1263_v12  ;;  %1252 = vmatpush3.bf16.msra.mxu1 %v1263_v12  ;;  %v46_v12 = vld [vmem:[%s1780_s0 + $0x7c] sm:$0xf] }
  0x1c   :  { %1136 = vmatprep.subr.bf16.mxu0 %v1265_v0  ;;  %1245 = vmatprep.subr.bf16.mxu1 %v1265_v0  ;;  %v95_v17 = vmax.bf16 %v1267_v16, %v46_v12  ;;  %v27_v12 = vld [vmem:[%s1780_s0 + $0x30] sm:$0xf] }
  0x1e   :  { %v830_v19 = vcombine.low %v94_v15, %v95_v17  ;;  %v54_v15 = vld [vmem:[%s1780_s0 + $0x9c] sm:$0xf]  ;;  %v76_v17 = vmax.bf16 %v1267_v16, %v27_v12 }
  0x1f   :  { %1137 = vmatpush3.bf16.msra.mxu0 %v1264_v44  ;;  %1253 = vmatpush3.bf16.msra.mxu1 %v1264_v44  ;;  %v50_v44 = vld [vmem:[%s1780_s0 + $0x8c] sm:$0xf]  ;;  %v103_v20 = vmax.bf16 %v1267_v16, %v54_v15 }
  0x20   :  { %v99_v58 = vmax.bf16 %v1267_v16, %v50_v44 }
  0x22   :  { %1139 = vmatmul.mubr.bf16.vlgmr.msra.gmra.mrb[0].mxu0 %v815_v56  ;;  %1191 = vmatmul.mubr.bf16.vlgmr.msra.gmra.mrb[0].mxu1 %v828_v57  ;;  %v73_v56 = vmax.bf16 %v1267_v16, %v24_v42  ;;  %v98_v57 = vmax.bf16 %v1267_v16, %v49_v43 }
  0x23   :  { %1142 = vmatprep.mubr.msk.bf16.mxu0 %vm1266_vm0, %v1265_v0  ;;  %1194 = vmatprep.mubr.msk.bf16.mxu1 %vm1266_vm0, %v1265_v0 }
  0x24   :  { %v819_v61 = vcombine.low %v72_v48, %v73_v56  ;;  %v832_v62 = vcombine.low %v98_v57, %v99_v58 }
  0x2a   :  { %1143 = vmatmul.mubr.bf16.gmra.mrb[4].mxu0 %v816_v7  ;;  %1195 = vmatmul.mubr.bf16.gmra.mrb[4].mxu1 %v829_v8  ;;  %v75_v7 = vmax.bf16 %v1267_v16, %v26_v3  ;;  %v100_v8 = vmax.bf16 %v1267_v16, %v51_v4 }
  0x2b   :  { %1146 = vmatprep.mubr.msk.bf16.mxu0 %vm1266_vm0, %v1265_v0  ;;  %1198 = vmatprep.mubr.msk.bf16.mxu1 %vm1266_vm0, %v1265_v0 }
  0x2c   :  { %v820_v10 = vcombine.low %v74_v6, %v75_v7  ;;  %v833_v11 = vcombine.low %v100_v8, %v101_v9 }
  0x32   :  { %1147 = vmatmul.mubr.bf16.gmra.mrb[8].mxu0 %v817_v18  ;;  %1199 = vmatmul.mubr.bf16.gmra.mrb[8].mxu1 %v830_v19  ;;  %v77_v18 = vmax.bf16 %v1267_v16, %v28_v13  ;;  %v102_v19 = vmax.bf16 %v1267_v16, %v53_v14 }
  0x33   :  { %1150 = vmatprep.mubr.msk.bf16.mxu0 %vm1266_vm0, %v1265_v0  ;;  %1202 = vmatprep.mubr.msk.bf16.mxu1 %vm1266_vm0, %v1265_v0 }
  0x34   :  { %v821_v21 = vcombine.low %v76_v17, %v77_v18  ;;  %v834_v24 = vcombine.low %v102_v19, %v103_v20 }
  0x3a   :  { %1151 = vmatmul.mubr.bf16.gmra.mrb[12].mxu0 %v818_v35  ;;  %1203 = vmatmul.mubr.bf16.gmra.mrb[12].mxu1 %v831_v36  ;;  %v79_v35 = vmax.bf16 %v1267_v16, %v30_v26  ;;  %v104_v36 = vmax.bf16 %v1267_v16, %v55_v27  ;;  %v839_v16 = vcombine.low %v1452_v54, %v1452_v54 }
  0x3b   :  { %1154 = vmatprep.mubr.msk.bf16.mxu0 %vm1266_vm0, %v1265_v0  ;;  %1206 = vmatprep.mubr.msk.bf16.mxu1 %vm1266_vm0, %v1265_v0 }
  0x3c   :  { %v822_v42 = vcombine.low %v78_v30, %v79_v35  ;;  %v835_v43 = vcombine.low %v104_v36, %v105_v41 }
  0x42   :  { %1155 = vmatmul.mubr.bf16.gmra.mrb[16].mxu0 %v819_v61  ;;  %1207 = vmatmul.mubr.bf16.gmra.mrb[16].mxu1 %v832_v62 }
  0x43   :  { %1158 = vmatprep.mubr.msk.bf16.mxu0 %vm1266_vm0, %v1265_v0  ;;  %1210 = vmatprep.mubr.msk.bf16.mxu1 %vm1266_vm0, %v1265_v0 }
  0x4a   :  { %1159 = vmatmul.mubr.bf16.gmra.mrb[20].mxu0 %v820_v10  ;;  %1211 = vmatmul.mubr.bf16.gmra.mrb[20].mxu1 %v833_v11 }
  0x4b   :  { %1162 = vmatprep.mubr.msk.bf16.mxu0 %vm1266_vm0, %v1265_v0  ;;  %1214 = vmatprep.mubr.msk.bf16.mxu1 %vm1266_vm0, %v1265_v0 }
  0x52   :  { %1163 = vmatmul.mubr.bf16.gmra.mrb[24].mxu0 %v821_v21  ;;  %1215 = vmatmul.mubr.bf16.gmra.mrb[24].mxu1 %v834_v24 }
  0x53   :  { %1166 = vmatprep.mubr.msk.bf16.mxu0 %vm1266_vm0, %v1265_v0  ;;  %1218 = vmatprep.mubr.msk.bf16.mxu1 %vm1266_vm0, %v1265_v0 }
  0x5a   :  { %1167 = vmatmul.mubr.bf16.gmra.mrb[28].mxu0 %v822_v42  ;;  %1219 = vmatmul.mubr.bf16.gmra.mrb[28].mxu1 %v835_v43 }
  0x5b   :  { %1170 = vmatprep.mubr.msk.bf16.mxu0 %vm1266_vm0, %v1265_v0  ;;  %1222 = vmatprep.mubr.msk.bf16.mxu1 %vm1266_vm0, %v1265_v0 }
  0x62   :  { %1171 = vmatmul.mubr.bf16.gmra.mrb[32].mxu0 %v823_v31  ;;  %1223 = vmatmul.mubr.bf16.gmra.mrb[32].mxu1 %v836_v45 }
  0x63   :  { %1174 = vmatprep.mubr.msk.bf16.mxu0 %vm1266_vm0, %v1265_v0  ;;  %1226 = vmatprep.mubr.msk.bf16.mxu1 %vm1266_vm0, %v1265_v0 }
  0x6a   :  { %1175 = vmatmul.mubr.bf16.gmra.mrb[36].mxu0 %v824_v46  ;;  %1227 = vmatmul.mubr.bf16.gmra.mrb[36].mxu1 %v837_v49 }
  0x6b   :  { %1178 = vmatprep.mubr.msk.bf16.mxu0 %vm1266_vm0, %v1265_v0  ;;  %1230 = vmatprep.mubr.msk.bf16.mxu1 %vm1266_vm0, %v1265_v0 }
  0x72   :  { %1179 = vmatmul.mubr.bf16.gmra.mrb[40].mxu0 %v825_v50  ;;  %1231 = vmatmul.mubr.bf16.gmra.mrb[40].mxu1 %v838_v59 }
  0x73   :  { %1182 = vmatprep.mubr.msk.bf16.mxu0 %vm1266_vm0, %v1265_v0  ;;  %1234 = vmatprep.mubr.msk.bf16.mxu1 %vm1266_vm0, %v1265_v0 }
  0x7a   :  { %1183 = vmatmul.mubr.bf16.gmra.mrb[44].mxu0 %v826_v1  ;;  %1235 = vmatmul.mubr.bf16.gmra.mrb[44].mxu1 %v839_v16 }
  0x7b   :  { %1186 = vmatprep.mubr.msk.bf16.mxu0 %vm1266_vm0, %v1265_v0 }
  0x82   :  { %1187 = vmatmul.mubr.bf16.gmra.mrb[48].mxu0 %v827_v2 }
  0xf5   :  { %v366_v23 = vpop.f32.mrb[0].mxu0  ;;  %v470_v29 = vpop.f32.mrb[0].mxu1 }
  0xf6   :  { %v1140_v31 = vpop.f32.mrb[1].mxu0  ;;  %v471_v32 = vadd.f32 %v1653_v22, %v470_v29  ;;  %v1192_v33 = vpop.f32.mrb[1].mxu1  ;;  %v367_v38 = vadd.f32 %v1653_v22, %v366_v23 }
  0xf7   :  { %v369_v34 = vpop.f32.mrb[2].mxu0  ;;  %v473_v37 = vpop.f32.mrb[2].mxu1 }
  0xf8   :  { %v370_v0 = vadd.f32 %v1653_v22, %v369_v34  ;;  %v1141_v39 = vpop.f32.mrb[3].mxu0  ;;  %v474_v40 = vadd.f32 %v1653_v22, %v473_v37  ;;  %v1193_v45 = vpop.f32.mrb[3].mxu1 }
  0xfa   :  { %v949_v46 = vpack.c.bf16 %v370_v0, %v367_v38  ;;  %v1014_v47 = vpack.c.bf16 %v474_v40, %v471_v32 }
  0xfc   :  { %950 = vst [vmem:[%s1782_s3] sm:$0xff] %v949_v46   ;;  %1078 = vst [vmem:[%s1782_s3 + $0x68] sm:$0xff] %v1014_v47  }
  0xfd   :  { %v374_v49 = vpop.f32.mrb[4].mxu0  ;;  %v478_v50 = vpop.f32.mrb[4].mxu1 }
  0xfe   :  { %v1144_v51 = vpop.f32.mrb[5].mxu0  ;;  %v479_v52 = vadd.f32 %v1653_v22, %v478_v50  ;;  %v1196_v53 = vpop.f32.mrb[5].mxu1  ;;  %v375_v59 = vadd.f32 %v1653_v22, %v374_v49 }
  0xff   :  { %v377_v54 = vpop.f32.mrb[6].mxu0  ;;  %v481_v55 = vpop.f32.mrb[6].mxu1 }
 0x100   :  { %v378_v60 = vadd.f32 %v1653_v22, %v377_v54  ;;  %v1145_v1 = vpop.f32.mrb[7].mxu0  ;;  %v482_v2 = vadd.f32 %v1653_v22, %v481_v55  ;;  %v1197_v44 = vpop.f32.mrb[7].mxu1 }
 0x102   :  { %v954_v48 = vpack.c.bf16 %v378_v60, %v375_v59  ;;  %v1019_v56 = vpack.c.bf16 %v482_v2, %v479_v52 }
 0x104   :  { %1066 = vst [vmem:[%s1782_s3 + $0x8] sm:$0xff] %v954_v48   ;;  %1079 = vst [vmem:[%s1782_s3 + $0x70] sm:$0xff] %v1019_v56  }
 0x105   :  { %v382_v57 = vpop.f32.mrb[8].mxu0  ;;  %v486_v58 = vpop.f32.mrb[8].mxu1 }
 0x106   :  { %v1148_v61 = vpop.f32.mrb[9].mxu0  ;;  %v487_v62 = vadd.f32 %v1653_v22, %v486_v58  ;;  %v1200_v63 = vpop.f32.mrb[9].mxu1  ;;  %v383_v5 = vadd.f32 %v1653_v22, %v382_v57 }
 0x107   :  { %v385_v3 = vpop.f32.mrb[10].mxu0  ;;  %v489_v4 = vpop.f32.mrb[10].mxu1 }
 0x108   :  { %v386_v6 = vadd.f32 %v1653_v22, %v385_v3  ;;  %v1149_v7 = vpop.f32.mrb[11].mxu0  ;;  %v490_v8 = vadd.f32 %v1653_v22, %v489_v4  ;;  %v1201_v9 = vpop.f32.mrb[11].mxu1 }
 0x10a   :  { %v959_v10 = vpack.c.bf16 %v386_v6, %v383_v5  ;;  %v1024_v11 = vpack.c.bf16 %v490_v8, %v487_v62 }
 0x10c   :  { %1067 = vst [vmem:[%s1782_s3 + $0x10] sm:$0xff] %v959_v10   ;;  %1080 = vst [vmem:[%s1782_s3 + $0x78] sm:$0xff] %v1024_v11  }
 0x10d   :  { %v390_v12 = vpop.f32.mrb[12].mxu0  ;;  %v494_v13 = vpop.f32.mrb[12].mxu1 }
 0x10e   :  { %v1152_v14 = vpop.f32.mrb[13].mxu0  ;;  %v495_v15 = vadd.f32 %v1653_v22, %v494_v13  ;;  %v1204_v17 = vpop.f32.mrb[13].mxu1  ;;  %v391_v20 = vadd.f32 %v1653_v22, %v390_v12 }
 0x10f   :  { %v393_v18 = vpop.f32.mrb[14].mxu0  ;;  %v497_v19 = vpop.f32.mrb[14].mxu1 }
 0x110   :  { %v394_v21 = vadd.f32 %v1653_v22, %v393_v18  ;;  %v1153_v24 = vpop.f32.mrb[15].mxu0  ;;  %v498_v25 = vadd.f32 %v1653_v22, %v497_v19  ;;  %v1205_v26 = vpop.f32.mrb[15].mxu1 }
 0x112   :  { %v964_v27 = vpack.c.bf16 %v394_v21, %v391_v20  ;;  %v1029_v28 = vpack.c.bf16 %v498_v25, %v495_v15 }
 0x114   :  { %1068 = vst [vmem:[%s1782_s3 + $0x18] sm:$0xff] %v964_v27   ;;  %1081 = vst [vmem:[%s1782_s3 + $0x80] sm:$0xff] %v1029_v28  }
 0x115   :  { %v398_v30 = vpop.f32.mrb[16].mxu0  ;;  %v502_v35 = vpop.f32.mrb[16].mxu1 }
 0x116   :  { %v1156_v36 = vpop.f32.mrb[17].mxu0  ;;  %v503_v41 = vadd.f32 %v1653_v22, %v502_v35  ;;  %v1208_v42 = vpop.f32.mrb[17].mxu1  ;;  %v399_v23 = vadd.f32 %v1653_v22, %v398_v30 }
 0x117   :  { %v401_v43 = vpop.f32.mrb[18].mxu0  ;;  %v505_v16 = vpop.f32.mrb[18].mxu1 }
 0x118   :  { %v402_v29 = vadd.f32 %v1653_v22, %v401_v43  ;;  %v1157_v31 = vpop.f32.mrb[19].mxu0  ;;  %v506_v32 = vadd.f32 %v1653_v22, %v505_v16  ;;  %v1209_v33 = vpop.f32.mrb[19].mxu1 }
 0x11a   :  { %v969_v34 = vpack.c.bf16 %v402_v29, %v399_v23  ;;  %v1034_v37 = vpack.c.bf16 %v506_v32, %v503_v41 }
 0x11c   :  { %1069 = vst [vmem:[%s1782_s3 + $0x20] sm:$0xff] %v969_v34   ;;  %1082 = vst [vmem:[%s1782_s3 + $0x88] sm:$0xff] %v1034_v37  }
 0x11d   :  { %v406_v38 = vpop.f32.mrb[20].mxu0  ;;  %v510_v0 = vpop.f32.mrb[20].mxu1 }
 0x11e   :  { %v1160_v39 = vpop.f32.mrb[21].mxu0  ;;  %v511_v40 = vadd.f32 %v1653_v22, %v510_v0  ;;  %v1212_v45 = vpop.f32.mrb[21].mxu1  ;;  %v407_v49 = vadd.f32 %v1653_v22, %v406_v38 }
 0x11f   :  { %v409_v46 = vpop.f32.mrb[22].mxu0  ;;  %v513_v47 = vpop.f32.mrb[22].mxu1 }
 0x120   :  { %v410_v50 = vadd.f32 %v1653_v22, %v409_v46  ;;  %v1161_v51 = vpop.f32.mrb[23].mxu0  ;;  %v514_v52 = vadd.f32 %v1653_v22, %v513_v47  ;;  %v1213_v53 = vpop.f32.mrb[23].mxu1 }
 0x122   :  { %v974_v54 = vpack.c.bf16 %v410_v50, %v407_v49  ;;  %v1039_v55 = vpack.c.bf16 %v514_v52, %v511_v40 }
 0x124   :  { %1070 = vst [vmem:[%s1782_s3 + $0x28] sm:$0xff] %v974_v54   ;;  %1083 = vst [vmem:[%s1782_s3 + $0x90] sm:$0xff] %v1039_v55  }
 0x125   :  { %v414_v59 = vpop.f32.mrb[24].mxu0  ;;  %v518_v60 = vpop.f32.mrb[24].mxu1 }
 0x126   :  { %v1164_v1 = vpop.f32.mrb[25].mxu0  ;;  %v519_v2 = vadd.f32 %v1653_v22, %v518_v60  ;;  %v1216_v44 = vpop.f32.mrb[25].mxu1  ;;  %v415_v57 = vadd.f32 %v1653_v22, %v414_v59 }
 0x127   :  { %v417_v48 = vpop.f32.mrb[26].mxu0  ;;  %v521_v56 = vpop.f32.mrb[26].mxu1 }
 0x128   :  { %v418_v58 = vadd.f32 %v1653_v22, %v417_v48  ;;  %v1165_v61 = vpop.f32.mrb[27].mxu0  ;;  %v522_v62 = vadd.f32 %v1653_v22, %v521_v56  ;;  %v1217_v63 = vpop.f32.mrb[27].mxu1 }
 0x12a   :  { %v979_v3 = vpack.c.bf16 %v418_v58, %v415_v57  ;;  %v1044_v4 = vpack.c.bf16 %v522_v62, %v519_v2 }
 0x12c   :  { %1071 = vst [vmem:[%s1782_s3 + $0x30] sm:$0xff] %v979_v3   ;;  %1084 = vst [vmem:[%s1782_s3 + $0x98] sm:$0xff] %v1044_v4  }
 0x12d   :  { %v422_v5 = vpop.f32.mrb[28].mxu0  ;;  %v526_v6 = vpop.f32.mrb[28].mxu1 }
 0x12e   :  { %v1168_v7 = vpop.f32.mrb[29].mxu0  ;;  %v527_v8 = vadd.f32 %v1653_v22, %v526_v6  ;;  %v1220_v9 = vpop.f32.mrb[29].mxu1  ;;  %v423_v12 = vadd.f32 %v1653_v22, %v422_v5 }
 0x12f   :  { %v425_v10 = vpop.f32.mrb[30].mxu0  ;;  %v529_v11 = vpop.f32.mrb[30].mxu1 }
 0x130   :  { %v426_v13 = vadd.f32 %v1653_v22, %v425_v10  ;;  %v1169_v14 = vpop.f32.mrb[31].mxu0  ;;  %v530_v15 = vadd.f32 %v1653_v22, %v529_v11  ;;  %v1221_v17 = vpop.f32.mrb[31].mxu1 }
 0x132   :  { %v984_v18 = vpack.c.bf16 %v426_v13, %v423_v12  ;;  %v1049_v19 = vpack.c.bf16 %v530_v15, %v527_v8 }
 0x134   :  { %1072 = vst [vmem:[%s1782_s3 + $0x38] sm:$0xff] %v984_v18   ;;  %1085 = vst [vmem:[%s1782_s3 + $0xa0] sm:$0xff] %v1049_v19  }
 0x135   :  { %v430_v20 = vpop.f32.mrb[32].mxu0  ;;  %v534_v21 = vpop.f32.mrb[32].mxu1 }
 0x136   :  { %v1172_v24 = vpop.f32.mrb[33].mxu0  ;;  %v535_v25 = vadd.f32 %v1653_v22, %v534_v21  ;;  %v1224_v26 = vpop.f32.mrb[33].mxu1  ;;  %v431_v30 = vadd.f32 %v1653_v22, %v430_v20 }
 0x137   :  { %v433_v27 = vpop.f32.mrb[34].mxu0  ;;  %v537_v28 = vpop.f32.mrb[34].mxu1 }
 0x138   :  { %v434_v35 = vadd.f32 %v1653_v22, %v433_v27  ;;  %v1173_v36 = vpop.f32.mrb[35].mxu0  ;;  %v538_v41 = vadd.f32 %v1653_v22, %v537_v28  ;;  %v1225_v42 = vpop.f32.mrb[35].mxu1 }
 0x13a   :  { %v989_v43 = vpack.c.bf16 %v434_v35, %v431_v30  ;;  %v1054_v16 = vpack.c.bf16 %v538_v41, %v535_v25 }
 0x13c   :  { %1073 = vst [vmem:[%s1782_s3 + $0x40] sm:$0xff] %v989_v43   ;;  %1086 = vst [vmem:[%s1782_s3 + $0xa8] sm:$0xff] %v1054_v16  }
 0x13d   :  { %v438_v23 = vpop.f32.mrb[36].mxu0  ;;  %v542_v29 = vpop.f32.mrb[36].mxu1 }
 0x13e   :  { %v1176_v31 = vpop.f32.mrb[37].mxu0  ;;  %v543_v32 = vadd.f32 %v1653_v22, %v542_v29  ;;  %v1228_v33 = vpop.f32.mrb[37].mxu1  ;;  %v439_v38 = vadd.f32 %v1653_v22, %v438_v23 }
 0x13f   :  { %v441_v34 = vpop.f32.mrb[38].mxu0  ;;  %v545_v37 = vpop.f32.mrb[38].mxu1 }
 0x140   :  { %v442_v0 = vadd.f32 %v1653_v22, %v441_v34  ;;  %v1177_v39 = vpop.f32.mrb[39].mxu0  ;;  %v546_v40 = vadd.f32 %v1653_v22, %v545_v37  ;;  %v1229_v45 = vpop.f32.mrb[39].mxu1 }
 0x142   :  { %v994_v46 = vpack.c.bf16 %v442_v0, %v439_v38  ;;  %v1059_v47 = vpack.c.bf16 %v546_v40, %v543_v32 }
 0x144   :  { %1074 = vst [vmem:[%s1782_s3 + $0x48] sm:$0xff] %v994_v46   ;;  %1087 = vst [vmem:[%s1782_s3 + $0xb0] sm:$0xff] %v1059_v47  }
 0x145   :  { %v446_v49 = vpop.f32.mrb[40].mxu0  ;;  %v550_v50 = vpop.f32.mrb[40].mxu1 }
 0x146   :  { %v1180_v51 = vpop.f32.mrb[41].mxu0  ;;  %v551_v52 = vadd.f32 %v1653_v22, %v550_v50  ;;  %v1232_v53 = vpop.f32.mrb[41].mxu1  ;;  %v447_v59 = vadd.f32 %v1653_v22, %v446_v49 }
 0x147   :  { %v449_v54 = vpop.f32.mrb[42].mxu0  ;;  %v553_v55 = vpop.f32.mrb[42].mxu1 }
 0x148   :  { %v450_v60 = vadd.f32 %v1653_v22, %v449_v54  ;;  %v1181_v1 = vpop.f32.mrb[43].mxu0  ;;  %v554_v2 = vadd.f32 %v1653_v22, %v553_v55  ;;  %v1233_v44 = vpop.f32.mrb[43].mxu1 }
 0x14a   :  { %v999_v48 = vpack.c.bf16 %v450_v60, %v447_v59  ;;  %v1064_v56 = vpack.c.bf16 %v554_v2, %v551_v52 }
 0x14c   :  { %1075 = vst [vmem:[%s1782_s3 + $0x50] sm:$0xff] %v999_v48   ;;  %1088 = vst [vmem:[%s1782_s3 + $0xb8] sm:$0xff] %v1064_v56  }
 0x14d   :  { %v454_v57 = vpop.f32.mrb[44].mxu0  ;;  %v558_v58 = vpop.f32.mrb[44].mxu1 }
 0x14e   :  { %v1184_v61 = vpop.f32.mrb[45].mxu0  ;;  %v559_v62 = vadd.f32 %v1653_v22, %v558_v58  ;;  %v1236_v63 = vpop.f32.mrb[45].mxu1  ;;  %v455_v5 = vadd.f32 %v1653_v22, %v454_v57 }
 0x14f   :  { %v457_v3 = vpop.f32.mrb[46].mxu0  ;;  %v561_v4 = vpop.f32.mrb[46].mxu1 }
 0x150   :  { %v458_v6 = vadd.f32 %v1653_v22, %v457_v3  ;;  %v1185_v7 = vpop.f32.mrb[47].mxu0  ;;  %v945_v8 = vpack.c.bf16 %v559_v62, %v559_v62  ;;  %v1237_v9 = vpop.f32.mrb[47].mxu1 }
 0x152   :  { %v1004_v10 = vpack.c.bf16 %v458_v6, %v455_v5  ;;  %809 = vst [vmem:[%s1782_s3 + $0xc0] sm:$0xf] %v945_v8 }
 0x154   :  { %1076 = vst [vmem:[%s1782_s3 + $0x58] sm:$0xff] %v1004_v10  }
 0x155   :  { %v462_v11 = vpop.f32.mrb[48].mxu0 }
 0x156   :  { %v1188_v12 = vpop.f32.mrb[49].mxu0  ;;  %v463_v14 = vadd.f32 %v1653_v22, %v462_v11 }
 0x157   :  { %v465_v13 = vpop.f32.mrb[50].mxu0 }
 0x158   :  { %v466_v15 = vadd.f32 %v1653_v22, %v465_v13  ;;  %v1189_v17 = vpop.f32.mrb[51].mxu0 }
 0x15a   :  { %v1009_v18 = vpack.c.bf16 %v466_v15, %v463_v14 }
 0x15c   :  { %1077 = vst [vmem:[%s1782_s3 + $0x60] sm:$0xff] %v1009_v18  }

// kernel: _lambda_.23
= control target key start
LH: loop header
LB: loop body
LE: loop exit
PB: predicated region body
PF: predicated region fallthrough
CT: control target
= control target key end

     0   :  { %v466_v0 = vmov 0.0   ;;  %vm467_vm0 = vmmov 0   ;;  %s564_s1 = inlined_call_operand.vmem [shape: bf16[128,128], index: 1, kind: input, shape index: {}]   ;;  %s565_s0 = inlined_call_operand.vmem [shape: bf16[104,128], index: 0, kind: input, shape index: {}]   ;;  %s566_s2 = inlined_call_operand.vmem [shape: f32[1,128], index: 2, kind: input, shape index: {}]   ;;  %s567_s3 = inlined_call_operand.vmem [shape: bf16[104,128], index: 3, kind: output, shape index: {}]  }
   0x1   :  { %389 = vmatprep.subr.bf16.mxu0 %v466_v0  ;;  %v451_v1 = vld [vmem:[%s564_s1] sm:$0xff]   ;;  %433 = vmatprep.subr.bf16.mxu1 %v466_v0  ;;  %v452_v2 = vld [vmem:[%s564_s1 + $0x8] sm:$0xff]   ;;  %v453_v3 = vld [vmem:[%s564_s1 + $0x10] sm:$0xff]  }
   0x2   :  { %405 = vmatprep.mubr.msk.bf16.mxu0 %vm467_vm0, %v466_v0  ;;  %421 = vmatprep.mubr.msk.bf16.mxu1 %vm467_vm0, %v466_v0  ;;  %v454_v4 = vld [vmem:[%s564_s1 + $0x18] sm:$0xff]   ;;  %v455_v5 = vld [vmem:[%s564_s1 + $0x20] sm:$0xff]   ;;  %v456_v6 = vld [vmem:[%s564_s1 + $0x28] sm:$0xff]  }
   0x3   :  { %390 = vmatpush3.bf16.msra.mxu0 %v451_v1  ;;  %441 = vmatpush3.bf16.msra.mxu1 %v451_v1  ;;  %v457_v7 = vld [vmem:[%s564_s1 + $0x30] sm:$0xff]   ;;  %v458_v8 = vld [vmem:[%s564_s1 + $0x38] sm:$0xff]   ;;  %v459_v9 = vld [vmem:[%s565_s0] sm:$0xff]  }
   0x4   :  { %391 = vmatprep.subr.bf16.mxu0 %v466_v0  ;;  %434 = vmatprep.subr.bf16.mxu1 %v466_v0  ;;  %v460_v10 = vld [vmem:[%s565_s0 + $0x20] sm:$0xff]   ;;  %v461_v11 = vld [vmem:[%s565_s0 + $0x8] sm:$0xff]   ;;  %v463_v13 = vld [vmem:[%s565_s0 + $0x10] sm:$0xff]  }
   0x5   :  { %v462_v12 = vld [vmem:[%s565_s0 + $0x28] sm:$0xff]   ;;  %v464_v14 = vld [vmem:[%s565_s0 + $0x30] ss:$0 sps:$4 sm:$0xff]   ;;  %v465_v15 = vld [vmem:[%s565_s0 + $0x18] sm:$0xff]  }
   0x6   :  { %v297_v16 = vld [vmem:[%s566_s2] ss:$0 sm:$0xff] }
   0x7   :  { %392 = vmatpush3.bf16.msra.mxu0 %v452_v2  ;;  %442 = vmatpush3.bf16.msra.mxu1 %v452_v2 }
   0x8   :  { %393 = vmatprep.subr.bf16.mxu0 %v466_v0  ;;  %435 = vmatprep.subr.bf16.mxu1 %v466_v0 }
   0xb   :  { %394 = vmatpush3.bf16.msra.mxu0 %v453_v3  ;;  %443 = vmatpush3.bf16.msra.mxu1 %v453_v3 }
   0xc   :  { %395 = vmatprep.subr.bf16.mxu0 %v466_v0  ;;  %436 = vmatprep.subr.bf16.mxu1 %v466_v0 }
   0xf   :  { %396 = vmatpush3.bf16.msra.mxu0 %v454_v4  ;;  %444 = vmatpush3.bf16.msra.mxu1 %v454_v4 }
  0x10   :  { %397 = vmatprep.subr.bf16.mxu0 %v466_v0  ;;  %437 = vmatprep.subr.bf16.mxu1 %v466_v0 }
  0x13   :  { %398 = vmatpush3.bf16.msra.mxu0 %v455_v5  ;;  %445 = vmatpush3.bf16.msra.mxu1 %v455_v5 }
  0x14   :  { %399 = vmatprep.subr.bf16.mxu0 %v466_v0  ;;  %438 = vmatprep.subr.bf16.mxu1 %v466_v0 }
  0x17   :  { %400 = vmatpush3.bf16.msra.mxu0 %v456_v6  ;;  %446 = vmatpush3.bf16.msra.mxu1 %v456_v6 }
  0x18   :  { %401 = vmatprep.subr.bf16.mxu0 %v466_v0  ;;  %439 = vmatprep.subr.bf16.mxu1 %v466_v0 }
  0x1b   :  { %402 = vmatpush3.bf16.msra.mxu0 %v457_v7  ;;  %447 = vmatpush3.bf16.msra.mxu1 %v457_v7 }
  0x1c   :  { %403 = vmatprep.subr.bf16.mxu0 %v466_v0  ;;  %440 = vmatprep.subr.bf16.mxu1 %v466_v0 }
  0x1f   :  { %404 = vmatpush3.bf16.msra.mxu0 %v458_v8  ;;  %448 = vmatpush3.bf16.msra.mxu1 %v458_v8 }
  0x22   :  { %406 = vmatmul.mubr.bf16.vlgmr.msra.gmra.mrb[0].mxu0 %v459_v9  ;;  %422 = vmatmul.mubr.bf16.vlgmr.msra.gmra.mrb[0].mxu1 %v460_v10 }
  0x23   :  { %409 = vmatprep.mubr.msk.bf16.mxu0 %vm467_vm0, %v466_v0  ;;  %425 = vmatprep.mubr.msk.bf16.mxu1 %vm467_vm0, %v466_v0 }
  0x2a   :  { %410 = vmatmul.mubr.bf16.gmra.mrb[4].mxu0 %v461_v11  ;;  %426 = vmatmul.mubr.bf16.gmra.mrb[4].mxu1 %v462_v12 }
  0x2b   :  { %413 = vmatprep.mubr.msk.bf16.mxu0 %vm467_vm0, %v466_v0  ;;  %429 = vmatprep.mubr.msk.bf16.mxu1 %vm467_vm0, %v466_v0 }
  0x32   :  { %414 = vmatmul.mubr.bf16.gmra.mrb[8].mxu0 %v463_v13  ;;  %430 = vmatmul.mubr.bf16.gmra.mrb[8].mxu1 %v464_v14 }
  0x33   :  { %417 = vmatprep.mubr.msk.bf16.mxu0 %vm467_vm0, %v466_v0 }
  0x3a   :  { %418 = vmatmul.mubr.bf16.gmra.mrb[12].mxu0 %v465_v15 }
  0xf5   :  { %v173_v17 = vpop.f32.mrb[0].mxu0  ;;  %v205_v18 = vpop.f32.mrb[0].mxu1 }
  0xf6   :  { %v407_v19 = vpop.f32.mrb[1].mxu0  ;;  %v206_v20 = vadd.f32 %v297_v16, %v205_v18  ;;  %v423_v21 = vpop.f32.mrb[1].mxu1  ;;  %v174_v24 = vadd.f32 %v297_v16, %v173_v17 }
  0xf7   :  { %v176_v22 = vpop.f32.mrb[2].mxu0  ;;  %v208_v23 = vpop.f32.mrb[2].mxu1 }
  0xf8   :  { %v177_v25 = vadd.f32 %v297_v16, %v176_v22  ;;  %v408_v26 = vpop.f32.mrb[3].mxu0  ;;  %v209_v27 = vadd.f32 %v297_v16, %v208_v23  ;;  %v424_v28 = vpop.f32.mrb[3].mxu1 }
  0xfa   :  { %v342_v29 = vpack.c.bf16 %v177_v25, %v174_v24  ;;  %v362_v30 = vpack.c.bf16 %v209_v27, %v206_v20 }
  0xfc   :  { %343 = vst [vmem:[%s567_s3] sm:$0xff] %v342_v29   ;;  %372 = vst [vmem:[%s567_s3 + $0x20] sm:$0xff] %v362_v30  }
  0xfd   :  { %v181_v31 = vpop.f32.mrb[4].mxu0  ;;  %v213_v32 = vpop.f32.mrb[4].mxu1 }
  0xfe   :  { %v411_v33 = vpop.f32.mrb[5].mxu0  ;;  %v214_v34 = vadd.f32 %v297_v16, %v213_v32  ;;  %v427_v35 = vpop.f32.mrb[5].mxu1  ;;  %v182_v38 = vadd.f32 %v297_v16, %v181_v31 }
  0xff   :  { %v184_v36 = vpop.f32.mrb[6].mxu0  ;;  %v216_v37 = vpop.f32.mrb[6].mxu1 }
 0x100   :  { %v185_v39 = vadd.f32 %v297_v16, %v184_v36  ;;  %v412_v40 = vpop.f32.mrb[7].mxu0  ;;  %v217_v41 = vadd.f32 %v297_v16, %v216_v37  ;;  %v428_v42 = vpop.f32.mrb[7].mxu1 }
 0x102   :  { %v347_v43 = vpack.c.bf16 %v185_v39, %v182_v38  ;;  %v367_v44 = vpack.c.bf16 %v217_v41, %v214_v34 }
 0x104   :  { %369 = vst [vmem:[%s567_s3 + $0x8] sm:$0xff] %v347_v43   ;;  %373 = vst [vmem:[%s567_s3 + $0x28] sm:$0xff] %v367_v44  }
 0x105   :  { %v189_v45 = vpop.f32.mrb[8].mxu0  ;;  %v221_v46 = vpop.f32.mrb[8].mxu1 }
 0x106   :  { %v415_v47 = vpop.f32.mrb[9].mxu0  ;;  %v222_v48 = vadd.f32 %v297_v16, %v221_v46  ;;  %v431_v49 = vpop.f32.mrb[9].mxu1  ;;  %v190_v52 = vadd.f32 %v297_v16, %v189_v45 }
 0x107   :  { %v192_v50 = vpop.f32.mrb[10].mxu0  ;;  %v224_v51 = vpop.f32.mrb[10].mxu1 }
 0x108   :  { %v193_v53 = vadd.f32 %v297_v16, %v192_v50  ;;  %v416_v54 = vpop.f32.mrb[11].mxu0  ;;  %v338_v55 = vpack.c.bf16 %v222_v48, %v222_v48  ;;  %v432_v56 = vpop.f32.mrb[11].mxu1 }
 0x10a   :  { %v352_v57 = vpack.c.bf16 %v193_v53, %v190_v52  ;;  %292 = vst [vmem:[%s567_s3 + $0x30] sm:$0xf] %v338_v55 }
 0x10c   :  { %370 = vst [vmem:[%s567_s3 + $0x10] sm:$0xff] %v352_v57  }
 0x10d   :  { %v197_v58 = vpop.f32.mrb[12].mxu0 }
 0x10e   :  { %v419_v59 = vpop.f32.mrb[13].mxu0  ;;  %v198_v61 = vadd.f32 %v297_v16, %v197_v58 }
 0x10f   :  { %v200_v60 = vpop.f32.mrb[14].mxu0 }
 0x110   :  { %v201_v62 = vadd.f32 %v297_v16, %v200_v60  ;;  %v420_v63 = vpop.f32.mrb[15].mxu0 }
 0x112   :  { %v357_v0 = vpack.c.bf16 %v201_v62, %v198_v61 }
 0x114   :  { %371 = vst [vmem:[%s567_s3 + $0x18] sm:$0xff] %v357_v0  }

// kernel: _lambda_.25
= control target key start
LH: loop header
LB: loop body
LE: loop exit
PB: predicated region body
PF: predicated region fallthrough
CT: control target
= control target key end

     0   :  { %v544_v0 = vmov 0.0   ;;  %vm545_vm0 = vmmov 0   ;;  %v546_v12 = vmov 0   ;;  %s725_s1 = inlined_call_operand.vmem [shape: bf16[128,128], index: 1, kind: input, shape index: {}]   ;;  %s726_s0 = inlined_call_operand.vmem [shape: bf16[104,128], index: 0, kind: input, shape index: {}]   ;;  %s727_s3 = inlined_call_operand.vmem [shape: bf16[104,128], index: 3, kind: input, shape index: {}]   ;;  %s728_s2 = inlined_call_operand.vmem [shape: f32[1,128], index: 2, kind: input, shape index: {}]   ;;  %s729_s4 = inlined_call_operand.vmem [shape: bf16[104,128], index: 4, kind: output, shape index: {}]  }
   0x1   :  { %473 = vmatprep.subr.bf16.mxu0 %v544_v0  ;;  %v536_v1 = vld [vmem:[%s725_s1] sm:$0xff]   ;;  %517 = vmatprep.subr.bf16.mxu1 %v544_v0  ;;  %v537_v2 = vld [vmem:[%s725_s1 + $0x8] sm:$0xff]   ;;  %v538_v3 = vld [vmem:[%s725_s1 + $0x10] sm:$0xff]  }
   0x2   :  { %489 = vmatprep.mubr.msk.bf16.mxu0 %vm545_vm0, %v544_v0  ;;  %505 = vmatprep.mubr.msk.bf16.mxu1 %vm545_vm0, %v544_v0  ;;  %v539_v4 = vld [vmem:[%s725_s1 + $0x18] sm:$0xff]   ;;  %v540_v5 = vld [vmem:[%s725_s1 + $0x20] sm:$0xff]   ;;  %v541_v6 = vld [vmem:[%s725_s1 + $0x28] sm:$0xff]  }
   0x3   :  { %474 = vmatpush3.bf16.msra.mxu0 %v536_v1  ;;  %525 = vmatpush3.bf16.msra.mxu1 %v536_v1  ;;  %v542_v7 = vld [vmem:[%s725_s1 + $0x30] sm:$0xff]   ;;  %v18_v8 = vld [vmem:[%s726_s0] sm:$0xf]  ;;  %v19_v9 = vld [vmem:[%s726_s0 + $0x4] sm:$0xf] }
   0x4   :  { %475 = vmatprep.subr.bf16.mxu0 %v544_v0  ;;  %518 = vmatprep.subr.bf16.mxu1 %v544_v0  ;;  %v26_v10 = vld [vmem:[%s726_s0 + $0x20] sm:$0xf]  ;;  %v27_v11 = vld [vmem:[%s726_s0 + $0x24] sm:$0xf]  ;;  %v31_v13 = vmax.bf16 %v546_v12, %v18_v8  ;;  %v32_v14 = vmax.bf16 %v546_v12, %v19_v9  ;;  %v543_v17 = vld [vmem:[%s725_s1 + $0x38] sm:$0xff]  }
   0x5   :  { %v39_v15 = vmax.bf16 %v546_v12, %v26_v10  ;;  %v40_v16 = vmax.bf16 %v546_v12, %v27_v11  ;;  %v20_v20 = vld [vmem:[%s726_s0 + $0x8] sm:$0xf]  ;;  %v21_v21 = vld [vmem:[%s726_s0 + $0xc] sm:$0xf]  ;;  %v22_v30 = vld [vmem:[%s726_s0 + $0x10] sm:$0xf] }
   0x6   :  { %v353_v18 = vcombine.low %v31_v13, %v32_v14  ;;  %v28_v22 = vld [vmem:[%s726_s0 + $0x28] sm:$0xf]  ;;  %v29_v23 = vld [vmem:[%s726_s0 + $0x2c] sm:$0xf]  ;;  %v33_v24 = vmax.bf16 %v546_v12, %v20_v20  ;;  %v34_v25 = vmax.bf16 %v546_v12, %v21_v21  ;;  %v23_v31 = vld [vmem:[%s726_s0 + $0x14] sm:$0xf]  ;;  %v35_v33 = vmax.bf16 %v546_v12, %v22_v30 }
   0x7   :  { %476 = vmatpush3.bf16.msra.mxu0 %v537_v2  ;;  %526 = vmatpush3.bf16.msra.mxu1 %v537_v2  ;;  %v357_v19 = vcombine.low %v39_v15, %v40_v16  ;;  %v41_v26 = vmax.bf16 %v546_v12, %v28_v22  ;;  %v42_v27 = vmax.bf16 %v546_v12, %v29_v23  ;;  %v30_v32 = vld [vmem:[%s726_s0 + $0x30] sm:$0xf]  ;;  %v24_v38 = vld [vmem:[%s726_s0 + $0x18] sm:$0xf]  ;;  %v25_v39 = vld [vmem:[%s726_s0 + $0x1c] sm:$0xf] }
   0x8   :  { %477 = vmatprep.subr.bf16.mxu0 %v544_v0  ;;  %519 = vmatprep.subr.bf16.mxu1 %v544_v0  ;;  %v354_v28 = vcombine.low %v33_v24, %v34_v25  ;;  %v36_v34 = vmax.bf16 %v546_v12, %v23_v31  ;;  %v43_v35 = vmax.bf16 %v546_v12, %v30_v32  ;;  %v451_v43 = vld [vmem:[%s727_s3 + $0x20] sm:$0xff]   ;;  %v452_v63 = vld [vmem:[%s727_s3 + $0x28] sm:$0xff]   ;;  %v255_v23 = vld [vmem:[%s727_s3 + $0x30] sm:$0xf] }
   0x9   :  { %v358_v29 = vcombine.low %v41_v26, %v42_v27  ;;  %v37_v40 = vmax.bf16 %v546_v12, %v24_v38  ;;  %v38_v41 = vmax.bf16 %v546_v12, %v25_v39  ;;  %v395_v44 = vld [vmem:[%s727_s3] sm:$0xff]   ;;  %v412_v46 = vunpack.c.l.bf16 %v451_v43  ;;  %v448_v2 = vld [vmem:[%s727_s3 + $0x8] sm:$0xff]   ;;  %v449_v27 = vld [vmem:[%s727_s3 + $0x10] sm:$0xff]  }
   0xa   :  { %v355_v36 = vcombine.low %v35_v33, %v36_v34  ;;  %v359_v37 = vcombine.low %v43_v35, %v43_v35  ;;  %v674_v45 = vld [vmem:[%s728_s2] ss:$0 sm:$0xff]  ;;  %v396_v48 = vunpack.c.l.bf16 %v395_v44  ;;  %v397_v52 = vunpack.c.h.bf16 %v395_v44 }
   0xb   :  { %478 = vmatpush3.bf16.msra.mxu0 %v538_v3  ;;  %527 = vmatpush3.bf16.msra.mxu1 %v538_v3  ;;  %v356_v42 = vcombine.low %v37_v40, %v38_v41  ;;  %v413_v55 = vunpack.c.h.bf16 %v451_v43  ;;  %v400_v8 = vunpack.c.l.bf16 %v448_v2  ;;  %v401_v12 = vunpack.c.h.bf16 %v448_v2 }
   0xc   :  { %479 = vmatprep.subr.bf16.mxu0 %v544_v0  ;;  %520 = vmatprep.subr.bf16.mxu1 %v544_v0  ;;  %v417_v15 = vunpack.c.h.bf16 %v452_v63  ;;  %v268_v30 = vunpack.c.l.bf16 %v255_v23  ;;  %v404_v34 = vunpack.c.l.bf16 %v449_v27 }
   0xf   :  { %480 = vmatpush3.bf16.msra.mxu0 %v539_v4  ;;  %528 = vmatpush3.bf16.msra.mxu1 %v539_v4 }
  0x10   :  { %481 = vmatprep.subr.bf16.mxu0 %v544_v0  ;;  %521 = vmatprep.subr.bf16.mxu1 %v544_v0 }
  0x13   :  { %482 = vmatpush3.bf16.msra.mxu0 %v540_v5  ;;  %529 = vmatpush3.bf16.msra.mxu1 %v540_v5 }
  0x14   :  { %483 = vmatprep.subr.bf16.mxu0 %v544_v0  ;;  %522 = vmatprep.subr.bf16.mxu1 %v544_v0 }
  0x17   :  { %484 = vmatpush3.bf16.msra.mxu0 %v541_v6  ;;  %530 = vmatpush3.bf16.msra.mxu1 %v541_v6  ;;  %v416_v6 = vunpack.c.l.bf16 %v452_v63 }
  0x18   :  { %485 = vmatprep.subr.bf16.mxu0 %v544_v0  ;;  %523 = vmatprep.subr.bf16.mxu1 %v544_v0 }
  0x1b   :  { %486 = vmatpush3.bf16.msra.mxu0 %v542_v7  ;;  %531 = vmatpush3.bf16.msra.mxu1 %v542_v7 }
  0x1c   :  { %487 = vmatprep.subr.bf16.mxu0 %v544_v0  ;;  %524 = vmatprep.subr.bf16.mxu1 %v544_v0 }
  0x1f   :  { %488 = vmatpush3.bf16.msra.mxu0 %v543_v17  ;;  %532 = vmatpush3.bf16.msra.mxu1 %v543_v17 }
  0x22   :  { %490 = vmatmul.mubr.bf16.vlgmr.msra.gmra.mrb[0].mxu0 %v353_v18  ;;  %506 = vmatmul.mubr.bf16.vlgmr.msra.gmra.mrb[0].mxu1 %v357_v19 }
  0x23   :  { %493 = vmatprep.mubr.msk.bf16.mxu0 %vm545_vm0, %v544_v0  ;;  %509 = vmatprep.mubr.msk.bf16.mxu1 %vm545_vm0, %v544_v0 }
  0x2a   :  { %494 = vmatmul.mubr.bf16.gmra.mrb[4].mxu0 %v354_v28  ;;  %510 = vmatmul.mubr.bf16.gmra.mrb[4].mxu1 %v358_v29 }
  0x2b   :  { %497 = vmatprep.mubr.msk.bf16.mxu0 %vm545_vm0, %v544_v0  ;;  %513 = vmatprep.mubr.msk.bf16.mxu1 %vm545_vm0, %v544_v0 }
  0x32   :  { %498 = vmatmul.mubr.bf16.gmra.mrb[8].mxu0 %v355_v36  ;;  %514 = vmatmul.mubr.bf16.gmra.mrb[8].mxu1 %v359_v37  ;;  %v405_v36 = vunpack.c.h.bf16 %v449_v27 }
  0x33   :  { %501 = vmatprep.mubr.msk.bf16.mxu0 %vm545_vm0, %v544_v0 }
  0x3a   :  { %502 = vmatmul.mubr.bf16.gmra.mrb[12].mxu0 %v356_v42 }
  0xf5   :  { %v189_v47 = vpop.f32.mrb[0].mxu0  ;;  %v221_v49 = vpop.f32.mrb[0].mxu1 }
  0xf6   :  { %v190_v50 = vadd.f32 %v674_v45, %v189_v47  ;;  %v491_v51 = vpop.f32.mrb[1].mxu0  ;;  %v222_v53 = vadd.f32 %v674_v45, %v221_v49  ;;  %v507_v54 = vpop.f32.mrb[1].mxu1  ;;  %v450_v49 = vld [vmem:[%s727_s3 + $0x18] sm:$0xff]  }
  0xf7   :  { %v192_v56 = vpop.f32.mrb[2].mxu0  ;;  %v224_v57 = vpop.f32.mrb[2].mxu1 }
  0xf8   :  { %v193_v58 = vadd.f32 %v674_v45, %v192_v56  ;;  %v492_v59 = vpop.f32.mrb[3].mxu0  ;;  %v277_v60 = vadd.f32 %v412_v46, %v222_v53  ;;  %v225_v61 = vadd.f32 %v674_v45, %v224_v57  ;;  %v508_v62 = vpop.f32.mrb[3].mxu1  ;;  %v269_v0 = vadd.f32 %v396_v48, %v190_v50 }
  0xf9   :  { %v408_v53 = vunpack.c.l.bf16 %v450_v49 }
  0xfa   :  { %v270_v1 = vadd.f32 %v397_v52, %v193_v58  ;;  %v278_v3 = vadd.f32 %v413_v55, %v225_v61  ;;  %v409_v55 = vunpack.c.h.bf16 %v450_v49 }
  0xfc   :  { %v421_v4 = vpack.c.bf16 %v270_v1, %v269_v0  ;;  %v441_v5 = vpack.c.bf16 %v278_v3, %v277_v60 }
  0xfd   :  { %v197_v7 = vpop.f32.mrb[4].mxu0  ;;  %v229_v9 = vpop.f32.mrb[4].mxu1 }
  0xfe   :  { %422 = vst [vmem:[%s729_s4] sm:$0xff] %v421_v4   ;;  %v198_v10 = vadd.f32 %v674_v45, %v197_v7  ;;  %v495_v11 = vpop.f32.mrb[5].mxu0  ;;  %456 = vst [vmem:[%s729_s4 + $0x20] sm:$0xff] %v441_v5   ;;  %v230_v13 = vadd.f32 %v674_v45, %v229_v9  ;;  %v511_v14 = vpop.f32.mrb[5].mxu1 }
  0xff   :  { %v200_v16 = vpop.f32.mrb[6].mxu0  ;;  %v232_v17 = vpop.f32.mrb[6].mxu1 }
 0x100   :  { %v201_v18 = vadd.f32 %v674_v45, %v200_v16  ;;  %v496_v19 = vpop.f32.mrb[7].mxu0  ;;  %v279_v20 = vadd.f32 %v416_v6, %v230_v13  ;;  %v233_v21 = vadd.f32 %v674_v45, %v232_v17  ;;  %v512_v22 = vpop.f32.mrb[7].mxu1  ;;  %v271_v24 = vadd.f32 %v400_v8, %v198_v10 }
 0x102   :  { %v272_v25 = vadd.f32 %v401_v12, %v201_v18  ;;  %v280_v26 = vadd.f32 %v417_v15, %v233_v21 }
 0x104   :  { %v426_v28 = vpack.c.bf16 %v272_v25, %v271_v24  ;;  %v446_v29 = vpack.c.bf16 %v280_v26, %v279_v20 }
 0x105   :  { %v205_v31 = vpop.f32.mrb[8].mxu0  ;;  %v237_v32 = vpop.f32.mrb[8].mxu1 }
 0x106   :  { %453 = vst [vmem:[%s729_s4 + $0x8] sm:$0xff] %v426_v28   ;;  %v206_v33 = vadd.f32 %v674_v45, %v205_v31  ;;  %v499_v35 = vpop.f32.mrb[9].mxu0  ;;  %457 = vst [vmem:[%s729_s4 + $0x28] sm:$0xff] %v446_v29   ;;  %v238_v37 = vadd.f32 %v674_v45, %v237_v32  ;;  %v515_v38 = vpop.f32.mrb[9].mxu1 }
 0x107   :  { %v208_v39 = vpop.f32.mrb[10].mxu0  ;;  %v240_v40 = vpop.f32.mrb[10].mxu1 }
 0x108   :  { %v209_v41 = vadd.f32 %v674_v45, %v208_v39  ;;  %v500_v42 = vpop.f32.mrb[11].mxu0  ;;  %v281_v43 = vadd.f32 %v268_v30, %v238_v37  ;;  %v516_v44 = vpop.f32.mrb[11].mxu1  ;;  %v273_v46 = vadd.f32 %v404_v34, %v206_v33 }
 0x10a   :  { %v274_v47 = vadd.f32 %v405_v36, %v209_v41  ;;  %v393_v48 = vpack.c.bf16 %v281_v43, %v281_v43 }
 0x10c   :  { %v431_v50 = vpack.c.bf16 %v274_v47, %v273_v46  ;;  %347 = vst [vmem:[%s729_s4 + $0x30] sm:$0xf] %v393_v48 }
 0x10d   :  { %v213_v51 = vpop.f32.mrb[12].mxu0 }
 0x10e   :  { %454 = vst [vmem:[%s729_s4 + $0x10] sm:$0xff] %v431_v50   ;;  %v214_v52 = vadd.f32 %v674_v45, %v213_v51  ;;  %v503_v54 = vpop.f32.mrb[13].mxu0 }
 0x10f   :  { %v216_v56 = vpop.f32.mrb[14].mxu0 }
 0x110   :  { %v217_v57 = vadd.f32 %v674_v45, %v216_v56  ;;  %v504_v58 = vpop.f32.mrb[15].mxu0  ;;  %v275_v59 = vadd.f32 %v408_v53, %v214_v52 }
 0x112   :  { %v276_v60 = vadd.f32 %v409_v55, %v217_v57 }
 0x114   :  { %v436_v61 = vpack.c.bf16 %v276_v60, %v275_v59 }
 0x116   :  { %455 = vst [vmem:[%s729_s4 + $0x18] sm:$0xff] %v436_v61  }

// kernel: _lambda_.26
= control target key start
LH: loop header
LB: loop body
LE: loop exit
PB: predicated region body
PF: predicated region fallthrough
CT: control target
= control target key end

     0   :  { %v584_v14 = vmov 0   ;;  %s716_s1 = inlined_call_operand.vmem [shape: bf16[256,128], index: 1, kind: input, shape index: {}]   ;;  %s717_s0 = inlined_call_operand.vmem [shape: bf16[104,256], index: 0, kind: input, shape index: {}]   ;;  %s718_s2 = inlined_call_operand.vmem [shape: f32[1,128], index: 2, kind: input, shape index: {}]   ;;  %s719_s3 = inlined_call_operand.vmem [shape: bf16[104,128], index: 3, kind: output, shape index: {}]  }
   0x1   :  { %v568_v0 = vld [vmem:[%s716_s1 + $0x40] sm:$0xff]   ;;  %v570_v2 = vld [vmem:[%s716_s1 + $0x48] sm:$0xff]   ;;  %v572_v4 = vld [vmem:[%s716_s1 + $0x50] sm:$0xff]  }
   0x2   :  { %v569_v1 = vld [vmem:[%s716_s1] sm:$0xff]   ;;  %493 = vmatprep.subr.bf16.mxu0 %v568_v0  ;;  %551 = vmatprep.subr.bf16.mxu1 %v568_v0  ;;  %v571_v3 = vld [vmem:[%s716_s1 + $0x8] sm:$0xff]   ;;  %v573_v5 = vld [vmem:[%s716_s1 + $0x10] sm:$0xff]  }
   0x3   :  { %494 = vmatpush3.bf16.msra.mxu0 %v569_v1  ;;  %559 = vmatpush3.bf16.msra.mxu1 %v569_v1  ;;  %v574_v6 = vld [vmem:[%s716_s1 + $0x58] sm:$0xff]   ;;  %v576_v8 = vld [vmem:[%s716_s1 + $0x60] sm:$0xff]   ;;  %v578_v10 = vld [vmem:[%s716_s1 + $0x68] sm:$0xff]  }
   0x4   :  { %495 = vmatprep.subr.bf16.mxu0 %v570_v2  ;;  %552 = vmatprep.subr.bf16.mxu1 %v570_v2  ;;  %v575_v7 = vld [vmem:[%s716_s1 + $0x18] sm:$0xff]   ;;  %v577_v9 = vld [vmem:[%s716_s1 + $0x20] sm:$0xff]   ;;  %v16_v12 = vld [vmem:[%s717_s0 + $0x8] sm:$0xff] }
   0x5   :  { %v15_v11 = vld [vmem:[%s717_s0] sm:$0xff]  ;;  %v29_v16 = vmax.bf16 %v584_v14, %v16_v12  ;;  %v24_v17 = vld [vmem:[%s717_s0 + $0x48] sm:$0xff]  ;;  %v580_v22 = vld [vmem:[%s716_s1 + $0x70] sm:$0xff]  }
   0x6   :  { %v23_v13 = vld [vmem:[%s717_s0 + $0x40] sm:$0xff]  ;;  %v28_v15 = vmax.bf16 %v584_v14, %v15_v11  ;;  %v37_v19 = vmax.bf16 %v584_v14, %v24_v17  ;;  %v579_v20 = vld [vmem:[%s716_s1 + $0x28] sm:$0xff]   ;;  %v581_v24 = vld [vmem:[%s716_s1 + $0x30] sm:$0xff]  }
   0x7   :  { %496 = vmatpush3.bf16.msra.mxu0 %v571_v3  ;;  %560 = vmatpush3.bf16.msra.mxu1 %v571_v3  ;;  %v36_v18 = vmax.bf16 %v584_v14, %v23_v13  ;;  %v582_v25 = vld [vmem:[%s716_s1 + $0x78] sm:$0xff]   ;;  %v17_v26 = vld [vmem:[%s717_s0 + $0x10] sm:$0xff]  ;;  %v19_v39 = vld [vmem:[%s717_s0 + $0x20] sm:$0xff] }
   0x8   :  { %497 = vmatprep.subr.bf16.mxu0 %v572_v4  ;;  %553 = vmatprep.subr.bf16.mxu1 %v572_v4  ;;  %v403_v21 = vcombine.high %v28_v15, %v29_v16  ;;  %v18_v27 = vld [vmem:[%s717_s0 + $0x18] sm:$0xff]  ;;  %v25_v28 = vld [vmem:[%s717_s0 + $0x50] sm:$0xff]  ;;  %v30_v30 = vmax.bf16 %v584_v14, %v17_v26  ;;  %v402_v35 = vcombine.low %v28_v15, %v29_v16  ;;  %v20_v40 = vld [vmem:[%s717_s0 + $0x28] sm:$0xff] }
   0x9   :  { %v411_v23 = vcombine.high %v36_v18, %v37_v19  ;;  %v26_v29 = vld [vmem:[%s717_s0 + $0x58] sm:$0xff]  ;;  %v31_v32 = vmax.bf16 %v584_v14, %v18_v27  ;;  %v38_v33 = vmax.bf16 %v584_v14, %v25_v28  ;;  %v410_v36 = vcombine.low %v36_v18, %v37_v19  ;;  %v27_v41 = vld [vmem:[%s717_s0 + $0x60] sm:$0xff]  ;;  %v21_v49 = vld [vmem:[%s717_s0 + $0x30] sm:$0xff] }
   0xa   :  { %275 = vmatprep.mubr.bf16.mxu0 %v403_v21  ;;  %v583_v31 = vld [vmem:[%s716_s1 + $0x38] sm:$0xff]   ;;  %v39_v34 = vmax.bf16 %v584_v14, %v26_v29  ;;  %v32_v42 = vmax.bf16 %v584_v14, %v19_v39  ;;  %v33_v43 = vmax.bf16 %v584_v14, %v20_v40  ;;  %v40_v44 = vmax.bf16 %v584_v14, %v27_v41  ;;  %v401_v1 = vld [vmem:[%s718_s2] ss:$0 sm:$0xff] }
   0xb   :  { %498 = vmatpush3.bf16.msra.mxu0 %v573_v5  ;;  %561 = vmatpush3.bf16.msra.mxu1 %v573_v5  ;;  %v405_v37 = vcombine.high %v30_v30, %v31_v32  ;;  %v404_v45 = vcombine.low %v30_v30, %v31_v32  ;;  %v22_v50 = vld [vmem:[%s717_s0 + $0x38] sm:$0xff]  ;;  %v34_v51 = vmax.bf16 %v584_v14, %v21_v49 }
   0xc   :  { %499 = vmatprep.subr.bf16.mxu0 %v574_v6  ;;  %554 = vmatprep.subr.bf16.mxu1 %v574_v6  ;;  %v413_v38 = vcombine.high %v38_v33, %v39_v34  ;;  %v412_v46 = vcombine.low %v38_v33, %v39_v34  ;;  %v407_v47 = vcombine.high %v32_v42, %v33_v43 }
   0xd   :  { %307 = vmatprep.mubr.bf16.mxu1 %v411_v23  ;;  %v415_v48 = vcombine.high %v40_v44, %v40_v44  ;;  %v35_v52 = vmax.bf16 %v584_v14, %v22_v50  ;;  %v406_v53 = vcombine.low %v32_v42, %v33_v43  ;;  %v414_v54 = vcombine.low %v40_v44, %v40_v44 }
   0xf   :  { %500 = vmatpush3.bf16.msra.mxu0 %v575_v7  ;;  %562 = vmatpush3.bf16.msra.mxu1 %v575_v7  ;;  %v409_v55 = vcombine.high %v34_v51, %v35_v52  ;;  %v408_v56 = vcombine.low %v34_v51, %v35_v52 }
  0x10   :  { %501 = vmatprep.subr.bf16.mxu0 %v576_v8  ;;  %555 = vmatprep.subr.bf16.mxu1 %v576_v8 }
  0x13   :  { %502 = vmatpush3.bf16.msra.mxu0 %v577_v9  ;;  %563 = vmatpush3.bf16.msra.mxu1 %v577_v9 }
  0x14   :  { %503 = vmatprep.subr.bf16.mxu0 %v578_v10  ;;  %556 = vmatprep.subr.bf16.mxu1 %v578_v10 }
  0x17   :  { %504 = vmatpush3.bf16.msra.mxu0 %v579_v20  ;;  %564 = vmatpush3.bf16.msra.mxu1 %v579_v20 }
  0x18   :  { %505 = vmatprep.subr.bf16.mxu0 %v580_v22  ;;  %557 = vmatprep.subr.bf16.mxu1 %v580_v22 }
  0x1b   :  { %506 = vmatpush3.bf16.msra.mxu0 %v581_v24  ;;  %565 = vmatpush3.bf16.msra.mxu1 %v581_v24 }
  0x1c   :  { %507 = vmatprep.subr.bf16.mxu0 %v582_v25  ;;  %558 = vmatprep.subr.bf16.mxu1 %v582_v25 }
  0x1f   :  { %508 = vmatpush3.bf16.msra.mxu0 %v583_v31  ;;  %566 = vmatpush3.bf16.msra.mxu1 %v583_v31 }
  0x22   :  { %276 = vmatmul.mubr.bf16.vlgmr.msra.gmra.mrb[0].mxu0 %v402_v35  ;;  %308 = vmatmul.mubr.bf16.vlgmr.msra.gmra.mrb[0].mxu1 %v410_v36 }
  0x23   :  { %283 = vmatprep.mubr.bf16.mxu0 %v405_v37  ;;  %315 = vmatprep.mubr.bf16.mxu1 %v413_v38 }
  0x2a   :  { %284 = vmatmul.mubr.bf16.gmra.mrb[4].mxu0 %v404_v45  ;;  %316 = vmatmul.mubr.bf16.gmra.mrb[4].mxu1 %v412_v46 }
  0x2b   :  { %291 = vmatprep.mubr.bf16.mxu0 %v407_v47  ;;  %323 = vmatprep.mubr.bf16.mxu1 %v415_v48 }
  0x32   :  { %292 = vmatmul.mubr.bf16.gmra.mrb[8].mxu0 %v406_v53  ;;  %324 = vmatmul.mubr.bf16.gmra.mrb[8].mxu1 %v414_v54 }
  0x33   :  { %299 = vmatprep.mubr.bf16.mxu0 %v409_v55 }
  0x3a   :  { %300 = vmatmul.mubr.bf16.gmra.mrb[12].mxu0 %v408_v56 }
  0xf5   :  { %v509_v57 = vpop.f32.mrb[0].mxu0  ;;  %v533_v58 = vpop.f32.mrb[0].mxu1 }
  0xf6   :  { %v510_v59 = vpop.f32.mrb[1].mxu0  ;;  %v534_v60 = vpop.f32.mrb[1].mxu1 }
  0xf7   :  { %v511_v61 = vadd.f32 %v510_v59, %v509_v57  ;;  %v512_v62 = vpop.f32.mrb[2].mxu0  ;;  %v535_v63 = vadd.f32 %v534_v60, %v533_v58  ;;  %v536_v0 = vpop.f32.mrb[2].mxu1 }
  0xf8   :  { %v513_v2 = vpop.f32.mrb[3].mxu0  ;;  %v537_v3 = vpop.f32.mrb[3].mxu1 }
  0xf9   :  { %v514_v4 = vadd.f32 %v513_v2, %v512_v62  ;;  %v310_v5 = vadd.f32 %v535_v63, %v401_v1  ;;  %v538_v6 = vadd.f32 %v537_v3, %v536_v0  ;;  %v278_v7 = vadd.f32 %v511_v61, %v401_v1 }
  0xfb   :  { %v281_v8 = vadd.f32 %v514_v4, %v401_v1  ;;  %v313_v9 = vadd.f32 %v538_v6, %v401_v1 }
  0xfd   :  { %v461_v10 = vpack.c.bf16 %v281_v8, %v278_v7  ;;  %v515_v11 = vpop.f32.mrb[4].mxu0  ;;  %v481_v12 = vpack.c.bf16 %v313_v9, %v310_v5  ;;  %v539_v13 = vpop.f32.mrb[4].mxu1 }
  0xfe   :  { %v516_v14 = vpop.f32.mrb[5].mxu0  ;;  %v540_v15 = vpop.f32.mrb[5].mxu1 }
  0xff   :  { %462 = vst [vmem:[%s719_s3] sm:$0xff] %v461_v10   ;;  %v517_v16 = vadd.f32 %v516_v14, %v515_v11  ;;  %v518_v17 = vpop.f32.mrb[6].mxu0  ;;  %491 = vst [vmem:[%s719_s3 + $0x20] sm:$0xff] %v481_v12   ;;  %v541_v18 = vadd.f32 %v540_v15, %v539_v13  ;;  %v542_v19 = vpop.f32.mrb[6].mxu1 }
 0x100   :  { %v519_v20 = vpop.f32.mrb[7].mxu0  ;;  %v543_v21 = vpop.f32.mrb[7].mxu1 }
 0x101   :  { %v520_v22 = vadd.f32 %v519_v20, %v518_v17  ;;  %v318_v23 = vadd.f32 %v541_v18, %v401_v1  ;;  %v544_v24 = vadd.f32 %v543_v21, %v542_v19  ;;  %v286_v25 = vadd.f32 %v517_v16, %v401_v1 }
 0x103   :  { %v289_v26 = vadd.f32 %v520_v22, %v401_v1  ;;  %v321_v27 = vadd.f32 %v544_v24, %v401_v1 }
 0x105   :  { %v466_v28 = vpack.c.bf16 %v289_v26, %v286_v25  ;;  %v521_v29 = vpop.f32.mrb[8].mxu0  ;;  %v486_v30 = vpack.c.bf16 %v321_v27, %v318_v23  ;;  %v545_v31 = vpop.f32.mrb[8].mxu1 }
 0x106   :  { %v522_v32 = vpop.f32.mrb[9].mxu0  ;;  %v546_v33 = vpop.f32.mrb[9].mxu1 }
 0x107   :  { %488 = vst [vmem:[%s719_s3 + $0x8] sm:$0xff] %v466_v28   ;;  %v523_v34 = vadd.f32 %v522_v32, %v521_v29  ;;  %v524_v35 = vpop.f32.mrb[10].mxu0  ;;  %492 = vst [vmem:[%s719_s3 + $0x28] sm:$0xff] %v486_v30   ;;  %v547_v36 = vadd.f32 %v546_v33, %v545_v31  ;;  %v548_v37 = vpop.f32.mrb[10].mxu1 }
 0x108   :  { %v525_v38 = vpop.f32.mrb[11].mxu0  ;;  %v549_v39 = vpop.f32.mrb[11].mxu1 }
 0x109   :  { %v526_v40 = vadd.f32 %v525_v38, %v524_v35  ;;  %v326_v41 = vadd.f32 %v547_v36, %v401_v1  ;;  %v294_v42 = vadd.f32 %v523_v34, %v401_v1 }
 0x10b   :  { %v297_v43 = vadd.f32 %v526_v40, %v401_v1  ;;  %v457_v44 = vpack.c.bf16 %v326_v41, %v326_v41 }
 0x10d   :  { %v471_v45 = vpack.c.bf16 %v297_v43, %v294_v42  ;;  %v527_v46 = vpop.f32.mrb[12].mxu0  ;;  %396 = vst [vmem:[%s719_s3 + $0x30] sm:$0xf] %v457_v44 }
 0x10e   :  { %v528_v47 = vpop.f32.mrb[13].mxu0 }
 0x10f   :  { %489 = vst [vmem:[%s719_s3 + $0x10] sm:$0xff] %v471_v45   ;;  %v529_v48 = vadd.f32 %v528_v47, %v527_v46  ;;  %v530_v49 = vpop.f32.mrb[14].mxu0 }
 0x110   :  { %v531_v50 = vpop.f32.mrb[15].mxu0 }
 0x111   :  { %v532_v51 = vadd.f32 %v531_v50, %v530_v49  ;;  %v302_v52 = vadd.f32 %v529_v48, %v401_v1 }
 0x113   :  { %v305_v53 = vadd.f32 %v532_v51, %v401_v1 }
 0x115   :  { %v476_v54 = vpack.c.bf16 %v305_v53, %v302_v52 }
 0x117   :  { %490 = vst [vmem:[%s719_s3 + $0x18] sm:$0xff] %v476_v54  }

// kernel: _lambda_.27
= control target key start
LH: loop header
LB: loop body
LE: loop exit
PB: predicated region body
PF: predicated region fallthrough
CT: control target
= control target key end

     0   :  { %v655_v14 = vmov 0   ;;  %s828_s1 = inlined_call_operand.vmem [shape: bf16[256,128], index: 1, kind: input, shape index: {}]   ;;  %s829_s0 = inlined_call_operand.vmem [shape: bf16[104,256], index: 0, kind: input, shape index: {}]   ;;  %s830_s3 = inlined_call_operand.vmem [shape: bf16[104,128], index: 3, kind: input, shape index: {}]   ;;  %s831_s2 = inlined_call_operand.vmem [shape: f32[1,128], index: 2, kind: input, shape index: {}]   ;;  %s832_s4 = inlined_call_operand.vmem [shape: bf16[104,128], index: 4, kind: output, shape index: {}]  }
   0x1   :  { %v639_v0 = vld [vmem:[%s828_s1 + $0x40] sm:$0xff]   ;;  %v641_v2 = vld [vmem:[%s828_s1 + $0x48] sm:$0xff]   ;;  %v643_v4 = vld [vmem:[%s828_s1 + $0x50] sm:$0xff]  }
   0x2   :  { %v640_v1 = vld [vmem:[%s828_s1] sm:$0xff]   ;;  %564 = vmatprep.subr.bf16.mxu0 %v639_v0  ;;  %622 = vmatprep.subr.bf16.mxu1 %v639_v0  ;;  %v642_v3 = vld [vmem:[%s828_s1 + $0x8] sm:$0xff]   ;;  %v644_v5 = vld [vmem:[%s828_s1 + $0x10] sm:$0xff]  }
   0x3   :  { %565 = vmatpush3.bf16.msra.mxu0 %v640_v1  ;;  %630 = vmatpush3.bf16.msra.mxu1 %v640_v1  ;;  %v645_v6 = vld [vmem:[%s828_s1 + $0x58] sm:$0xff]   ;;  %v647_v8 = vld [vmem:[%s828_s1 + $0x60] sm:$0xff]   ;;  %v649_v10 = vld [vmem:[%s828_s1 + $0x68] sm:$0xff]  }
   0x4   :  { %566 = vmatprep.subr.bf16.mxu0 %v641_v2  ;;  %623 = vmatprep.subr.bf16.mxu1 %v641_v2  ;;  %v646_v7 = vld [vmem:[%s828_s1 + $0x18] sm:$0xff]   ;;  %v648_v9 = vld [vmem:[%s828_s1 + $0x20] sm:$0xff]   ;;  %v19_v12 = vld [vmem:[%s829_s0 + $0x8] sm:$0xff] }
   0x5   :  { %v18_v11 = vld [vmem:[%s829_s0] sm:$0xff]  ;;  %v32_v16 = vmax.bf16 %v655_v14, %v19_v12  ;;  %v27_v17 = vld [vmem:[%s829_s0 + $0x48] sm:$0xff]  ;;  %v651_v22 = vld [vmem:[%s828_s1 + $0x70] sm:$0xff]  }
   0x6   :  { %v26_v13 = vld [vmem:[%s829_s0 + $0x40] sm:$0xff]  ;;  %v31_v15 = vmax.bf16 %v655_v14, %v18_v11  ;;  %v40_v19 = vmax.bf16 %v655_v14, %v27_v17  ;;  %v650_v20 = vld [vmem:[%s828_s1 + $0x28] sm:$0xff]   ;;  %v652_v24 = vld [vmem:[%s828_s1 + $0x30] sm:$0xff]  }
   0x7   :  { %567 = vmatpush3.bf16.msra.mxu0 %v642_v3  ;;  %631 = vmatpush3.bf16.msra.mxu1 %v642_v3  ;;  %v39_v18 = vmax.bf16 %v655_v14, %v26_v13  ;;  %v653_v25 = vld [vmem:[%s828_s1 + $0x78] sm:$0xff]   ;;  %v20_v26 = vld [vmem:[%s829_s0 + $0x10] sm:$0xff]  ;;  %v22_v39 = vld [vmem:[%s829_s0 + $0x20] sm:$0xff] }
   0x8   :  { %568 = vmatprep.subr.bf16.mxu0 %v643_v4  ;;  %624 = vmatprep.subr.bf16.mxu1 %v643_v4  ;;  %v445_v21 = vcombine.high %v31_v15, %v32_v16  ;;  %v21_v27 = vld [vmem:[%s829_s0 + $0x18] sm:$0xff]  ;;  %v28_v28 = vld [vmem:[%s829_s0 + $0x50] sm:$0xff]  ;;  %v33_v30 = vmax.bf16 %v655_v14, %v20_v26  ;;  %v444_v35 = vcombine.low %v31_v15, %v32_v16  ;;  %v23_v40 = vld [vmem:[%s829_s0 + $0x28] sm:$0xff] }
   0x9   :  { %v453_v23 = vcombine.high %v39_v18, %v40_v19  ;;  %v29_v29 = vld [vmem:[%s829_s0 + $0x58] sm:$0xff]  ;;  %v34_v32 = vmax.bf16 %v655_v14, %v21_v27  ;;  %v41_v33 = vmax.bf16 %v655_v14, %v28_v28  ;;  %v452_v36 = vcombine.low %v39_v18, %v40_v19  ;;  %v30_v41 = vld [vmem:[%s829_s0 + $0x60] sm:$0xff]  ;;  %v24_v49 = vld [vmem:[%s829_s0 + $0x30] sm:$0xff] }
   0xa   :  { %278 = vmatprep.mubr.bf16.mxu0 %v445_v21  ;;  %v654_v31 = vld [vmem:[%s828_s1 + $0x38] sm:$0xff]   ;;  %v42_v34 = vmax.bf16 %v655_v14, %v29_v29  ;;  %v35_v42 = vmax.bf16 %v655_v14, %v22_v39  ;;  %v36_v43 = vmax.bf16 %v655_v14, %v23_v40  ;;  %v43_v44 = vmax.bf16 %v655_v14, %v30_v41  ;;  %v557_v57 = vld [vmem:[%s830_s3 + $0x20] sm:$0xff]   ;;  %v558_v17 = vld [vmem:[%s830_s3 + $0x28] sm:$0xff]  }
   0xb   :  { %569 = vmatpush3.bf16.msra.mxu0 %v644_v5  ;;  %632 = vmatpush3.bf16.msra.mxu1 %v644_v5  ;;  %v447_v37 = vcombine.high %v33_v30, %v34_v32  ;;  %v446_v45 = vcombine.low %v33_v30, %v34_v32  ;;  %v25_v50 = vld [vmem:[%s829_s0 + $0x38] sm:$0xff]  ;;  %v37_v51 = vmax.bf16 %v655_v14, %v24_v49  ;;  %v501_v59 = vld [vmem:[%s830_s3] sm:$0xff]   ;;  %v518_v3 = vunpack.c.l.bf16 %v557_v57  ;;  %v554_v21 = vld [vmem:[%s830_s3 + $0x8] sm:$0xff]  }
   0xc   :  { %570 = vmatprep.subr.bf16.mxu0 %v645_v6  ;;  %625 = vmatprep.subr.bf16.mxu1 %v645_v6  ;;  %v455_v38 = vcombine.high %v41_v33, %v42_v34  ;;  %v454_v46 = vcombine.low %v41_v33, %v42_v34  ;;  %v449_v47 = vcombine.high %v35_v42, %v36_v43  ;;  %v777_v61 = vld [vmem:[%s831_s2] ss:$0 sm:$0xff]  ;;  %v502_v5 = vunpack.c.l.bf16 %v501_v59  ;;  %v555_v49 = vld [vmem:[%s830_s3 + $0x10] sm:$0xff]  }
   0xd   :  { %310 = vmatprep.mubr.bf16.mxu1 %v453_v23  ;;  %v457_v48 = vcombine.high %v43_v44, %v43_v44  ;;  %v38_v52 = vmax.bf16 %v655_v14, %v25_v50  ;;  %v448_v53 = vcombine.low %v35_v42, %v36_v43  ;;  %v456_v54 = vcombine.low %v43_v44, %v43_v44 }
   0xe   :  { %v522_v26 = vunpack.c.l.bf16 %v558_v17  ;;  %v506_v33 = vunpack.c.l.bf16 %v554_v21 }
   0xf   :  { %571 = vmatpush3.bf16.msra.mxu0 %v646_v7  ;;  %633 = vmatpush3.bf16.msra.mxu1 %v646_v7  ;;  %v451_v55 = vcombine.high %v37_v51, %v38_v52  ;;  %v450_v56 = vcombine.low %v37_v51, %v38_v52  ;;  %v503_v7 = vunpack.c.h.bf16 %v501_v59 }
  0x10   :  { %572 = vmatprep.subr.bf16.mxu0 %v647_v8  ;;  %626 = vmatprep.subr.bf16.mxu1 %v647_v8 }
  0x13   :  { %573 = vmatpush3.bf16.msra.mxu0 %v648_v9  ;;  %634 = vmatpush3.bf16.msra.mxu1 %v648_v9  ;;  %v519_v9 = vunpack.c.h.bf16 %v557_v57 }
  0x14   :  { %574 = vmatprep.subr.bf16.mxu0 %v649_v10  ;;  %627 = vmatprep.subr.bf16.mxu1 %v649_v10 }
  0x17   :  { %575 = vmatpush3.bf16.msra.mxu0 %v650_v20  ;;  %635 = vmatpush3.bf16.msra.mxu1 %v650_v20 }
  0x18   :  { %576 = vmatprep.subr.bf16.mxu0 %v651_v22  ;;  %628 = vmatprep.subr.bf16.mxu1 %v651_v22 }
  0x1b   :  { %577 = vmatpush3.bf16.msra.mxu0 %v652_v24  ;;  %636 = vmatpush3.bf16.msra.mxu1 %v652_v24 }
  0x1c   :  { %578 = vmatprep.subr.bf16.mxu0 %v653_v25  ;;  %629 = vmatprep.subr.bf16.mxu1 %v653_v25 }
  0x1f   :  { %579 = vmatpush3.bf16.msra.mxu0 %v654_v31  ;;  %637 = vmatpush3.bf16.msra.mxu1 %v654_v31 }
  0x22   :  { %279 = vmatmul.mubr.bf16.vlgmr.msra.gmra.mrb[0].mxu0 %v444_v35  ;;  %311 = vmatmul.mubr.bf16.vlgmr.msra.gmra.mrb[0].mxu1 %v452_v36  ;;  %v507_v35 = vunpack.c.h.bf16 %v554_v21 }
  0x23   :  { %286 = vmatprep.mubr.bf16.mxu0 %v447_v37  ;;  %318 = vmatprep.mubr.bf16.mxu1 %v455_v38  ;;  %v523_v37 = vunpack.c.h.bf16 %v558_v17 }
  0x2a   :  { %287 = vmatmul.mubr.bf16.gmra.mrb[4].mxu0 %v446_v45  ;;  %319 = vmatmul.mubr.bf16.gmra.mrb[4].mxu1 %v454_v46  ;;  %v346_v45 = vld [vmem:[%s830_s3 + $0x30] sm:$0xf] }
  0x2b   :  { %294 = vmatprep.mubr.bf16.mxu0 %v449_v47  ;;  %326 = vmatprep.mubr.bf16.mxu1 %v457_v48 }
  0x32   :  { %295 = vmatmul.mubr.bf16.gmra.mrb[8].mxu0 %v448_v53  ;;  %327 = vmatmul.mubr.bf16.gmra.mrb[8].mxu1 %v456_v54  ;;  %v359_v54 = vunpack.c.l.bf16 %v346_v45 }
  0x33   :  { %302 = vmatprep.mubr.bf16.mxu0 %v451_v55 }
  0x3a   :  { %303 = vmatmul.mubr.bf16.gmra.mrb[12].mxu0 %v450_v56 }
  0xf5   :  { %v580_v58 = vpop.f32.mrb[0].mxu0  ;;  %v604_v60 = vpop.f32.mrb[0].mxu1 }
  0xf6   :  { %v581_v62 = vpop.f32.mrb[1].mxu0  ;;  %v605_v63 = vpop.f32.mrb[1].mxu1 }
  0xf7   :  { %v582_v0 = vadd.f32 %v581_v62, %v580_v58  ;;  %v583_v1 = vpop.f32.mrb[2].mxu0  ;;  %v606_v2 = vadd.f32 %v605_v63, %v604_v60  ;;  %v607_v4 = vpop.f32.mrb[2].mxu1  ;;  %v510_v62 = vunpack.c.l.bf16 %v555_v49 }
  0xf8   :  { %v584_v6 = vpop.f32.mrb[3].mxu0  ;;  %v608_v8 = vpop.f32.mrb[3].mxu1 }
  0xf9   :  { %v281_v10 = vadd.f32 %v582_v0, %v777_v61  ;;  %v585_v11 = vadd.f32 %v584_v6, %v583_v1  ;;  %v313_v12 = vadd.f32 %v606_v2, %v777_v61  ;;  %v609_v13 = vadd.f32 %v608_v8, %v607_v4 }
  0xfb   :  { %v284_v14 = vadd.f32 %v585_v11, %v777_v61  ;;  %v368_v15 = vadd.f32 %v518_v3, %v313_v12  ;;  %v316_v16 = vadd.f32 %v609_v13, %v777_v61  ;;  %v360_v18 = vadd.f32 %v502_v5, %v281_v10  ;;  %v556_v12 = vld [vmem:[%s830_s3 + $0x18] sm:$0xff]  }
  0xfc   :  { %v511_v3 = vunpack.c.h.bf16 %v555_v49 }
  0xfd   :  { %v361_v19 = vadd.f32 %v503_v7, %v284_v14  ;;  %v586_v20 = vpop.f32.mrb[4].mxu0  ;;  %v369_v22 = vadd.f32 %v519_v9, %v316_v16  ;;  %v610_v23 = vpop.f32.mrb[4].mxu1 }
  0xfe   :  { %v587_v24 = vpop.f32.mrb[5].mxu0  ;;  %v611_v25 = vpop.f32.mrb[5].mxu1 }
  0xff   :  { %v527_v27 = vpack.c.bf16 %v361_v19, %v360_v18  ;;  %v588_v28 = vadd.f32 %v587_v24, %v586_v20  ;;  %v589_v29 = vpop.f32.mrb[6].mxu0  ;;  %v547_v30 = vpack.c.bf16 %v369_v22, %v368_v15  ;;  %v612_v31 = vadd.f32 %v611_v25, %v610_v23  ;;  %v613_v32 = vpop.f32.mrb[6].mxu1 }
 0x100   :  { %v590_v34 = vpop.f32.mrb[7].mxu0  ;;  %v614_v36 = vpop.f32.mrb[7].mxu1  ;;  %v514_v18 = vunpack.c.l.bf16 %v556_v12  ;;  %v515_v20 = vunpack.c.h.bf16 %v556_v12 }
 0x101   :  { %528 = vst [vmem:[%s832_s4] sm:$0xff] %v527_v27   ;;  %v289_v38 = vadd.f32 %v588_v28, %v777_v61  ;;  %562 = vst [vmem:[%s832_s4 + $0x20] sm:$0xff] %v547_v30   ;;  %v591_v39 = vadd.f32 %v590_v34, %v589_v29  ;;  %v321_v40 = vadd.f32 %v612_v31, %v777_v61 }
 0x102   :  { %v615_v41 = vadd.f32 %v614_v36, %v613_v32 }
 0x103   :  { %v292_v42 = vadd.f32 %v591_v39, %v777_v61  ;;  %v370_v43 = vadd.f32 %v522_v26, %v321_v40  ;;  %v362_v46 = vadd.f32 %v506_v33, %v289_v38 }
 0x104   :  { %v324_v44 = vadd.f32 %v615_v41, %v777_v61 }
 0x105   :  { %v363_v47 = vadd.f32 %v507_v35, %v292_v42  ;;  %v592_v48 = vpop.f32.mrb[8].mxu0  ;;  %v616_v51 = vpop.f32.mrb[8].mxu1 }
 0x106   :  { %v371_v50 = vadd.f32 %v523_v37, %v324_v44  ;;  %v593_v52 = vpop.f32.mrb[9].mxu0  ;;  %v617_v53 = vpop.f32.mrb[9].mxu1 }
 0x107   :  { %v532_v55 = vpack.c.bf16 %v363_v47, %v362_v46  ;;  %v594_v56 = vadd.f32 %v593_v52, %v592_v48  ;;  %v595_v57 = vpop.f32.mrb[10].mxu0  ;;  %v618_v59 = vadd.f32 %v617_v53, %v616_v51  ;;  %v619_v60 = vpop.f32.mrb[10].mxu1 }
 0x108   :  { %v552_v58 = vpack.c.bf16 %v371_v50, %v370_v43  ;;  %v596_v63 = vpop.f32.mrb[11].mxu0  ;;  %v620_v0 = vpop.f32.mrb[11].mxu1 }
 0x109   :  { %559 = vst [vmem:[%s832_s4 + $0x8] sm:$0xff] %v532_v55   ;;  %v297_v1 = vadd.f32 %v594_v56, %v777_v61  ;;  %v597_v2 = vadd.f32 %v596_v63, %v595_v57  ;;  %v329_v4 = vadd.f32 %v618_v59, %v777_v61 }
 0x10a   :  { %563 = vst [vmem:[%s832_s4 + $0x28] sm:$0xff] %v552_v58  }
 0x10b   :  { %v300_v5 = vadd.f32 %v597_v2, %v777_v61  ;;  %v372_v6 = vadd.f32 %v359_v54, %v329_v4  ;;  %v364_v7 = vadd.f32 %v510_v62, %v297_v1 }
 0x10d   :  { %v365_v8 = vadd.f32 %v511_v3, %v300_v5  ;;  %v598_v9 = vpop.f32.mrb[12].mxu0  ;;  %v499_v10 = vpack.c.bf16 %v372_v6, %v372_v6 }
 0x10e   :  { %v599_v11 = vpop.f32.mrb[13].mxu0 }
 0x10f   :  { %v537_v13 = vpack.c.bf16 %v365_v8, %v364_v7  ;;  %438 = vst [vmem:[%s832_s4 + $0x30] sm:$0xf] %v499_v10  ;;  %v600_v14 = vadd.f32 %v599_v11, %v598_v9  ;;  %v601_v15 = vpop.f32.mrb[14].mxu0 }
 0x110   :  { %v602_v16 = vpop.f32.mrb[15].mxu0 }
 0x111   :  { %560 = vst [vmem:[%s832_s4 + $0x10] sm:$0xff] %v537_v13   ;;  %v305_v17 = vadd.f32 %v600_v14, %v777_v61  ;;  %v603_v19 = vadd.f32 %v602_v16, %v601_v15 }
 0x113   :  { %v308_v21 = vadd.f32 %v603_v19, %v777_v61  ;;  %v366_v22 = vadd.f32 %v514_v18, %v305_v17 }
 0x115   :  { %v367_v23 = vadd.f32 %v515_v20, %v308_v21 }
 0x117   :  { %v542_v24 = vpack.c.bf16 %v367_v23, %v366_v22 }
 0x119   :  { %561 = vst [vmem:[%s832_s4 + $0x18] sm:$0xff] %v542_v24  }

// kernel: _lambda_.28
= control target key start
LH: loop header
LB: loop body
LE: loop exit
PB: predicated region body
PF: predicated region fallthrough
CT: control target
= control target key end

     0   :  { %s442_s1 = inlined_call_operand.vmem [shape: bf16[256,128], index: 1, kind: input, shape index: {}]   ;;  %s443_s0 = inlined_call_operand.vmem [shape: bf16[32,256], index: 0, kind: input, shape index: {}]   ;;  %s444_s2 = inlined_call_operand.vmem [shape: f32[1,128], index: 2, kind: input, shape index: {}]   ;;  %s445_s3 = inlined_call_operand.vmem [shape: bf16[32,128], index: 3, kind: output, shape index: {}]  }
   0x1   :  { %v331_v0 = vld [vmem:[%s442_s1 + $0x40] sm:$0xff]   ;;  %v333_v2 = vld [vmem:[%s442_s1 + $0x48] sm:$0xff]   ;;  %v335_v4 = vld [vmem:[%s442_s1 + $0x50] sm:$0xff]  }
   0x2   :  { %v332_v1 = vld [vmem:[%s442_s1] sm:$0xff]   ;;  %287 = vmatprep.subr.bf16.mxu0 %v331_v0  ;;  %315 = vmatprep.subr.bf16.mxu1 %v331_v0  ;;  %v334_v3 = vld [vmem:[%s442_s1 + $0x8] sm:$0xff]   ;;  %v336_v5 = vld [vmem:[%s442_s1 + $0x10] sm:$0xff]  }
   0x3   :  { %288 = vmatpush3.bf16.msra.mxu0 %v332_v1  ;;  %323 = vmatpush3.bf16.msra.mxu1 %v332_v1  ;;  %v337_v6 = vld [vmem:[%s442_s1 + $0x58] sm:$0xff]   ;;  %v339_v8 = vld [vmem:[%s442_s1 + $0x60] sm:$0xff]   ;;  %v341_v10 = vld [vmem:[%s442_s1 + $0x68] sm:$0xff]  }
   0x4   :  { %289 = vmatprep.subr.bf16.mxu0 %v333_v2  ;;  %316 = vmatprep.subr.bf16.mxu1 %v333_v2  ;;  %v338_v7 = vld [vmem:[%s442_s1 + $0x18] sm:$0xff]   ;;  %v340_v9 = vld [vmem:[%s442_s1 + $0x20] sm:$0xff]   ;;  %v342_v13 = vld [vmem:[%s442_s1 + $0x28] sm:$0xff]  }
   0x5   :  { %v349_v11 = vld [vmem:[%s443_s0 + $0x4] ss:$8 sps:$4 sm:$0xff]   ;;  %v352_v12 = vld [vmem:[%s443_s0 + $0x14] ss:$8 sps:$4 sm:$0xff]   ;;  %v347_v18 = vld [vmem:[%s443_s0] ss:$8 sps:$4 sm:$0xff]  }
   0x6   :  { %v343_v14 = vld [vmem:[%s442_s1 + $0x70] sm:$0xff]   ;;  %206 = vmatprep.mubr.bf16.mxu0 %v349_v11  ;;  %214 = vmatprep.mubr.bf16.mxu1 %v352_v12  ;;  %v345_v16 = vld [vmem:[%s442_s1 + $0x78] sm:$0xff]   ;;  %v247_v28 = vld [vmem:[%s444_s2] ss:$0 sm:$0xff] }
   0x7   :  { %290 = vmatpush3.bf16.msra.mxu0 %v334_v3  ;;  %324 = vmatpush3.bf16.msra.mxu1 %v334_v3  ;;  %v344_v15 = vld [vmem:[%s442_s1 + $0x30] sm:$0xff]   ;;  %v346_v17 = vld [vmem:[%s442_s1 + $0x38] sm:$0xff]  }
   0x8   :  { %291 = vmatprep.subr.bf16.mxu0 %v335_v4  ;;  %317 = vmatprep.subr.bf16.mxu1 %v335_v4  ;;  %v350_v19 = vld [vmem:[%s443_s0 + $0x10] ss:$8 sps:$4 sm:$0xff]  }
   0xb   :  { %292 = vmatpush3.bf16.msra.mxu0 %v336_v5  ;;  %325 = vmatpush3.bf16.msra.mxu1 %v336_v5 }
   0xc   :  { %293 = vmatprep.subr.bf16.mxu0 %v337_v6  ;;  %318 = vmatprep.subr.bf16.mxu1 %v337_v6 }
   0xf   :  { %294 = vmatpush3.bf16.msra.mxu0 %v338_v7  ;;  %326 = vmatpush3.bf16.msra.mxu1 %v338_v7 }
  0x10   :  { %295 = vmatprep.subr.bf16.mxu0 %v339_v8  ;;  %319 = vmatprep.subr.bf16.mxu1 %v339_v8 }
  0x13   :  { %296 = vmatpush3.bf16.msra.mxu0 %v340_v9  ;;  %327 = vmatpush3.bf16.msra.mxu1 %v340_v9 }
  0x14   :  { %297 = vmatprep.subr.bf16.mxu0 %v341_v10  ;;  %320 = vmatprep.subr.bf16.mxu1 %v341_v10 }
  0x17   :  { %298 = vmatpush3.bf16.msra.mxu0 %v342_v13  ;;  %328 = vmatpush3.bf16.msra.mxu1 %v342_v13 }
  0x18   :  { %299 = vmatprep.subr.bf16.mxu0 %v343_v14  ;;  %321 = vmatprep.subr.bf16.mxu1 %v343_v14 }
  0x1b   :  { %300 = vmatpush3.bf16.msra.mxu0 %v344_v15  ;;  %329 = vmatpush3.bf16.msra.mxu1 %v344_v15 }
  0x1c   :  { %301 = vmatprep.subr.bf16.mxu0 %v345_v16  ;;  %322 = vmatprep.subr.bf16.mxu1 %v345_v16 }
  0x1f   :  { %302 = vmatpush3.bf16.msra.mxu0 %v346_v17  ;;  %330 = vmatpush3.bf16.msra.mxu1 %v346_v17 }
  0x22   :  { %207 = vmatmul.mubr.bf16.vlgmr.msra.gmra.mrb[0].mxu0 %v347_v18  ;;  %215 = vmatmul.mubr.bf16.vlgmr.msra.gmra.mrb[0].mxu1 %v350_v19 }
  0xf5   :  { %v303_v20 = vpop.f32.mrb[0].mxu0  ;;  %v309_v21 = vpop.f32.mrb[0].mxu1 }
  0xf6   :  { %v304_v22 = vpop.f32.mrb[1].mxu0  ;;  %v310_v23 = vpop.f32.mrb[1].mxu1 }
  0xf7   :  { %v305_v24 = vadd.f32 %v304_v22, %v303_v20  ;;  %v311_v25 = vadd.f32 %v310_v23, %v309_v21  ;;  %v306_v26 = vpop.f32.mrb[2].mxu0  ;;  %v312_v27 = vpop.f32.mrb[2].mxu1 }
  0xf8   :  { %v307_v29 = vpop.f32.mrb[3].mxu0  ;;  %v313_v30 = vpop.f32.mrb[3].mxu1 }
  0xf9   :  { %v308_v31 = vadd.f32 %v307_v29, %v306_v26  ;;  %v314_v32 = vadd.f32 %v313_v30, %v312_v27  ;;  %v209_v33 = vadd.f32 %v305_v24, %v247_v28  ;;  %v217_v34 = vadd.f32 %v311_v25, %v247_v28 }
  0xfb   :  { %v212_v35 = vadd.f32 %v308_v31, %v247_v28  ;;  %v220_v36 = vadd.f32 %v314_v32, %v247_v28 }
  0xfd   :  { %v279_v37 = vpack.c.bf16 %v212_v35, %v209_v33  ;;  %v284_v38 = vpack.c.bf16 %v220_v36, %v217_v34 }
  0xff   :  { %280 = vst [vmem:[%s445_s3] sm:$0xff] %v279_v37   ;;  %286 = vst [vmem:[%s445_s3 + $0x8] sm:$0xff] %v284_v38  }

// kernel: _lambda_.31
= control target key start
LH: loop header
LB: loop body
LE: loop exit
PB: predicated region body
PF: predicated region fallthrough
CT: control target
= control target key end

     0   :  { %v495_v34 = vmov 0   ;;  %s624_s1 = inlined_call_operand.vmem [shape: bf16[512,128], index: 1, kind: input, shape index: {}]   ;;  %s625_s0 = inlined_call_operand.vmem [shape: bf16[8,512], index: 0, kind: input, shape index: {}]   ;;  %s626_s2 = inlined_call_operand.vmem [shape: f32[1,128], index: 2, kind: input, shape index: {}]   ;;  %s627_s3 = inlined_call_operand.vmem [shape: f32[8,128], index: 3, kind: output, shape index: {}]  }
   0x1   :  { %v463_v0 = vld [vmem:[%s624_s1 + $0x40] sm:$0xff]   ;;  %v467_v4 = vld [vmem:[%s624_s1 + $0x48] sm:$0xff]   ;;  %v471_v8 = vld [vmem:[%s624_s1 + $0x50] sm:$0xff]  }
   0x2   :  { %v464_v1 = vld [vmem:[%s624_s1 + $0xc0] sm:$0xff]   ;;  %418 = vmatprep.subr.bf16.mxu0 %v463_v0  ;;  %v468_v5 = vld [vmem:[%s624_s1 + $0xc8] sm:$0xff]   ;;  %v472_v9 = vld [vmem:[%s624_s1 + $0xd0] sm:$0xff]  }
   0x3   :  { %v465_v2 = vld [vmem:[%s624_s1] sm:$0xff]   ;;  %440 = vmatprep.subr.bf16.mxu1 %v464_v1  ;;  %v469_v6 = vld [vmem:[%s624_s1 + $0x8] sm:$0xff]   ;;  %v473_v10 = vld [vmem:[%s624_s1 + $0x10] sm:$0xff]  }
   0x4   :  { %v466_v3 = vld [vmem:[%s624_s1 + $0x80] sm:$0xff]   ;;  %419 = vmatpush3.bf16.msra.mxu0 %v465_v2  ;;  %v470_v7 = vld [vmem:[%s624_s1 + $0x88] sm:$0xff]   ;;  %v474_v11 = vld [vmem:[%s624_s1 + $0x90] sm:$0xff]  }
   0x5   :  { %441 = vmatpush3.bf16.msra.mxu1 %v466_v3  ;;  %420 = vmatprep.subr.bf16.mxu0 %v467_v4  ;;  %v475_v12 = vld [vmem:[%s624_s1 + $0x58] sm:$0xff]   ;;  %v479_v16 = vld [vmem:[%s624_s1 + $0x60] sm:$0xff]   ;;  %v483_v20 = vld [vmem:[%s624_s1 + $0x68] sm:$0xff]  }
   0x6   :  { %442 = vmatprep.subr.bf16.mxu1 %v468_v5  ;;  %v476_v13 = vld [vmem:[%s624_s1 + $0xd8] sm:$0xff]   ;;  %v480_v17 = vld [vmem:[%s624_s1 + $0xe0] sm:$0xff]   ;;  %v484_v21 = vld [vmem:[%s624_s1 + $0xe8] sm:$0xff]  }
   0x7   :  { %v477_v14 = vld [vmem:[%s624_s1 + $0x18] sm:$0xff]   ;;  %v481_v18 = vld [vmem:[%s624_s1 + $0x20] sm:$0xff]   ;;  %v485_v22 = vld [vmem:[%s624_s1 + $0x28] sm:$0xff]  }
   0x8   :  { %421 = vmatpush3.bf16.msra.mxu0 %v469_v6  ;;  %v478_v15 = vld [vmem:[%s624_s1 + $0x98] sm:$0xff]   ;;  %v482_v19 = vld [vmem:[%s624_s1 + $0xa0] sm:$0xff]   ;;  %v486_v23 = vld [vmem:[%s624_s1 + $0xa8] sm:$0xff]  }
   0x9   :  { %443 = vmatpush3.bf16.msra.mxu1 %v470_v7  ;;  %422 = vmatprep.subr.bf16.mxu0 %v471_v8  ;;  %v487_v24 = vld [vmem:[%s624_s1 + $0x70] sm:$0xff]   ;;  %v491_v28 = vld [vmem:[%s624_s1 + $0x78] sm:$0xff]   ;;  %v15_v32 = vld [vmem:[%s625_s0] sm:$0xff] }
   0xa   :  { %444 = vmatprep.subr.bf16.mxu1 %v472_v9  ;;  %v488_v25 = vld [vmem:[%s624_s1 + $0xf0] sm:$0xff]   ;;  %v492_v29 = vld [vmem:[%s624_s1 + $0xf8] sm:$0xff]   ;;  %v16_v33 = vld [vmem:[%s625_s0 + $0x8] sm:$0xff]  ;;  %v17_v35 = vmax.bf16 %v495_v34, %v15_v32 }
   0xb   :  { %v489_v26 = vld [vmem:[%s624_s1 + $0x30] sm:$0xff]   ;;  %v493_v30 = vld [vmem:[%s624_s1 + $0x38] sm:$0xff]   ;;  %v18_v36 = vmax.bf16 %v495_v34, %v16_v33  ;;  %v381_v43 = vld [vmem:[%s626_s2] ss:$0 sm:$0xff] }
   0xc   :  { %423 = vmatpush3.bf16.msra.mxu0 %v473_v10  ;;  %v490_v27 = vld [vmem:[%s624_s1 + $0xb0] sm:$0xff]   ;;  %v494_v31 = vld [vmem:[%s624_s1 + $0xb8] sm:$0xff]   ;;  %v383_v37 = vcombine.high %v17_v35, %v17_v35  ;;  %v382_v39 = vcombine.low %v17_v35, %v17_v35 }
   0xd   :  { %445 = vmatpush3.bf16.msra.mxu1 %v474_v11  ;;  %424 = vmatprep.subr.bf16.mxu0 %v475_v12  ;;  %v385_v38 = vcombine.high %v18_v36, %v18_v36  ;;  %v384_v40 = vcombine.low %v18_v36, %v18_v36 }
   0xe   :  { %446 = vmatprep.subr.bf16.mxu1 %v476_v13  ;;  %328 = vmatprep.mubr.bf16.mxu0 %v383_v37 }
   0xf   :  { %368 = vmatprep.mubr.bf16.mxu1 %v385_v38 }
  0x10   :  { %425 = vmatpush3.bf16.msra.mxu0 %v477_v14 }
  0x11   :  { %447 = vmatpush3.bf16.msra.mxu1 %v478_v15  ;;  %426 = vmatprep.subr.bf16.mxu0 %v479_v16 }
  0x12   :  { %448 = vmatprep.subr.bf16.mxu1 %v480_v17 }
  0x14   :  { %427 = vmatpush3.bf16.msra.mxu0 %v481_v18 }
  0x15   :  { %449 = vmatpush3.bf16.msra.mxu1 %v482_v19  ;;  %428 = vmatprep.subr.bf16.mxu0 %v483_v20 }
  0x16   :  { %450 = vmatprep.subr.bf16.mxu1 %v484_v21 }
  0x18   :  { %429 = vmatpush3.bf16.msra.mxu0 %v485_v22 }
  0x19   :  { %451 = vmatpush3.bf16.msra.mxu1 %v486_v23  ;;  %430 = vmatprep.subr.bf16.mxu0 %v487_v24 }
  0x1a   :  { %452 = vmatprep.subr.bf16.mxu1 %v488_v25 }
  0x1c   :  { %431 = vmatpush3.bf16.msra.mxu0 %v489_v26 }
  0x1d   :  { %453 = vmatpush3.bf16.msra.mxu1 %v490_v27  ;;  %432 = vmatprep.subr.bf16.mxu0 %v491_v28 }
  0x1e   :  { %454 = vmatprep.subr.bf16.mxu1 %v492_v29 }
  0x20   :  { %433 = vmatpush3.bf16.msra.mxu0 %v493_v30 }
  0x21   :  { %455 = vmatpush3.bf16.msra.mxu1 %v494_v31 }
  0x23   :  { %329 = vmatmul.mubr.bf16.vlgmr.msra.gmra.mrb[0].mxu0 %v382_v39 }
  0x24   :  { %369 = vmatmul.mubr.bf16.vlgmr.msra.gmra.mrb[0].mxu1 %v384_v40 }
  0xf6   :  { %v434_v41 = vpop.f32.mrb[0].mxu0 }
  0xf7   :  { %v456_v42 = vpop.f32.mrb[0].mxu1  ;;  %v435_v44 = vpop.f32.mrb[1].mxu0 }
  0xf8   :  { %v457_v45 = vpop.f32.mrb[1].mxu1  ;;  %v436_v46 = vadd.f32 %v435_v44, %v434_v41  ;;  %v437_v48 = vpop.f32.mrb[2].mxu0 }
  0xf9   :  { %v458_v47 = vadd.f32 %v457_v45, %v456_v42  ;;  %v459_v49 = vpop.f32.mrb[2].mxu1  ;;  %v438_v50 = vpop.f32.mrb[3].mxu0 }
  0xfa   :  { %v460_v51 = vpop.f32.mrb[3].mxu1  ;;  %v331_v52 = vadd.f32 %v436_v46, %v381_v43 }
  0xfc   :  { %v371_v53 = vadd.f32 %v458_v47, %v331_v52 }
  0xfe   :  { %376 = vst [vmem:[%s627_s3] sm:$0xff] %v371_v53 }

// kernel: _lambda_.30
= control target key start
LH: loop header
LB: loop body
LE: loop exit
PB: predicated region body
PF: predicated region fallthrough
CT: control target
= control target key end

     0   :  { %v376_v14 = vmov 0   ;;  %s477_s1 = inlined_call_operand.vmem [shape: bf16[256,128], index: 1, kind: input, shape index: {}]   ;;  %s478_s0 = inlined_call_operand.vmem [shape: bf16[32,256], index: 0, kind: input, shape index: {}]   ;;  %s479_s3 = inlined_call_operand.vmem [shape: bf16[32,128], index: 3, kind: input, shape index: {}]   ;;  %s480_s2 = inlined_call_operand.vmem [shape: f32[1,128], index: 2, kind: input, shape index: {}]   ;;  %s481_s4 = inlined_call_operand.vmem [shape: bf16[32,128], index: 4, kind: output, shape index: {}]  }
   0x1   :  { %v360_v0 = vld [vmem:[%s477_s1 + $0x40] sm:$0xff]   ;;  %v362_v2 = vld [vmem:[%s477_s1 + $0x48] sm:$0xff]   ;;  %v364_v4 = vld [vmem:[%s477_s1 + $0x50] sm:$0xff]  }
   0x2   :  { %v361_v1 = vld [vmem:[%s477_s1] sm:$0xff]   ;;  %315 = vmatprep.subr.bf16.mxu0 %v360_v0  ;;  %343 = vmatprep.subr.bf16.mxu1 %v360_v0  ;;  %v363_v3 = vld [vmem:[%s477_s1 + $0x8] sm:$0xff]   ;;  %v365_v5 = vld [vmem:[%s477_s1 + $0x10] sm:$0xff]  }
   0x3   :  { %316 = vmatpush3.bf16.msra.mxu0 %v361_v1  ;;  %351 = vmatpush3.bf16.msra.mxu1 %v361_v1  ;;  %v366_v6 = vld [vmem:[%s477_s1 + $0x58] sm:$0xff]   ;;  %v368_v8 = vld [vmem:[%s477_s1 + $0x60] sm:$0xff]   ;;  %v370_v10 = vld [vmem:[%s477_s1 + $0x68] sm:$0xff]  }
   0x4   :  { %317 = vmatprep.subr.bf16.mxu0 %v362_v2  ;;  %344 = vmatprep.subr.bf16.mxu1 %v362_v2  ;;  %v367_v7 = vld [vmem:[%s477_s1 + $0x18] sm:$0xff]   ;;  %v369_v9 = vld [vmem:[%s477_s1 + $0x20] sm:$0xff]   ;;  %v19_v12 = vld [vmem:[%s478_s0 + $0x8] sm:$0xff] }
   0x5   :  { %v18_v11 = vld [vmem:[%s478_s0] sm:$0xff]  ;;  %v20_v13 = vld [vmem:[%s478_s0 + $0x10] sm:$0xff]  ;;  %v23_v16 = vmax.bf16 %v376_v14, %v19_v12  ;;  %v21_v17 = vld [vmem:[%s478_s0 + $0x18] sm:$0xff] }
   0x6   :  { %v22_v15 = vmax.bf16 %v376_v14, %v18_v11  ;;  %v24_v18 = vmax.bf16 %v376_v14, %v20_v13  ;;  %v25_v19 = vmax.bf16 %v376_v14, %v21_v17  ;;  %v371_v20 = vld [vmem:[%s477_s1 + $0x28] sm:$0xff]   ;;  %v372_v22 = vld [vmem:[%s477_s1 + $0x70] sm:$0xff]   ;;  %v374_v25 = vld [vmem:[%s477_s1 + $0x78] sm:$0xff]  }
   0x7   :  { %318 = vmatpush3.bf16.msra.mxu0 %v363_v3  ;;  %352 = vmatpush3.bf16.msra.mxu1 %v363_v3  ;;  %v373_v24 = vld [vmem:[%s477_s1 + $0x30] sm:$0xff]   ;;  %v375_v26 = vld [vmem:[%s477_s1 + $0x38] sm:$0xff]   ;;  %v296_v31 = vld [vmem:[%s479_s3] sm:$0xff]  }
   0x8   :  { %319 = vmatprep.subr.bf16.mxu0 %v364_v4  ;;  %345 = vmatprep.subr.bf16.mxu1 %v364_v4  ;;  %v268_v21 = vcombine.high %v22_v15, %v23_v16  ;;  %v270_v23 = vcombine.high %v24_v18, %v25_v19  ;;  %v267_v27 = vcombine.low %v22_v15, %v23_v16  ;;  %v313_v32 = vld [vmem:[%s479_s3 + $0x8] sm:$0xff]   ;;  %v266_v33 = vld [vmem:[%s480_s2] ss:$0 sm:$0xff]  ;;  %v297_v40 = vunpack.c.l.bf16 %v296_v31 }
   0x9   :  { %v269_v28 = vcombine.low %v24_v18, %v25_v19  ;;  %v301_v41 = vunpack.c.l.bf16 %v313_v32  ;;  %v298_v43 = vunpack.c.h.bf16 %v296_v31  ;;  %v302_v45 = vunpack.c.h.bf16 %v313_v32 }
   0xa   :  { %213 = vmatprep.mubr.bf16.mxu0 %v268_v21  ;;  %221 = vmatprep.mubr.bf16.mxu1 %v270_v23 }
   0xb   :  { %320 = vmatpush3.bf16.msra.mxu0 %v365_v5  ;;  %353 = vmatpush3.bf16.msra.mxu1 %v365_v5 }
   0xc   :  { %321 = vmatprep.subr.bf16.mxu0 %v366_v6  ;;  %346 = vmatprep.subr.bf16.mxu1 %v366_v6 }
   0xf   :  { %322 = vmatpush3.bf16.msra.mxu0 %v367_v7  ;;  %354 = vmatpush3.bf16.msra.mxu1 %v367_v7 }
  0x10   :  { %323 = vmatprep.subr.bf16.mxu0 %v368_v8  ;;  %347 = vmatprep.subr.bf16.mxu1 %v368_v8 }
  0x13   :  { %324 = vmatpush3.bf16.msra.mxu0 %v369_v9  ;;  %355 = vmatpush3.bf16.msra.mxu1 %v369_v9 }
  0x14   :  { %325 = vmatprep.subr.bf16.mxu0 %v370_v10  ;;  %348 = vmatprep.subr.bf16.mxu1 %v370_v10 }
  0x17   :  { %326 = vmatpush3.bf16.msra.mxu0 %v371_v20  ;;  %356 = vmatpush3.bf16.msra.mxu1 %v371_v20 }
  0x18   :  { %327 = vmatprep.subr.bf16.mxu0 %v372_v22  ;;  %349 = vmatprep.subr.bf16.mxu1 %v372_v22 }
  0x1b   :  { %328 = vmatpush3.bf16.msra.mxu0 %v373_v24  ;;  %357 = vmatpush3.bf16.msra.mxu1 %v373_v24 }
  0x1c   :  { %329 = vmatprep.subr.bf16.mxu0 %v374_v25  ;;  %350 = vmatprep.subr.bf16.mxu1 %v374_v25 }
  0x1f   :  { %330 = vmatpush3.bf16.msra.mxu0 %v375_v26  ;;  %358 = vmatpush3.bf16.msra.mxu1 %v375_v26 }
  0x22   :  { %214 = vmatmul.mubr.bf16.vlgmr.msra.gmra.mrb[0].mxu0 %v267_v27  ;;  %222 = vmatmul.mubr.bf16.vlgmr.msra.gmra.mrb[0].mxu1 %v269_v28 }
  0xf5   :  { %v331_v29 = vpop.f32.mrb[0].mxu0  ;;  %v337_v30 = vpop.f32.mrb[0].mxu1 }
  0xf6   :  { %v332_v34 = vpop.f32.mrb[1].mxu0  ;;  %v338_v35 = vpop.f32.mrb[1].mxu1 }
  0xf7   :  { %v333_v36 = vadd.f32 %v332_v34, %v331_v29  ;;  %v339_v37 = vadd.f32 %v338_v35, %v337_v30  ;;  %v334_v38 = vpop.f32.mrb[2].mxu0  ;;  %v340_v39 = vpop.f32.mrb[2].mxu1 }
  0xf8   :  { %v335_v42 = vpop.f32.mrb[3].mxu0  ;;  %v341_v44 = vpop.f32.mrb[3].mxu1 }
  0xf9   :  { %v216_v46 = vadd.f32 %v333_v36, %v266_v33  ;;  %v224_v47 = vadd.f32 %v339_v37, %v266_v33  ;;  %v336_v48 = vadd.f32 %v335_v42, %v334_v38  ;;  %v342_v49 = vadd.f32 %v341_v44, %v340_v39 }
  0xfb   :  { %v219_v50 = vadd.f32 %v336_v48, %v266_v33  ;;  %v227_v51 = vadd.f32 %v342_v49, %v266_v33  ;;  %v238_v52 = vadd.f32 %v297_v40, %v216_v46  ;;  %v240_v53 = vadd.f32 %v301_v41, %v224_v47 }
  0xfd   :  { %v239_v54 = vadd.f32 %v298_v43, %v219_v50  ;;  %v241_v55 = vadd.f32 %v302_v45, %v227_v51 }
  0xff   :  { %v306_v56 = vpack.c.bf16 %v239_v54, %v238_v52  ;;  %v311_v57 = vpack.c.bf16 %v241_v55, %v240_v53 }
 0x101   :  { %307 = vst [vmem:[%s481_s4] sm:$0xff] %v306_v56   ;;  %314 = vst [vmem:[%s481_s4 + $0x8] sm:$0xff] %v311_v57  }

</bundles_post_ra>
